<compile_context>
chip_gen: v7x
topology: tpu7x:2x2x1
jax: 0.10.0
libtpu: 0.0.40
codegen_flags: <defaults>
</compile_context>

<pallas_src>
import math
import functools

import jax
import jax.numpy as jnp
from jax.experimental import pallas as pl
from jax.experimental.pallas import tpu as pltpu


def _layernorm(x, w, b, eps=1e-5):
    mu = jnp.mean(x, axis=-1, keepdims=True)
    var = jnp.mean(jnp.square(x - mu), axis=-1, keepdims=True)
    return (x - mu) * jax.lax.rsqrt(var + eps) * w + b


def _gelu_tanh(x):
    # tanh-approximate GELU (tanh lowers to the EUP slot). Max deviation from exact
    # erf-GELU ~1e-3, far below the bf16-matmul noise floor of this kernel.
    c = math.sqrt(2.0 / math.pi)
    return 0.5 * x * (1.0 + jnp.tanh(c * (x + 0.044715 * x * x * x)))


def _is_v5e():
    try:
        kind = jax.devices()[0].device_kind.lower()
        return ("v5 lite" in kind) or ("v5e" in kind) or ("v5litepod" in kind)
    except Exception:
        return False


def _vmem_limit_bytes():
    # Generation-aware scoped-VMEM budget: ~56 MiB on v7x (64 MiB physical),
    # ~110 MiB on v5e/v6e (128 MiB physical). Conservative default if the query fails.
    try:
        info = pltpu.get_tpu_info()
        vmem = getattr(info, "vmem_capacity_bytes", None)
        if vmem:
            return int(min(vmem - vmem // 8, 110 * 1024 * 1024))
    except Exception:
        pass
    return 56 * 1024 * 1024


def _pick_tile(T, pref):
    for c in (pref, 256, 128, 64, 32, 16, 8):
        if c <= T and T % c == 0:
            return c
    return T


def transformer_kernel(n_head, TS, NQ, NF, FCH,
                       x_ref,
                       ln1w_ref, ln1b_ref,
                       wq_ref, wk_ref, wv_ref,
                       bq_ref, bk_ref, bv_ref,
                       wo_ref, bo_ref,
                       ln2w_ref, ln2b_ref,
                       wfc_ref, bfc_ref,
                       wpr_ref, bpr_ref,
                       o_ref,
                       k_scr, v_scr, h1_scr, ho_scr):
    T, C = x_ref.shape                     # leading batch dim is squeezed by the BlockSpec
    hs = C // n_head
    qi = pl.program_id(1)
    bf16 = jnp.bfloat16

    ln1w = ln1w_ref[0]
    ln1b = ln1b_ref[0]

    # ---------------- prologue: LN1 + K/V for the full sequence, once per batch ----------
    # Runs at qi == 0 only; results live in VMEM scratch and are reused by every query tile.
    # NOTE: correct only because the qi grid axis is last (fastest) and marked "arbitrary".
    @pl.when(qi == 0)
    def _():
        def kv_body(t, carry):
            rs = pl.multiple_of(t * TS, TS)
            xr = x_ref[pl.ds(rs, TS), :].astype(jnp.float32)
            hr = _layernorm(xr, ln1w, ln1b).astype(bf16)
            h1_scr[pl.ds(rs, TS), :] = hr                       # cache LN1 output (bf16)
            kr = (jnp.dot(hr, wk_ref[...], preferred_element_type=jnp.float32)
                  + bk_ref[0]).astype(bf16)
            vr = (jnp.dot(hr, wv_ref[...], preferred_element_type=jnp.float32)
                  + bv_ref[0]).astype(bf16)
            # re-layout per head (leading dim) so the hot inner loop is lane-aligned
            for h in range(n_head):
                k_scr[h, pl.ds(rs, TS), :] = kr[:, h * hs:(h + 1) * hs]
                v_scr[h, pl.ds(rs, TS), :] = vr[:, h * hs:(h + 1) * hs]
            return carry

        if NQ <= 8:
            jax.lax.fori_loop(0, NQ, kv_body, 0, unroll=True)
        else:
            jax.lax.fori_loop(0, NQ, kv_body, 0)

    # ---------------- query tile: x + attn(ln_1(x)) --------------------------------------
    q_start = pl.multiple_of(qi * TS, TS)
    x_q = x_ref[pl.ds(q_start, TS), :].astype(jnp.float32)          # (TS, C) residual input
    h1_q = h1_scr[pl.ds(q_start, TS), :]                            # (TS, C) bf16 cached LN1
    # wq / bq are pre-scaled by 1/sqrt(hs) in the wrapper (no per-tile score scaling)
    q = jnp.dot(h1_q, wq_ref[...], preferred_element_type=jnp.float32) + bq_ref[0]

    # local triangular mask: only needed for the diagonal KV tile, independent of qi
    tri = (jax.lax.broadcasted_iota(jnp.int32, (TS, TS), 1)
           <= jax.lax.broadcasted_iota(jnp.int32, (TS, TS), 0))

    for hh in range(n_head):
        q_h = q[:, hh * hs:(hh + 1) * hs].astype(bf16)              # (TS, hs)

        def kv_tile(j, carry, q_h=q_h, hh=hh):
            # fully visible KV tiles (j < qi): no causal mask needed
            m, l, acc = carry
            ks = pl.multiple_of(j * TS, TS)
            k_t = k_scr[hh, pl.ds(ks, TS), :]                       # (TS, hs) bf16, aligned
            v_t = v_scr[hh, pl.ds(ks, TS), :]
            s = jax.lax.dot_general(q_h, k_t, (((1,), (1,)), ((), ())),
                                    preferred_element_type=jnp.float32)
            m_new = jnp.maximum(m, jnp.max(s, axis=-1, keepdims=True))
            alpha = jnp.exp(m - m_new)
            p = jnp.exp(s - m_new)
            l_new = alpha * l + jnp.sum(p, axis=-1, keepdims=True)
            acc_new = alpha * acc + jnp.dot(p.astype(bf16), v_t,
                                            preferred_element_type=jnp.float32)
            return m_new, l_new, acc_new

        m0 = jnp.full((TS, 1), -1e30, jnp.float32)
        l0 = jnp.zeros((TS, 1), jnp.float32)
        a0 = jnp.zeros((TS, hs), jnp.float32)
        m, l, acc = jax.lax.fori_loop(0, qi, kv_tile, (m0, l0, a0))

        # diagonal KV tile (j == qi): the only tile that needs the causal mask
        ks = pl.multiple_of(qi * TS, TS)
        k_t = k_scr[hh, pl.ds(ks, TS), :]
        v_t = v_scr[hh, pl.ds(ks, TS), :]
        s = jax.lax.dot_general(q_h, k_t, (((1,), (1,)), ((), ())),
                                preferred_element_type=jnp.float32)
        s = jnp.where(tri, s, -1e30)
        m_new = jnp.maximum(m, jnp.max(s, axis=-1, keepdims=True))
        alpha = jnp.exp(m - m_new)
        p = jnp.exp(s - m_new)
        l = alpha * l + jnp.sum(p, axis=-1, keepdims=True)
        acc = alpha * acc + jnp.dot(p.astype(bf16), v_t, preferred_element_type=jnp.float32)

        head_out = acc * pl.reciprocal(l, approx=True)              # EUP reciprocal
        # deferred output projection: stash the head result, project once after the loop
        ho_scr[:, hh * hs:(hh + 1) * hs] = head_out.astype(bf16)

    # single full-width (K = C) output projection -> feeds the MXU at full systolic depth
    attn = jnp.dot(ho_scr[...], wo_ref[...], preferred_element_type=jnp.float32)
    x1 = x_q + attn + bo_ref[0]                                     # resid_dropout == identity

    # ---------------- mlp branch: x + mlp(ln_2(x)), hidden dim chunked -------------------
    h2 = _layernorm(x1, ln2w_ref[0], ln2b_ref[0]).astype(bf16)
    y = x1 + bpr_ref[0]                                             # dropout == identity
    for fi in range(NF):
        c0 = fi * FCH
        f = (jnp.dot(h2, wfc_ref[:, c0:c0 + FCH], preferred_element_type=jnp.float32)
             + bfc_ref[0, c0:c0 + FCH])
        f = _gelu_tanh(f)
        y = y + jnp.dot(f.astype(bf16), wpr_ref[c0:c0 + FCH, :],
                        preferred_element_type=jnp.float32)

    o_ref[...] = y.astype(o_ref.dtype)


def transformer_block(x, params, n_head):
    B, T, C = x.shape
    ln1w, ln1b, wqkv, bqkv, wo, bo, ln2w, ln2b, wfc, bfc, wpr, bpr = params
    assert C % n_head == 0
    hs = C // n_head
    scale = 1.0 / math.sqrt(hs)

    # generation-aware sequence tile: 256-wide KV/Q tiles on v6e/v7x (256-wide MXU), 128 on v5e
    TS = _pick_tile(T, 128 if _is_v5e() else 256)
    assert T % TS == 0
    NQ = T // TS

    # chunk the MLP hidden dim (4C) to bound the (TS, 4C) f32 GELU intermediate
    FH = 4 * C
    FCH = FH
    if FH > 2048:
        for cand in (2048, 1024, 512):
            if FH % cand == 0:
                FCH = cand
                break
    NF = FH // FCH

    bf = jnp.bfloat16
    # Split c_attn into q / k / v pieces, fold the 1/sqrt(hs) scale into wq/bq, and cast
    # all matmul weights to bf16 (MXU-native; halves weight DMA / VMEM bytes).
    wq = (wqkv[:, :C] * scale).astype(bf)
    wk = wqkv[:, C:2 * C].astype(bf)
    wv = wqkv[:, 2 * C:].astype(bf)
    bq = bqkv[:, :C] * scale
    bk = bqkv[:, C:2 * C]
    bv = bqkv[:, 2 * C:]
    wo_b = wo.astype(bf)
    wfc_b = wfc.astype(bf)
    wpr_b = wpr.astype(bf)

    args = (x, ln1w, ln1b, wq, wk, wv, bq, bk, bv,
            wo_b, bo, ln2w, ln2b, wfc_b, bfc, wpr_b, bpr)

    kern = functools.partial(transformer_kernel, n_head, TS, NQ, NF, FCH)

    def run(single_buffer):
        def rep_spec(a):
            nd = a.ndim
            idx = lambda b, qi, _nd=nd: (0,) * _nd
            if single_buffer:
                # constant-index inputs: single-buffer them (no overlap benefit from 2 bufs)
                return pl.BlockSpec(a.shape, idx, pipeline_mode=pl.Buffered(1))
            return pl.BlockSpec(a.shape, idx)

        in_specs = [pl.BlockSpec((None, T, C), lambda b, qi: (b, 0, 0))]  # full seq per b
        in_specs += [rep_spec(a) for a in args[1:]]
        out_specs = pl.BlockSpec((None, TS, C), lambda b, qi: (b, qi, 0))  # lane-dense

        return pl.pallas_call(
            kern,
            out_shape=jax.ShapeDtypeStruct((B, T, C), x.dtype),
            grid=(B, NQ),
            in_specs=in_specs,
            out_specs=out_specs,
            scratch_shapes=[
                pltpu.VMEM((n_head, T, hs), jnp.bfloat16),   # K, per-head leading dim
                pltpu.VMEM((n_head, T, hs), jnp.bfloat16),   # V
                pltpu.VMEM((T, C), jnp.bfloat16),            # cached LN1 output
                pltpu.VMEM((TS, C), jnp.bfloat16),           # per-tile head outputs
            ],
            compiler_params=pltpu.CompilerParams(
                # batch axis -> parallel (megacore); query-tile axis -> arbitrary
                # (sequential: scratch is filled at qi == 0 and reused by later tiles).
                dimension_semantics=("parallel", "arbitrary"),
                vmem_limit_bytes=_vmem_limit_bytes()),
        )(*args)

    try:
        return run(True)
    except Exception:
        # fallback if pipeline_mode=pl.Buffered(1) is not supported by this JAX version
        return run(False)


# ---------------------------- pure-JAX reference (exact, f32) ----------------------------
def reference_block(x, params, n_head):
    ln1w, ln1b, wqkv, bqkv, wo, bo, ln2w, ln2b, wfc, bfc, wpr, bpr = params
    B, T, C = x.shape
    hs = C // n_head

    def ln(x, w, b):
        mu = jnp.mean(x, axis=-1, keepdims=True)
        var = jnp.mean(jnp.square(x - mu), axis=-1, keepdims=True)
        return (x - mu) * jax.lax.rsqrt(var + 1e-5) * w[0] + b[0]

    h = ln(x, ln1w, ln1b)
    qkv = h @ wqkv + bqkv[0]
    q, k, v = jnp.split(qkv, 3, axis=-1)
    q = q.reshape(B, T, n_head, hs).transpose(0, 2, 1, 3)
    k = k.reshape(B, T, n_head, hs).transpose(0, 2, 1, 3)
    v = v.reshape(B, T, n_head, hs).transpose(0, 2, 1, 3)
    s = jnp.einsum('bhqd,bhkd->bhqk', q, k) / math.sqrt(hs)
    mask = jnp.tril(jnp.ones((T, T), dtype=bool))
    s = jnp.where(mask, s, -jnp.inf)
    p = jax.nn.softmax(s, axis=-1)
    o = jnp.einsum('bhqk,bhkd->bhqd', p, v).transpose(0, 2, 1, 3).reshape(B, T, C)
    x = x + (o @ wo + bo[0])

    h2 = ln(x, ln2w, ln2b)
    f = h2 @ wfc + bfc[0]
    f = 0.5 * f * (1.0 + jax.lax.erf(f / math.sqrt(2.0)))   # exact GELU
    f = f @ wpr + bpr[0]
    return x + f


if __name__ == "__main__":
    def make_params(key, C):
        keys = jax.random.split(key, 8)

        def linear_params(kw, kb, fin, fout):
            # PyTorch nn.Linear default init: U(-1/sqrt(fan_in), 1/sqrt(fan_in)).
            # Stored pre-transposed as (fin, fout) so the kernel does plain x @ W.
            bound = 1.0 / math.sqrt(fin)
            w = jax.random.uniform(kw, (fin, fout), jnp.float32, -bound, bound)
            b = jax.random.uniform(kb, (1, fout), jnp.float32, -bound, bound)
            return w, b

        wqkv, bqkv = linear_params(keys[0], keys[1], C, 3 * C)   # c_attn
        wo, bo = linear_params(keys[2], keys[3], C, C)           # attn c_proj
        wfc, bfc = linear_params(keys[4], keys[5], C, 4 * C)     # mlp c_fc
        wpr, bpr = linear_params(keys[6], keys[7], 4 * C, C)     # mlp c_proj
        ln1w = jnp.ones((1, C), jnp.float32)
        ln1b = jnp.zeros((1, C), jnp.float32)
        ln2w = jnp.ones((1, C), jnp.float32)
        ln2b = jnp.zeros((1, C), jnp.float32)
        return (ln1w, ln1b, wqkv, bqkv, wo, bo, ln2w, ln2b, wfc, bfc, wpr, bpr)

    key = jax.random.PRNGKey(0)
    # 1) small smoke test; 2) multi-tile test exercising the causal KV-tile loop,
    #    the per-head (n_head, T, hs) scratch layout, and the (8,128) tiling paths.
    for (B, T, C, n_head) in [(2, 8, 32, 4), (2, 512, 128, 4)]:
        kp, kx, key = jax.random.split(key, 3)
        params = make_params(kp, C)
        x = jax.random.normal(kx, (B, T, C), jnp.float32)

        out = jax.block_until_ready(transformer_block(x, params, n_head))
        ref = reference_block(x, params, n_head)

        assert out.shape == (B, T, C) and out.dtype == jnp.float32
        # Tolerance reflects bf16 MXU matmuls (f32 accumulation), tanh-GELU, and the
        # approximate softmax reciprocal vs the exact f32 reference.
        err = float(jnp.max(jnp.abs(out - ref)))
        assert jnp.allclose(out, ref, atol=6e-2, rtol=6e-2), (B, T, C, n_head, err)

    print("KERNEL_OK")
</pallas_src>

<mosaic_0001>
module attributes {stable_mosaic.version = 11 : i64} {
  func.func @transformer_kernel(%arg0: i32, %arg1: i32, %arg2: memref<1x8x32xf32, #tpu.memory_space<vmem>>, %arg3: memref<1x32xf32, #tpu.memory_space<vmem>>, %arg4: memref<1x32xf32, #tpu.memory_space<vmem>>, %arg5: memref<32x32xbf16, #tpu.memory_space<vmem>>, %arg6: memref<32x32xbf16, #tpu.memory_space<vmem>>, %arg7: memref<32x32xbf16, #tpu.memory_space<vmem>>, %arg8: memref<1x32xf32, #tpu.memory_space<vmem>>, %arg9: memref<1x32xf32, #tpu.memory_space<vmem>>, %arg10: memref<1x32xf32, #tpu.memory_space<vmem>>, %arg11: memref<32x32xbf16, #tpu.memory_space<vmem>>, %arg12: memref<1x32xf32, #tpu.memory_space<vmem>>, %arg13: memref<1x32xf32, #tpu.memory_space<vmem>>, %arg14: memref<1x32xf32, #tpu.memory_space<vmem>>, %arg15: memref<32x128xbf16, #tpu.memory_space<vmem>>, %arg16: memref<1x128xf32, #tpu.memory_space<vmem>>, %arg17: memref<128x32xbf16, #tpu.memory_space<vmem>>, %arg18: memref<1x32xf32, #tpu.memory_space<vmem>>, %arg19: memref<1x8x32xf32, #tpu.memory_space<vmem>>, %arg20: memref<4x8x8xbf16, #tpu.memory_space<vmem>>, %arg21: memref<4x8x8xbf16, #tpu.memory_space<vmem>>, %arg22: memref<8x32xbf16, #tpu.memory_space<vmem>>, %arg23: memref<8x32xbf16, #tpu.memory_space<vmem>>) attributes {dimension_semantics = [#tpu.dimension_semantics<parallel>, #tpu.dimension_semantics<arbitrary>], iteration_bounds = array<i64: 2, 1>, scalar_prefetch = 0 : i64, scratch_operands = 4 : i64, tpu.core_type = #tpu.core_type<tc>, window_params = [{transform_indices = @transform_0, window_bounds = array<i64: 1, 8, 32>}, {pipeline_mode = #tpu.pipeline_mode<synchronous>, transform_indices = @transform_1, window_bounds = array<i64: 1, 32>}, {pipeline_mode = #tpu.pipeline_mode<synchronous>, transform_indices = @transform_2, window_bounds = array<i64: 1, 32>}, {pipeline_mode = #tpu.pipeline_mode<synchronous>, transform_indices = @transform_3, window_bounds = array<i64: 32, 32>}, {pipeline_mode = #tpu.pipeline_mode<synchronous>, transform_indices = @transform_4, window_bounds = array<i64: 32, 32>}, {pipeline_mode = #tpu.pipeline_mode<synchronous>, transform_indices = @transform_5, window_bounds = array<i64: 32, 32>}, {pipeline_mode = #tpu.pipeline_mode<synchronous>, transform_indices = @transform_6, window_bounds = array<i64: 1, 32>}, {pipeline_mode = #tpu.pipeline_mode<synchronous>, transform_indices = @transform_7, window_bounds = array<i64: 1, 32>}, {pipeline_mode = #tpu.pipeline_mode<synchronous>, transform_indices = @transform_8, window_bounds = array<i64: 1, 32>}, {pipeline_mode = #tpu.pipeline_mode<synchronous>, transform_indices = @transform_9, window_bounds = array<i64: 32, 32>}, {pipeline_mode = #tpu.pipeline_mode<synchronous>, transform_indices = @transform_10, window_bounds = array<i64: 1, 32>}, {pipeline_mode = #tpu.pipeline_mode<synchronous>, transform_indices = @transform_11, window_bounds = array<i64: 1, 32>}, {pipeline_mode = #tpu.pipeline_mode<synchronous>, transform_indices = @transform_12, window_bounds = array<i64: 1, 32>}, {pipeline_mode = #tpu.pipeline_mode<synchronous>, transform_indices = @transform_13, window_bounds = array<i64: 32, 128>}, {pipeline_mode = #tpu.pipeline_mode<synchronous>, transform_indices = @transform_14, window_bounds = array<i64: 1, 128>}, {pipeline_mode = #tpu.pipeline_mode<synchronous>, transform_indices = @transform_15, window_bounds = array<i64: 128, 32>}, {pipeline_mode = #tpu.pipeline_mode<synchronous>, transform_indices = @transform_16, window_bounds = array<i64: 1, 32>}, {transform_indices = @transform_17, window_bounds = array<i64: 1, 8, 32>}]} {
    %c0 = arith.constant 0 : index
    %c0_0 = arith.constant 0 : index
    %0 = vector.load %arg3[%c0, %c0_0] : memref<1x32xf32, #tpu.memory_space<vmem>>, vector<1x32xf32>
    %1 = vector.shape_cast %0 : vector<1x32xf32> to vector<32xf32>
    %c0_1 = arith.constant 0 : index
    %c0_2 = arith.constant 0 : index
    %2 = vector.load %arg4[%c0_1, %c0_2] : memref<1x32xf32, #tpu.memory_space<vmem>>, vector<1x32xf32>
    %3 = vector.shape_cast %2 : vector<1x32xf32> to vector<32xf32>
    %c0_i32 = arith.constant 0 : i32
    %4 = arith.cmpi eq, %arg1, %c0_i32 : i32
    %5 = arith.extui %4 : i1 to i32
    %c0_i32_3 = arith.constant 0 : i32
    %6 = arith.cmpi ne, %5, %c0_i32_3 : i32
    scf.if %6 {
      %c0_i32_105 = arith.constant 0 : i32
      %c8_i32_106 = arith.constant 8 : i32
      %258 = arith.muli %c0_i32_105, %c8_i32_106 : i32
      %259 = tpu.assume_multiple %258, 8 : i32
      %c0_107 = arith.constant 0 : index
      %260 = arith.index_cast %259 : i32 to index
      %c0_108 = arith.constant 0 : index
      %261 = vector.load %arg2[%c0_107, %260, %c0_108] : memref<1x8x32xf32, #tpu.memory_space<vmem>>, vector<1x8x32xf32>
      %262 = vector.shape_cast %261 : vector<1x8x32xf32> to vector<8x32xf32>
      %cst_109 = arith.constant dense<0.000000e+00> : vector<8xf32>
      %263 = vector.multi_reduction <add>, %262, %cst_109 [1] : vector<8x32xf32> to vector<8xf32>
      %264 = vector.shape_cast %263 : vector<8xf32> to vector<8x1xf32>
      %cst_110 = arith.constant 3.200000e+01 : f32
      %265 = vector.broadcast %cst_110 : f32 to vector<8x1xf32>
      %266 = arith.divf %264, %265 : vector<8x1xf32>
      %267 = vector.broadcast %266 : vector<8x1xf32> to vector<8x32xf32>
      %268 = arith.subf %262, %267 : vector<8x32xf32>
      %269 = arith.mulf %268, %268 : vector<8x32xf32>
      %cst_111 = arith.constant dense<0.000000e+00> : vector<8xf32>
      %270 = vector.multi_reduction <add>, %269, %cst_111 [1] : vector<8x32xf32> to vector<8xf32>
      %271 = vector.shape_cast %270 : vector<8xf32> to vector<8x1xf32>
      %cst_112 = arith.constant 3.200000e+01 : f32
      %272 = vector.broadcast %cst_112 : f32 to vector<8x1xf32>
      %273 = arith.divf %271, %272 : vector<8x1xf32>
      %274 = vector.broadcast %266 : vector<8x1xf32> to vector<8x32xf32>
      %275 = arith.subf %262, %274 : vector<8x32xf32>
      %cst_113 = arith.constant 9.99999974E-6 : f32
      %276 = vector.broadcast %cst_113 : f32 to vector<8x1xf32>
      %277 = arith.addf %273, %276 : vector<8x1xf32>
      %278 = math.rsqrt %277 : vector<8x1xf32>
      %279 = vector.broadcast %278 : vector<8x1xf32> to vector<8x32xf32>
      %280 = arith.mulf %275, %279 : vector<8x32xf32>
      %281 = vector.shape_cast %1 : vector<32xf32> to vector<1x32xf32>
      %282 = vector.broadcast %281 : vector<1x32xf32> to vector<8x32xf32>
      %283 = arith.mulf %280, %282 : vector<8x32xf32>
      %284 = vector.shape_cast %3 : vector<32xf32> to vector<1x32xf32>
      %285 = vector.broadcast %284 : vector<1x32xf32> to vector<8x32xf32>
      %286 = arith.addf %283, %285 : vector<8x32xf32>
      %287 = arith.truncf %286 : vector<8x32xf32> to vector<8x32xbf16>
      %288 = arith.index_cast %259 : i32 to index
      %c0_114 = arith.constant 0 : index
      %289 = vector.load %arg22[%288, %c0_114] : memref<8x32xbf16, #tpu.memory_space<vmem>>, vector<8x32xbf16>
      tpu.vector_store %arg22[%288, %c0_114], %287 {strides = array<i32>} : memref<8x32xbf16, #tpu.memory_space<vmem>>, vector<8x32xbf16>,
      %c0_115 = arith.constant 0 : index
      %c0_116 = arith.constant 0 : index
      %290 = vector.load %arg6[%c0_115, %c0_116] : memref<32x32xbf16, #tpu.memory_space<vmem>>, vector<32x32xbf16>
      %cst_117 = arith.constant dense<0.000000e+00> : vector<8x32xf32>
      %291 = tpu.matmul %287, %290, %cst_117 {dimension_numbers = #tpu.dot_dimension_numbers<[1], [0], [0], [1], [0, 0, 1, 1], [], []>} : vector<8x32xbf16>, vector<32x32xbf16>, vector<8x32xf32> -> vector<8x32xf32>
      %c0_118 = arith.constant 0 : index
      %c0_119 = arith.constant 0 : index
      %292 = vector.load %arg9[%c0_118, %c0_119] : memref<1x32xf32, #tpu.memory_space<vmem>>, vector<1x32xf32>
      %293 = vector.shape_cast %292 : vector<1x32xf32> to vector<32xf32>
      %294 = vector.shape_cast %293 : vector<32xf32> to vector<1x32xf32>
      %295 = vector.broadcast %294 : vector<1x32xf32> to vector<8x32xf32>
      %296 = arith.addf %291, %295 : vector<8x32xf32>
      %297 = arith.truncf %296 : vector<8x32xf32> to vector<8x32xbf16>
      %c0_120 = arith.constant 0 : index
      %c0_121 = arith.constant 0 : index
      %298 = vector.load %arg7[%c0_120, %c0_121] : memref<32x32xbf16, #tpu.memory_space<vmem>>, vector<32x32xbf16>
      %cst_122 = arith.constant dense<0.000000e+00> : vector<8x32xf32>
      %299 = tpu.matmul %287, %298, %cst_122 {dimension_numbers = #tpu.dot_dimension_numbers<[1], [0], [0], [1], [0, 0, 1, 1], [], []>} : vector<8x32xbf16>, vector<32x32xbf16>, vector<8x32xf32> -> vector<8x32xf32>
      %c0_123 = arith.constant 0 : index
      %c0_124 = arith.constant 0 : index
      %300 = vector.load %arg10[%c0_123, %c0_124] : memref<1x32xf32, #tpu.memory_space<vmem>>, vector<1x32xf32>
      %301 = vector.shape_cast %300 : vector<1x32xf32> to vector<32xf32>
      %302 = vector.shape_cast %301 : vector<32xf32> to vector<1x32xf32>
      %303 = vector.broadcast %302 : vector<1x32xf32> to vector<8x32xf32>
      %304 = arith.addf %299, %303 : vector<8x32xf32>
      %305 = arith.truncf %304 : vector<8x32xf32> to vector<8x32xbf16>
      %306 = vector.extract_strided_slice %297 {offsets = [0, 0], sizes = [8, 8], strides = [1, 1]} : vector<8x32xbf16> to vector<8x8xbf16>
      %c0_125 = arith.constant 0 : index
      %307 = arith.index_cast %259 : i32 to index
      %c0_126 = arith.constant 0 : index
      %308 = vector.load %arg20[%c0_125, %307, %c0_126] : memref<4x8x8xbf16, #tpu.memory_space<vmem>>, vector<1x8x8xbf16>
      %309 = vector.shape_cast %308 : vector<1x8x8xbf16> to vector<8x8xbf16>
      %310 = vector.shape_cast %306 : vector<8x8xbf16> to vector<1x8x8xbf16>
      tpu.vector_store %arg20[%c0_125, %307, %c0_126], %310 {strides = array<i32>} : memref<4x8x8xbf16, #tpu.memory_space<vmem>>, vector<1x8x8xbf16>,
      %311 = vector.extract_strided_slice %305 {offsets = [0, 0], sizes = [8, 8], strides = [1, 1]} : vector<8x32xbf16> to vector<8x8xbf16>
      %c0_127 = arith.constant 0 : index
      %312 = arith.index_cast %259 : i32 to index
      %c0_128 = arith.constant 0 : index
      %313 = vector.load %arg21[%c0_127, %312, %c0_128] : memref<4x8x8xbf16, #tpu.memory_space<vmem>>, vector<1x8x8xbf16>
      %314 = vector.shape_cast %313 : vector<1x8x8xbf16> to vector<8x8xbf16>
      %315 = vector.shape_cast %311 : vector<8x8xbf16> to vector<1x8x8xbf16>
      tpu.vector_store %arg21[%c0_127, %312, %c0_128], %315 {strides = array<i32>} : memref<4x8x8xbf16, #tpu.memory_space<vmem>>, vector<1x8x8xbf16>,
      %316 = vector.extract_strided_slice %297 {offsets = [0, 8], sizes = [8, 8], strides = [1, 1]} : vector<8x32xbf16> to vector<8x8xbf16>
      %c1_129 = arith.constant 1 : index
      %317 = arith.index_cast %259 : i32 to index
      %c0_130 = arith.constant 0 : index
      %318 = vector.load %arg20[%c1_129, %317, %c0_130] : memref<4x8x8xbf16, #tpu.memory_space<vmem>>, vector<1x8x8xbf16>
      %319 = vector.shape_cast %318 : vector<1x8x8xbf16> to vector<8x8xbf16>
      %320 = vector.shape_cast %316 : vector<8x8xbf16> to vector<1x8x8xbf16>
      tpu.vector_store %arg20[%c1_129, %317, %c0_130], %320 {strides = array<i32>} : memref<4x8x8xbf16, #tpu.memory_space<vmem>>, vector<1x8x8xbf16>,
      %321 = vector.extract_strided_slice %305 {offsets = [0, 8], sizes = [8, 8], strides = [1, 1]} : vector<8x32xbf16> to vector<8x8xbf16>
      %c1_131 = arith.constant 1 : index
      %322 = arith.index_cast %259 : i32 to index
      %c0_132 = arith.constant 0 : index
      %323 = vector.load %arg21[%c1_131, %322, %c0_132] : memref<4x8x8xbf16, #tpu.memory_space<vmem>>, vector<1x8x8xbf16>
      %324 = vector.shape_cast %323 : vector<1x8x8xbf16> to vector<8x8xbf16>
      %325 = vector.shape_cast %321 : vector<8x8xbf16> to vector<1x8x8xbf16>
      tpu.vector_store %arg21[%c1_131, %322, %c0_132], %325 {strides = array<i32>} : memref<4x8x8xbf16, #tpu.memory_space<vmem>>, vector<1x8x8xbf16>,
      %326 = vector.extract_strided_slice %297 {offsets = [0, 16], sizes = [8, 8], strides = [1, 1]} : vector<8x32xbf16> to vector<8x8xbf16>
      %c2_133 = arith.constant 2 : index
      %327 = arith.index_cast %259 : i32 to index
      %c0_134 = arith.constant 0 : index
      %328 = vector.load %arg20[%c2_133, %327, %c0_134] : memref<4x8x8xbf16, #tpu.memory_space<vmem>>, vector<1x8x8xbf16>
      %329 = vector.shape_cast %328 : vector<1x8x8xbf16> to vector<8x8xbf16>
      %330 = vector.shape_cast %326 : vector<8x8xbf16> to vector<1x8x8xbf16>
      tpu.vector_store %arg20[%c2_133, %327, %c0_134], %330 {strides = array<i32>} : memref<4x8x8xbf16, #tpu.memory_space<vmem>>, vector<1x8x8xbf16>,
      %331 = vector.extract_strided_slice %305 {offsets = [0, 16], sizes = [8, 8], strides = [1, 1]} : vector<8x32xbf16> to vector<8x8xbf16>
      %c2_135 = arith.constant 2 : index
      %332 = arith.index_cast %259 : i32 to index
      %c0_136 = arith.constant 0 : index
      %333 = vector.load %arg21[%c2_135, %332, %c0_136] : memref<4x8x8xbf16, #tpu.memory_space<vmem>>, vector<1x8x8xbf16>
      %334 = vector.shape_cast %333 : vector<1x8x8xbf16> to vector<8x8xbf16>
      %335 = vector.shape_cast %331 : vector<8x8xbf16> to vector<1x8x8xbf16>
      tpu.vector_store %arg21[%c2_135, %332, %c0_136], %335 {strides = array<i32>} : memref<4x8x8xbf16, #tpu.memory_space<vmem>>, vector<1x8x8xbf16>,
      %336 = vector.extract_strided_slice %297 {offsets = [0, 24], sizes = [8, 8], strides = [1, 1]} : vector<8x32xbf16> to vector<8x8xbf16>
      %c3_137 = arith.constant 3 : index
      %337 = arith.index_cast %259 : i32 to index
      %c0_138 = arith.constant 0 : index
      %338 = vector.load %arg20[%c3_137, %337, %c0_138] : memref<4x8x8xbf16, #tpu.memory_space<vmem>>, vector<1x8x8xbf16>
      %339 = vector.shape_cast %338 : vector<1x8x8xbf16> to vector<8x8xbf16>
      %340 = vector.shape_cast %336 : vector<8x8xbf16> to vector<1x8x8xbf16>
      tpu.vector_store %arg20[%c3_137, %337, %c0_138], %340 {strides = array<i32>} : memref<4x8x8xbf16, #tpu.memory_space<vmem>>, vector<1x8x8xbf16>,
      %341 = vector.extract_strided_slice %305 {offsets = [0, 24], sizes = [8, 8], strides = [1, 1]} : vector<8x32xbf16> to vector<8x8xbf16>
      %c3_139 = arith.constant 3 : index
      %342 = arith.index_cast %259 : i32 to index
      %c0_140 = arith.constant 0 : index
      %343 = vector.load %arg21[%c3_139, %342, %c0_140] : memref<4x8x8xbf16, #tpu.memory_space<vmem>>, vector<1x8x8xbf16>
      %344 = vector.shape_cast %343 : vector<1x8x8xbf16> to vector<8x8xbf16>
      %345 = vector.shape_cast %341 : vector<8x8xbf16> to vector<1x8x8xbf16>
      tpu.vector_store %arg21[%c3_139, %342, %c0_140], %345 {strides = array<i32>} : memref<4x8x8xbf16, #tpu.memory_space<vmem>>, vector<1x8x8xbf16>,
      %c1_i32_141 = arith.constant 1 : i32
    } else {
    }
    %c8_i32 = arith.constant 8 : i32
    %7 = arith.muli %arg1, %c8_i32 : i32
    %8 = tpu.assume_multiple %7, 8 : i32
    %c0_4 = arith.constant 0 : index
    %9 = arith.index_cast %8 : i32 to index
    %c0_5 = arith.constant 0 : index
    %10 = vector.load %arg2[%c0_4, %9, %c0_5] : memref<1x8x32xf32, #tpu.memory_space<vmem>>, vector<1x8x32xf32>
    %11 = vector.shape_cast %10 : vector<1x8x32xf32> to vector<8x32xf32>
    %12 = arith.index_cast %8 : i32 to index
    %c0_6 = arith.constant 0 : index
    %13 = vector.load %arg22[%12, %c0_6] : memref<8x32xbf16, #tpu.memory_space<vmem>>, vector<8x32xbf16>
    %c0_7 = arith.constant 0 : index
    %c0_8 = arith.constant 0 : index
    %14 = vector.load %arg5[%c0_7, %c0_8] : memref<32x32xbf16, #tpu.memory_space<vmem>>, vector<32x32xbf16>
    %cst = arith.constant dense<0.000000e+00> : vector<8x32xf32>
    %15 = tpu.matmul %13, %14, %cst {dimension_numbers = #tpu.dot_dimension_numbers<[1], [0], [0], [1], [0, 0, 1, 1], [], []>} : vector<8x32xbf16>, vector<32x32xbf16>, vector<8x32xf32> -> vector<8x32xf32>
    %c0_9 = arith.constant 0 : index
    %c0_10 = arith.constant 0 : index
    %16 = vector.load %arg8[%c0_9, %c0_10] : memref<1x32xf32, #tpu.memory_space<vmem>>, vector<1x32xf32>
    %17 = vector.shape_cast %16 : vector<1x32xf32> to vector<32xf32>
    %18 = vector.shape_cast %17 : vector<32xf32> to vector<1x32xf32>
    %19 = vector.broadcast %18 : vector<1x32xf32> to vector<8x32xf32>
    %20 = arith.addf %15, %19 : vector<8x32xf32>
    %21 = tpu.iota {dimensions = array<i32: 1>} : vector<8x8xi32>
    %22 = tpu.iota {dimensions = array<i32: 0>} : vector<8x8xi32>
    %23 = arith.cmpi sle, %21, %22 : vector<8x8xi32>
    %24 = vector.extract_strided_slice %20 {offsets = [0, 0], sizes = [8, 8], strides = [1, 1]} : vector<8x32xf32> to vector<8x8xf32>
    %25 = arith.truncf %24 : vector<8x8xf32> to vector<8x8xbf16>
    %cst_11 = arith.constant -1.000000e+30 : f32
    %26 = vector.broadcast %cst_11 : f32 to vector<8x1xf32>
    %cst_12 = arith.constant 0.000000e+00 : f32
    %27 = vector.broadcast %cst_12 : f32 to vector<8x1xf32>
    %cst_13 = arith.constant 0.000000e+00 : f32
    %28 = vector.broadcast %cst_13 : f32 to vector<8x8xf32>
    %c0_i32_14 = arith.constant 0 : i32
    %29 = arith.subi %arg1, %c0_i32_14 : i32
    %30 = arith.addi %c0_i32_14, %29 : i32
    %c1_i32 = arith.constant 1 : i32
    %31:3 = scf.for %arg24 = %c0_i32_14 to %30 step %c1_i32 iter_args(%arg25 = %26, %arg26 = %27, %arg27 = %28) -> (vector<8x1xf32>, vector<8x1xf32>, vector<8x8xf32>)  : i32 {
      %c8_i32_105 = arith.constant 8 : i32
      %258 = arith.muli %arg24, %c8_i32_105 : i32
      %259 = tpu.assume_multiple %258, 8 : i32
      %c0_106 = arith.constant 0 : index
      %260 = arith.index_cast %259 : i32 to index
      %c0_107 = arith.constant 0 : index
      %261 = vector.load %arg20[%c0_106, %260, %c0_107] : memref<4x8x8xbf16, #tpu.memory_space<vmem>>, vector<1x8x8xbf16>
      %262 = vector.shape_cast %261 : vector<1x8x8xbf16> to vector<8x8xbf16>
      %c0_108 = arith.constant 0 : index
      %263 = arith.index_cast %259 : i32 to index
      %c0_109 = arith.constant 0 : index
      %264 = vector.load %arg21[%c0_108, %263, %c0_109] : memref<4x8x8xbf16, #tpu.memory_space<vmem>>, vector<1x8x8xbf16>
      %265 = vector.shape_cast %264 : vector<1x8x8xbf16> to vector<8x8xbf16>
      %cst_110 = arith.constant dense<0.000000e+00> : vector<8x8xf32>
      %266 = tpu.matmul %25, %262, %cst_110 {dimension_numbers = #tpu.dot_dimension_numbers<[1], [1], [0], [0], [0, 0, 1, 0], [], []>} : vector<8x8xbf16>, vector<8x8xbf16>, vector<8x8xf32> -> vector<8x8xf32>
      %cst_111 = arith.constant dense<0xFF800000> : vector<8xf32>
      %267 = vector.multi_reduction <maximumf>, %266, %cst_111 [1] : vector<8x8xf32> to vector<8xf32>
      %268 = vector.shape_cast %267 : vector<8xf32> to vector<8x1xf32>
      %269 = arith.maximumf %arg25, %268 : vector<8x1xf32>
      %270 = arith.subf %arg25, %269 : vector<8x1xf32>
      %271 = math.exp %270 : vector<8x1xf32>
      %272 = vector.broadcast %269 : vector<8x1xf32> to vector<8x8xf32>
      %273 = arith.subf %266, %272 : vector<8x8xf32>
      %274 = math.exp %273 : vector<8x8xf32>
      %275 = arith.mulf %271, %arg26 : vector<8x1xf32>
      %cst_112 = arith.constant dense<0.000000e+00> : vector<8xf32>
      %276 = vector.multi_reduction <add>, %274, %cst_112 [1] : vector<8x8xf32> to vector<8xf32>
      %277 = vector.shape_cast %276 : vector<8xf32> to vector<8x1xf32>
      %278 = arith.addf %275, %277 : vector<8x1xf32>
      %279 = vector.broadcast %271 : vector<8x1xf32> to vector<8x8xf32>
      %280 = arith.mulf %279, %arg27 : vector<8x8xf32>
      %281 = arith.truncf %274 : vector<8x8xf32> to vector<8x8xbf16>
      %cst_113 = arith.constant dense<0.000000e+00> : vector<8x8xf32>
      %282 = tpu.matmul %281, %265, %cst_113 {dimension_numbers = #tpu.dot_dimension_numbers<[1], [0], [0], [1], [0, 0, 1, 1], [], []>} : vector<8x8xbf16>, vector<8x8xbf16>, vector<8x8xf32> -> vector<8x8xf32>
      %283 = arith.addf %280, %282 : vector<8x8xf32>
      scf.yield %269, %278, %283 : vector<8x1xf32>, vector<8x1xf32>, vector<8x8xf32>
    }
    %c8_i32_15 = arith.constant 8 : i32
    %32 = arith.muli %arg1, %c8_i32_15 : i32
    %33 = tpu.assume_multiple %32, 8 : i32
    %c0_16 = arith.constant 0 : index
    %34 = arith.index_cast %33 : i32 to index
    %c0_17 = arith.constant 0 : index
    %35 = vector.load %arg20[%c0_16, %34, %c0_17] : memref<4x8x8xbf16, #tpu.memory_space<vmem>>, vector<1x8x8xbf16>
    %36 = vector.shape_cast %35 : vector<1x8x8xbf16> to vector<8x8xbf16>
    %c0_18 = arith.constant 0 : index
    %37 = arith.index_cast %33 : i32 to index
    %c0_19 = arith.constant 0 : index
    %38 = vector.load %arg21[%c0_18, %37, %c0_19] : memref<4x8x8xbf16, #tpu.memory_space<vmem>>, vector<1x8x8xbf16>
    %39 = vector.shape_cast %38 : vector<1x8x8xbf16> to vector<8x8xbf16>
    %cst_20 = arith.constant dense<0.000000e+00> : vector<8x8xf32>
    %40 = tpu.matmul %25, %36, %cst_20 {dimension_numbers = #tpu.dot_dimension_numbers<[1], [1], [0], [0], [0, 0, 1, 0], [], []>} : vector<8x8xbf16>, vector<8x8xbf16>, vector<8x8xf32> -> vector<8x8xf32>
    %cst_21 = arith.constant -1.000000e+30 : f32
    %41 = vector.broadcast %cst_21 : f32 to vector<8x8xf32>
    %42 = arith.select %23, %40, %41 : vector<8x8xi1>, vector<8x8xf32>
    %cst_22 = arith.constant dense<0xFF800000> : vector<8xf32>
    %43 = vector.multi_reduction <maximumf>, %42, %cst_22 [1] : vector<8x8xf32> to vector<8xf32>
    %44 = vector.shape_cast %43 : vector<8xf32> to vector<8x1xf32>
    %45 = arith.maximumf %31#0, %44 : vector<8x1xf32>
    %46 = arith.subf %31#0, %45 : vector<8x1xf32>
    %47 = math.exp %46 : vector<8x1xf32>
    %48 = vector.broadcast %45 : vector<8x1xf32> to vector<8x8xf32>
    %49 = arith.subf %42, %48 : vector<8x8xf32>
    %50 = math.exp %49 : vector<8x8xf32>
    %51 = arith.mulf %47, %31#1 : vector<8x1xf32>
    %cst_23 = arith.constant dense<0.000000e+00> : vector<8xf32>
    %52 = vector.multi_reduction <add>, %50, %cst_23 [1] : vector<8x8xf32> to vector<8xf32>
    %53 = vector.shape_cast %52 : vector<8xf32> to vector<8x1xf32>
    %54 = arith.addf %51, %53 : vector<8x1xf32>
    %55 = vector.broadcast %47 : vector<8x1xf32> to vector<8x8xf32>
    %56 = arith.mulf %55, %31#2 : vector<8x8xf32>
    %57 = arith.truncf %50 : vector<8x8xf32> to vector<8x8xbf16>
    %cst_24 = arith.constant dense<0.000000e+00> : vector<8x8xf32>
    %58 = tpu.matmul %57, %39, %cst_24 {dimension_numbers = #tpu.dot_dimension_numbers<[1], [0], [0], [1], [0, 0, 1, 1], [], []>} : vector<8x8xbf16>, vector<8x8xbf16>, vector<8x8xf32> -> vector<8x8xf32>
    %59 = arith.addf %56, %58 : vector<8x8xf32>
    %60 = tpu.reciprocal %54 {approx = true} : vector<8x1xf32> -> vector<8x1xf32>
    %61 = vector.broadcast %60 : vector<8x1xf32> to vector<8x8xf32>
    %62 = arith.mulf %59, %61 : vector<8x8xf32>
    %63 = arith.truncf %62 : vector<8x8xf32> to vector<8x8xbf16>
    %c0_25 = arith.constant 0 : index
    %c0_26 = arith.constant 0 : index
    %64 = vector.load %arg23[%c0_25, %c0_26] : memref<8x32xbf16, #tpu.memory_space<vmem>>, vector<8x8xbf16>
    tpu.vector_store %arg23[%c0_25, %c0_26], %63 {strides = array<i32>} : memref<8x32xbf16, #tpu.memory_space<vmem>>, vector<8x8xbf16>,
    %65 = vector.extract_strided_slice %20 {offsets = [0, 8], sizes = [8, 8], strides = [1, 1]} : vector<8x32xf32> to vector<8x8xf32>
    %66 = arith.truncf %65 : vector<8x8xf32> to vector<8x8xbf16>
    %cst_27 = arith.constant -1.000000e+30 : f32
    %67 = vector.broadcast %cst_27 : f32 to vector<8x1xf32>
    %cst_28 = arith.constant 0.000000e+00 : f32
    %68 = vector.broadcast %cst_28 : f32 to vector<8x1xf32>
    %cst_29 = arith.constant 0.000000e+00 : f32
    %69 = vector.broadcast %cst_29 : f32 to vector<8x8xf32>
    %c0_i32_30 = arith.constant 0 : i32
    %70 = arith.subi %arg1, %c0_i32_30 : i32
    %71 = arith.addi %c0_i32_30, %70 : i32
    %c1_i32_31 = arith.constant 1 : i32
    %72:3 = scf.for %arg24 = %c0_i32_30 to %71 step %c1_i32_31 iter_args(%arg25 = %67, %arg26 = %68, %arg27 = %69) -> (vector<8x1xf32>, vector<8x1xf32>, vector<8x8xf32>)  : i32 {
      %c8_i32_105 = arith.constant 8 : i32
      %258 = arith.muli %arg24, %c8_i32_105 : i32
      %259 = tpu.assume_multiple %258, 8 : i32
      %c1_106 = arith.constant 1 : index
      %260 = arith.index_cast %259 : i32 to index
      %c0_107 = arith.constant 0 : index
      %261 = vector.load %arg20[%c1_106, %260, %c0_107] : memref<4x8x8xbf16, #tpu.memory_space<vmem>>, vector<1x8x8xbf16>
      %262 = vector.shape_cast %261 : vector<1x8x8xbf16> to vector<8x8xbf16>
      %c1_108 = arith.constant 1 : index
      %263 = arith.index_cast %259 : i32 to index
      %c0_109 = arith.constant 0 : index
      %264 = vector.load %arg21[%c1_108, %263, %c0_109] : memref<4x8x8xbf16, #tpu.memory_space<vmem>>, vector<1x8x8xbf16>
      %265 = vector.shape_cast %264 : vector<1x8x8xbf16> to vector<8x8xbf16>
      %cst_110 = arith.constant dense<0.000000e+00> : vector<8x8xf32>
      %266 = tpu.matmul %66, %262, %cst_110 {dimension_numbers = #tpu.dot_dimension_numbers<[1], [1], [0], [0], [0, 0, 1, 0], [], []>} : vector<8x8xbf16>, vector<8x8xbf16>, vector<8x8xf32> -> vector<8x8xf32>
      %cst_111 = arith.constant dense<0xFF800000> : vector<8xf32>
      %267 = vector.multi_reduction <maximumf>, %266, %cst_111 [1] : vector<8x8xf32> to vector<8xf32>
      %268 = vector.shape_cast %267 : vector<8xf32> to vector<8x1xf32>
      %269 = arith.maximumf %arg25, %268 : vector<8x1xf32>
      %270 = arith.subf %arg25, %269 : vector<8x1xf32>
      %271 = math.exp %270 : vector<8x1xf32>
      %272 = vector.broadcast %269 : vector<8x1xf32> to vector<8x8xf32>
      %273 = arith.subf %266, %272 : vector<8x8xf32>
      %274 = math.exp %273 : vector<8x8xf32>
      %275 = arith.mulf %271, %arg26 : vector<8x1xf32>
      %cst_112 = arith.constant dense<0.000000e+00> : vector<8xf32>
      %276 = vector.multi_reduction <add>, %274, %cst_112 [1] : vector<8x8xf32> to vector<8xf32>
      %277 = vector.shape_cast %276 : vector<8xf32> to vector<8x1xf32>
      %278 = arith.addf %275, %277 : vector<8x1xf32>
      %279 = vector.broadcast %271 : vector<8x1xf32> to vector<8x8xf32>
      %280 = arith.mulf %279, %arg27 : vector<8x8xf32>
      %281 = arith.truncf %274 : vector<8x8xf32> to vector<8x8xbf16>
      %cst_113 = arith.constant dense<0.000000e+00> : vector<8x8xf32>
      %282 = tpu.matmul %281, %265, %cst_113 {dimension_numbers = #tpu.dot_dimension_numbers<[1], [0], [0], [1], [0, 0, 1, 1], [], []>} : vector<8x8xbf16>, vector<8x8xbf16>, vector<8x8xf32> -> vector<8x8xf32>
      %283 = arith.addf %280, %282 : vector<8x8xf32>
      scf.yield %269, %278, %283 : vector<8x1xf32>, vector<8x1xf32>, vector<8x8xf32>
    }
    %c8_i32_32 = arith.constant 8 : i32
    %73 = arith.muli %arg1, %c8_i32_32 : i32
    %74 = tpu.assume_multiple %73, 8 : i32
    %c1 = arith.constant 1 : index
    %75 = arith.index_cast %74 : i32 to index
    %c0_33 = arith.constant 0 : index
    %76 = vector.load %arg20[%c1, %75, %c0_33] : memref<4x8x8xbf16, #tpu.memory_space<vmem>>, vector<1x8x8xbf16>
    %77 = vector.shape_cast %76 : vector<1x8x8xbf16> to vector<8x8xbf16>
    %c1_34 = arith.constant 1 : index
    %78 = arith.index_cast %74 : i32 to index
    %c0_35 = arith.constant 0 : index
    %79 = vector.load %arg21[%c1_34, %78, %c0_35] : memref<4x8x8xbf16, #tpu.memory_space<vmem>>, vector<1x8x8xbf16>
    %80 = vector.shape_cast %79 : vector<1x8x8xbf16> to vector<8x8xbf16>
    %cst_36 = arith.constant dense<0.000000e+00> : vector<8x8xf32>
    %81 = tpu.matmul %66, %77, %cst_36 {dimension_numbers = #tpu.dot_dimension_numbers<[1], [1], [0], [0], [0, 0, 1, 0], [], []>} : vector<8x8xbf16>, vector<8x8xbf16>, vector<8x8xf32> -> vector<8x8xf32>
    %cst_37 = arith.constant -1.000000e+30 : f32
    %82 = vector.broadcast %cst_37 : f32 to vector<8x8xf32>
    %83 = arith.select %23, %81, %82 : vector<8x8xi1>, vector<8x8xf32>
    %cst_38 = arith.constant dense<0xFF800000> : vector<8xf32>
    %84 = vector.multi_reduction <maximumf>, %83, %cst_38 [1] : vector<8x8xf32> to vector<8xf32>
    %85 = vector.shape_cast %84 : vector<8xf32> to vector<8x1xf32>
    %86 = arith.maximumf %72#0, %85 : vector<8x1xf32>
    %87 = arith.subf %72#0, %86 : vector<8x1xf32>
    %88 = math.exp %87 : vector<8x1xf32>
    %89 = vector.broadcast %86 : vector<8x1xf32> to vector<8x8xf32>
    %90 = arith.subf %83, %89 : vector<8x8xf32>
    %91 = math.exp %90 : vector<8x8xf32>
    %92 = arith.mulf %88, %72#1 : vector<8x1xf32>
    %cst_39 = arith.constant dense<0.000000e+00> : vector<8xf32>
    %93 = vector.multi_reduction <add>, %91, %cst_39 [1] : vector<8x8xf32> to vector<8xf32>
    %94 = vector.shape_cast %93 : vector<8xf32> to vector<8x1xf32>
    %95 = arith.addf %92, %94 : vector<8x1xf32>
    %96 = vector.broadcast %88 : vector<8x1xf32> to vector<8x8xf32>
    %97 = arith.mulf %96, %72#2 : vector<8x8xf32>
    %98 = arith.truncf %91 : vector<8x8xf32> to vector<8x8xbf16>
    %cst_40 = arith.constant dense<0.000000e+00> : vector<8x8xf32>
    %99 = tpu.matmul %98, %80, %cst_40 {dimension_numbers = #tpu.dot_dimension_numbers<[1], [0], [0], [1], [0, 0, 1, 1], [], []>} : vector<8x8xbf16>, vector<8x8xbf16>, vector<8x8xf32> -> vector<8x8xf32>
    %100 = arith.addf %97, %99 : vector<8x8xf32>
    %101 = tpu.reciprocal %95 {approx = true} : vector<8x1xf32> -> vector<8x1xf32>
    %102 = vector.broadcast %101 : vector<8x1xf32> to vector<8x8xf32>
    %103 = arith.mulf %100, %102 : vector<8x8xf32>
    %104 = arith.truncf %103 : vector<8x8xf32> to vector<8x8xbf16>
    %c0_41 = arith.constant 0 : index
    %c8 = arith.constant 8 : index
    %105 = vector.load %arg23[%c0_41, %c8] : memref<8x32xbf16, #tpu.memory_space<vmem>>, vector<8x8xbf16>
    tpu.vector_store %arg23[%c0_41, %c8], %104 {strides = array<i32>} : memref<8x32xbf16, #tpu.memory_space<vmem>>, vector<8x8xbf16>,
    %106 = vector.extract_strided_slice %20 {offsets = [0, 16], sizes = [8, 8], strides = [1, 1]} : vector<8x32xf32> to vector<8x8xf32>
    %107 = arith.truncf %106 : vector<8x8xf32> to vector<8x8xbf16>
    %cst_42 = arith.constant -1.000000e+30 : f32
    %108 = vector.broadcast %cst_42 : f32 to vector<8x1xf32>
    %cst_43 = arith.constant 0.000000e+00 : f32
    %109 = vector.broadcast %cst_43 : f32 to vector<8x1xf32>
    %cst_44 = arith.constant 0.000000e+00 : f32
    %110 = vector.broadcast %cst_44 : f32 to vector<8x8xf32>
    %c0_i32_45 = arith.constant 0 : i32
    %111 = arith.subi %arg1, %c0_i32_45 : i32
    %112 = arith.addi %c0_i32_45, %111 : i32
    %c1_i32_46 = arith.constant 1 : i32
    %113:3 = scf.for %arg24 = %c0_i32_45 to %112 step %c1_i32_46 iter_args(%arg25 = %108, %arg26 = %109, %arg27 = %110) -> (vector<8x1xf32>, vector<8x1xf32>, vector<8x8xf32>)  : i32 {
      %c8_i32_105 = arith.constant 8 : i32
      %258 = arith.muli %arg24, %c8_i32_105 : i32
      %259 = tpu.assume_multiple %258, 8 : i32
      %c2_106 = arith.constant 2 : index
      %260 = arith.index_cast %259 : i32 to index
      %c0_107 = arith.constant 0 : index
      %261 = vector.load %arg20[%c2_106, %260, %c0_107] : memref<4x8x8xbf16, #tpu.memory_space<vmem>>, vector<1x8x8xbf16>
      %262 = vector.shape_cast %261 : vector<1x8x8xbf16> to vector<8x8xbf16>
      %c2_108 = arith.constant 2 : index
      %263 = arith.index_cast %259 : i32 to index
      %c0_109 = arith.constant 0 : index
      %264 = vector.load %arg21[%c2_108, %263, %c0_109] : memref<4x8x8xbf16, #tpu.memory_space<vmem>>, vector<1x8x8xbf16>
      %265 = vector.shape_cast %264 : vector<1x8x8xbf16> to vector<8x8xbf16>
      %cst_110 = arith.constant dense<0.000000e+00> : vector<8x8xf32>
      %266 = tpu.matmul %107, %262, %cst_110 {dimension_numbers = #tpu.dot_dimension_numbers<[1], [1], [0], [0], [0, 0, 1, 0], [], []>} : vector<8x8xbf16>, vector<8x8xbf16>, vector<8x8xf32> -> vector<8x8xf32>
      %cst_111 = arith.constant dense<0xFF800000> : vector<8xf32>
      %267 = vector.multi_reduction <maximumf>, %266, %cst_111 [1] : vector<8x8xf32> to vector<8xf32>
      %268 = vector.shape_cast %267 : vector<8xf32> to vector<8x1xf32>
      %269 = arith.maximumf %arg25, %268 : vector<8x1xf32>
      %270 = arith.subf %arg25, %269 : vector<8x1xf32>
      %271 = math.exp %270 : vector<8x1xf32>
      %272 = vector.broadcast %269 : vector<8x1xf32> to vector<8x8xf32>
      %273 = arith.subf %266, %272 : vector<8x8xf32>
      %274 = math.exp %273 : vector<8x8xf32>
      %275 = arith.mulf %271, %arg26 : vector<8x1xf32>
      %cst_112 = arith.constant dense<0.000000e+00> : vector<8xf32>
      %276 = vector.multi_reduction <add>, %274, %cst_112 [1] : vector<8x8xf32> to vector<8xf32>
      %277 = vector.shape_cast %276 : vector<8xf32> to vector<8x1xf32>
      %278 = arith.addf %275, %277 : vector<8x1xf32>
      %279 = vector.broadcast %271 : vector<8x1xf32> to vector<8x8xf32>
      %280 = arith.mulf %279, %arg27 : vector<8x8xf32>
      %281 = arith.truncf %274 : vector<8x8xf32> to vector<8x8xbf16>
      %cst_113 = arith.constant dense<0.000000e+00> : vector<8x8xf32>
      %282 = tpu.matmul %281, %265, %cst_113 {dimension_numbers = #tpu.dot_dimension_numbers<[1], [0], [0], [1], [0, 0, 1, 1], [], []>} : vector<8x8xbf16>, vector<8x8xbf16>, vector<8x8xf32> -> vector<8x8xf32>
      %283 = arith.addf %280, %282 : vector<8x8xf32>
      scf.yield %269, %278, %283 : vector<8x1xf32>, vector<8x1xf32>, vector<8x8xf32>
    }
    %c8_i32_47 = arith.constant 8 : i32
    %114 = arith.muli %arg1, %c8_i32_47 : i32
    %115 = tpu.assume_multiple %114, 8 : i32
    %c2 = arith.constant 2 : index
    %116 = arith.index_cast %115 : i32 to index
    %c0_48 = arith.constant 0 : index
    %117 = vector.load %arg20[%c2, %116, %c0_48] : memref<4x8x8xbf16, #tpu.memory_space<vmem>>, vector<1x8x8xbf16>
    %118 = vector.shape_cast %117 : vector<1x8x8xbf16> to vector<8x8xbf16>
    %c2_49 = arith.constant 2 : index
    %119 = arith.index_cast %115 : i32 to index
    %c0_50 = arith.constant 0 : index
    %120 = vector.load %arg21[%c2_49, %119, %c0_50] : memref<4x8x8xbf16, #tpu.memory_space<vmem>>, vector<1x8x8xbf16>
    %121 = vector.shape_cast %120 : vector<1x8x8xbf16> to vector<8x8xbf16>
    %cst_51 = arith.constant dense<0.000000e+00> : vector<8x8xf32>
    %122 = tpu.matmul %107, %118, %cst_51 {dimension_numbers = #tpu.dot_dimension_numbers<[1], [1], [0], [0], [0, 0, 1, 0], [], []>} : vector<8x8xbf16>, vector<8x8xbf16>, vector<8x8xf32> -> vector<8x8xf32>
    %cst_52 = arith.constant -1.000000e+30 : f32
    %123 = vector.broadcast %cst_52 : f32 to vector<8x8xf32>
    %124 = arith.select %23, %122, %123 : vector<8x8xi1>, vector<8x8xf32>
    %cst_53 = arith.constant dense<0xFF800000> : vector<8xf32>
    %125 = vector.multi_reduction <maximumf>, %124, %cst_53 [1] : vector<8x8xf32> to vector<8xf32>
    %126 = vector.shape_cast %125 : vector<8xf32> to vector<8x1xf32>
    %127 = arith.maximumf %113#0, %126 : vector<8x1xf32>
    %128 = arith.subf %113#0, %127 : vector<8x1xf32>
    %129 = math.exp %128 : vector<8x1xf32>
    %130 = vector.broadcast %127 : vector<8x1xf32> to vector<8x8xf32>
    %131 = arith.subf %124, %130 : vector<8x8xf32>
    %132 = math.exp %131 : vector<8x8xf32>
    %133 = arith.mulf %129, %113#1 : vector<8x1xf32>
    %cst_54 = arith.constant dense<0.000000e+00> : vector<8xf32>
    %134 = vector.multi_reduction <add>, %132, %cst_54 [1] : vector<8x8xf32> to vector<8xf32>
    %135 = vector.shape_cast %134 : vector<8xf32> to vector<8x1xf32>
    %136 = arith.addf %133, %135 : vector<8x1xf32>
    %137 = vector.broadcast %129 : vector<8x1xf32> to vector<8x8xf32>
    %138 = arith.mulf %137, %113#2 : vector<8x8xf32>
    %139 = arith.truncf %132 : vector<8x8xf32> to vector<8x8xbf16>
    %cst_55 = arith.constant dense<0.000000e+00> : vector<8x8xf32>
    %140 = tpu.matmul %139, %121, %cst_55 {dimension_numbers = #tpu.dot_dimension_numbers<[1], [0], [0], [1], [0, 0, 1, 1], [], []>} : vector<8x8xbf16>, vector<8x8xbf16>, vector<8x8xf32> -> vector<8x8xf32>
    %141 = arith.addf %138, %140 : vector<8x8xf32>
    %142 = tpu.reciprocal %136 {approx = true} : vector<8x1xf32> -> vector<8x1xf32>
    %143 = vector.broadcast %142 : vector<8x1xf32> to vector<8x8xf32>
    %144 = arith.mulf %141, %143 : vector<8x8xf32>
    %145 = arith.truncf %144 : vector<8x8xf32> to vector<8x8xbf16>
    %c0_56 = arith.constant 0 : index
    %c16 = arith.constant 16 : index
    %146 = vector.load %arg23[%c0_56, %c16] : memref<8x32xbf16, #tpu.memory_space<vmem>>, vector<8x8xbf16>
    tpu.vector_store %arg23[%c0_56, %c16], %145 {strides = array<i32>} : memref<8x32xbf16, #tpu.memory_space<vmem>>, vector<8x8xbf16>,
    %147 = vector.extract_strided_slice %20 {offsets = [0, 24], sizes = [8, 8], strides = [1, 1]} : vector<8x32xf32> to vector<8x8xf32>
    %148 = arith.truncf %147 : vector<8x8xf32> to vector<8x8xbf16>
    %cst_57 = arith.constant -1.000000e+30 : f32
    %149 = vector.broadcast %cst_57 : f32 to vector<8x1xf32>
    %cst_58 = arith.constant 0.000000e+00 : f32
    %150 = vector.broadcast %cst_58 : f32 to vector<8x1xf32>
    %cst_59 = arith.constant 0.000000e+00 : f32
    %151 = vector.broadcast %cst_59 : f32 to vector<8x8xf32>
    %c0_i32_60 = arith.constant 0 : i32
    %152 = arith.subi %arg1, %c0_i32_60 : i32
    %153 = arith.addi %c0_i32_60, %152 : i32
    %c1_i32_61 = arith.constant 1 : i32
    %154:3 = scf.for %arg24 = %c0_i32_60 to %153 step %c1_i32_61 iter_args(%arg25 = %149, %arg26 = %150, %arg27 = %151) -> (vector<8x1xf32>, vector<8x1xf32>, vector<8x8xf32>)  : i32 {
      %c8_i32_105 = arith.constant 8 : i32
      %258 = arith.muli %arg24, %c8_i32_105 : i32
      %259 = tpu.assume_multiple %258, 8 : i32
      %c3_106 = arith.constant 3 : index
      %260 = arith.index_cast %259 : i32 to index
      %c0_107 = arith.constant 0 : index
      %261 = vector.load %arg20[%c3_106, %260, %c0_107] : memref<4x8x8xbf16, #tpu.memory_space<vmem>>, vector<1x8x8xbf16>
      %262 = vector.shape_cast %261 : vector<1x8x8xbf16> to vector<8x8xbf16>
      %c3_108 = arith.constant 3 : index
      %263 = arith.index_cast %259 : i32 to index
      %c0_109 = arith.constant 0 : index
      %264 = vector.load %arg21[%c3_108, %263, %c0_109] : memref<4x8x8xbf16, #tpu.memory_space<vmem>>, vector<1x8x8xbf16>
      %265 = vector.shape_cast %264 : vector<1x8x8xbf16> to vector<8x8xbf16>
      %cst_110 = arith.constant dense<0.000000e+00> : vector<8x8xf32>
      %266 = tpu.matmul %148, %262, %cst_110 {dimension_numbers = #tpu.dot_dimension_numbers<[1], [1], [0], [0], [0, 0, 1, 0], [], []>} : vector<8x8xbf16>, vector<8x8xbf16>, vector<8x8xf32> -> vector<8x8xf32>
      %cst_111 = arith.constant dense<0xFF800000> : vector<8xf32>
      %267 = vector.multi_reduction <maximumf>, %266, %cst_111 [1] : vector<8x8xf32> to vector<8xf32>
      %268 = vector.shape_cast %267 : vector<8xf32> to vector<8x1xf32>
      %269 = arith.maximumf %arg25, %268 : vector<8x1xf32>
      %270 = arith.subf %arg25, %269 : vector<8x1xf32>
      %271 = math.exp %270 : vector<8x1xf32>
      %272 = vector.broadcast %269 : vector<8x1xf32> to vector<8x8xf32>
      %273 = arith.subf %266, %272 : vector<8x8xf32>
      %274 = math.exp %273 : vector<8x8xf32>
      %275 = arith.mulf %271, %arg26 : vector<8x1xf32>
      %cst_112 = arith.constant dense<0.000000e+00> : vector<8xf32>
      %276 = vector.multi_reduction <add>, %274, %cst_112 [1] : vector<8x8xf32> to vector<8xf32>
      %277 = vector.shape_cast %276 : vector<8xf32> to vector<8x1xf32>
      %278 = arith.addf %275, %277 : vector<8x1xf32>
      %279 = vector.broadcast %271 : vector<8x1xf32> to vector<8x8xf32>
      %280 = arith.mulf %279, %arg27 : vector<8x8xf32>
      %281 = arith.truncf %274 : vector<8x8xf32> to vector<8x8xbf16>
      %cst_113 = arith.constant dense<0.000000e+00> : vector<8x8xf32>
      %282 = tpu.matmul %281, %265, %cst_113 {dimension_numbers = #tpu.dot_dimension_numbers<[1], [0], [0], [1], [0, 0, 1, 1], [], []>} : vector<8x8xbf16>, vector<8x8xbf16>, vector<8x8xf32> -> vector<8x8xf32>
      %283 = arith.addf %280, %282 : vector<8x8xf32>
      scf.yield %269, %278, %283 : vector<8x1xf32>, vector<8x1xf32>, vector<8x8xf32>
    }
    %c8_i32_62 = arith.constant 8 : i32
    %155 = arith.muli %arg1, %c8_i32_62 : i32
    %156 = tpu.assume_multiple %155, 8 : i32
    %c3 = arith.constant 3 : index
    %157 = arith.index_cast %156 : i32 to index
    %c0_63 = arith.constant 0 : index
    %158 = vector.load %arg20[%c3, %157, %c0_63] : memref<4x8x8xbf16, #tpu.memory_space<vmem>>, vector<1x8x8xbf16>
    %159 = vector.shape_cast %158 : vector<1x8x8xbf16> to vector<8x8xbf16>
    %c3_64 = arith.constant 3 : index
    %160 = arith.index_cast %156 : i32 to index
    %c0_65 = arith.constant 0 : index
    %161 = vector.load %arg21[%c3_64, %160, %c0_65] : memref<4x8x8xbf16, #tpu.memory_space<vmem>>, vector<1x8x8xbf16>
    %162 = vector.shape_cast %161 : vector<1x8x8xbf16> to vector<8x8xbf16>
    %cst_66 = arith.constant dense<0.000000e+00> : vector<8x8xf32>
    %163 = tpu.matmul %148, %159, %cst_66 {dimension_numbers = #tpu.dot_dimension_numbers<[1], [1], [0], [0], [0, 0, 1, 0], [], []>} : vector<8x8xbf16>, vector<8x8xbf16>, vector<8x8xf32> -> vector<8x8xf32>
    %cst_67 = arith.constant -1.000000e+30 : f32
    %164 = vector.broadcast %cst_67 : f32 to vector<8x8xf32>
    %165 = arith.select %23, %163, %164 : vector<8x8xi1>, vector<8x8xf32>
    %cst_68 = arith.constant dense<0xFF800000> : vector<8xf32>
    %166 = vector.multi_reduction <maximumf>, %165, %cst_68 [1] : vector<8x8xf32> to vector<8xf32>
    %167 = vector.shape_cast %166 : vector<8xf32> to vector<8x1xf32>
    %168 = arith.maximumf %154#0, %167 : vector<8x1xf32>
    %169 = arith.subf %154#0, %168 : vector<8x1xf32>
    %170 = math.exp %169 : vector<8x1xf32>
    %171 = vector.broadcast %168 : vector<8x1xf32> to vector<8x8xf32>
    %172 = arith.subf %165, %171 : vector<8x8xf32>
    %173 = math.exp %172 : vector<8x8xf32>
    %174 = arith.mulf %170, %154#1 : vector<8x1xf32>
    %cst_69 = arith.constant dense<0.000000e+00> : vector<8xf32>
    %175 = vector.multi_reduction <add>, %173, %cst_69 [1] : vector<8x8xf32> to vector<8xf32>
    %176 = vector.shape_cast %175 : vector<8xf32> to vector<8x1xf32>
    %177 = arith.addf %174, %176 : vector<8x1xf32>
    %178 = vector.broadcast %170 : vector<8x1xf32> to vector<8x8xf32>
    %179 = arith.mulf %178, %154#2 : vector<8x8xf32>
    %180 = arith.truncf %173 : vector<8x8xf32> to vector<8x8xbf16>
    %cst_70 = arith.constant dense<0.000000e+00> : vector<8x8xf32>
    %181 = tpu.matmul %180, %162, %cst_70 {dimension_numbers = #tpu.dot_dimension_numbers<[1], [0], [0], [1], [0, 0, 1, 1], [], []>} : vector<8x8xbf16>, vector<8x8xbf16>, vector<8x8xf32> -> vector<8x8xf32>
    %182 = arith.addf %179, %181 : vector<8x8xf32>
    %183 = tpu.reciprocal %177 {approx = true} : vector<8x1xf32> -> vector<8x1xf32>
    %184 = vector.broadcast %183 : vector<8x1xf32> to vector<8x8xf32>
    %185 = arith.mulf %182, %184 : vector<8x8xf32>
    %186 = arith.truncf %185 : vector<8x8xf32> to vector<8x8xbf16>
    %c0_71 = arith.constant 0 : index
    %c24 = arith.constant 24 : index
    %187 = vector.load %arg23[%c0_71, %c24] : memref<8x32xbf16, #tpu.memory_space<vmem>>, vector<8x8xbf16>
    tpu.vector_store %arg23[%c0_71, %c24], %186 {strides = array<i32>} : memref<8x32xbf16, #tpu.memory_space<vmem>>, vector<8x8xbf16>,
    %c0_72 = arith.constant 0 : index
    %c0_73 = arith.constant 0 : index
    %188 = vector.load %arg23[%c0_72, %c0_73] : memref<8x32xbf16, #tpu.memory_space<vmem>>, vector<8x32xbf16>
    %c0_74 = arith.constant 0 : index
    %c0_75 = arith.constant 0 : index
    %189 = vector.load %arg11[%c0_74, %c0_75] : memref<32x32xbf16, #tpu.memory_space<vmem>>, vector<32x32xbf16>
    %cst_76 = arith.constant dense<0.000000e+00> : vector<8x32xf32>
    %190 = tpu.matmul %188, %189, %cst_76 {dimension_numbers = #tpu.dot_dimension_numbers<[1], [0], [0], [1], [0, 0, 1, 1], [], []>} : vector<8x32xbf16>, vector<32x32xbf16>, vector<8x32xf32> -> vector<8x32xf32>
    %191 = arith.addf %11, %190 : vector<8x32xf32>
    %c0_77 = arith.constant 0 : index
    %c0_78 = arith.constant 0 : index
    %192 = vector.load %arg12[%c0_77, %c0_78] : memref<1x32xf32, #tpu.memory_space<vmem>>, vector<1x32xf32>
    %193 = vector.shape_cast %192 : vector<1x32xf32> to vector<32xf32>
    %194 = vector.shape_cast %193 : vector<32xf32> to vector<1x32xf32>
    %195 = vector.broadcast %194 : vector<1x32xf32> to vector<8x32xf32>
    %196 = arith.addf %191, %195 : vector<8x32xf32>
    %c0_79 = arith.constant 0 : index
    %c0_80 = arith.constant 0 : index
    %197 = vector.load %arg13[%c0_79, %c0_80] : memref<1x32xf32, #tpu.memory_space<vmem>>, vector<1x32xf32>
    %198 = vector.shape_cast %197 : vector<1x32xf32> to vector<32xf32>
    %c0_81 = arith.constant 0 : index
    %c0_82 = arith.constant 0 : index
    %199 = vector.load %arg14[%c0_81, %c0_82] : memref<1x32xf32, #tpu.memory_space<vmem>>, vector<1x32xf32>
    %200 = vector.shape_cast %199 : vector<1x32xf32> to vector<32xf32>
    %cst_83 = arith.constant dense<0.000000e+00> : vector<8xf32>
    %201 = vector.multi_reduction <add>, %196, %cst_83 [1] : vector<8x32xf32> to vector<8xf32>
    %202 = vector.shape_cast %201 : vector<8xf32> to vector<8x1xf32>
    %cst_84 = arith.constant 3.200000e+01 : f32
    %203 = vector.broadcast %cst_84 : f32 to vector<8x1xf32>
    %204 = arith.divf %202, %203 : vector<8x1xf32>
    %205 = vector.broadcast %204 : vector<8x1xf32> to vector<8x32xf32>
    %206 = arith.subf %196, %205 : vector<8x32xf32>
    %207 = arith.mulf %206, %206 : vector<8x32xf32>
    %cst_85 = arith.constant dense<0.000000e+00> : vector<8xf32>
    %208 = vector.multi_reduction <add>, %207, %cst_85 [1] : vector<8x32xf32> to vector<8xf32>
    %209 = vector.shape_cast %208 : vector<8xf32> to vector<8x1xf32>
    %cst_86 = arith.constant 3.200000e+01 : f32
    %210 = vector.broadcast %cst_86 : f32 to vector<8x1xf32>
    %211 = arith.divf %209, %210 : vector<8x1xf32>
    %212 = vector.broadcast %204 : vector<8x1xf32> to vector<8x32xf32>
    %213 = arith.subf %196, %212 : vector<8x32xf32>
    %cst_87 = arith.constant 9.99999974E-6 : f32
    %214 = vector.broadcast %cst_87 : f32 to vector<8x1xf32>
    %215 = arith.addf %211, %214 : vector<8x1xf32>
    %216 = math.rsqrt %215 : vector<8x1xf32>
    %217 = vector.broadcast %216 : vector<8x1xf32> to vector<8x32xf32>
    %218 = arith.mulf %213, %217 : vector<8x32xf32>
    %219 = vector.shape_cast %198 : vector<32xf32> to vector<1x32xf32>
    %220 = vector.broadcast %219 : vector<1x32xf32> to vector<8x32xf32>
    %221 = arith.mulf %218, %220 : vector<8x32xf32>
    %222 = vector.shape_cast %200 : vector<32xf32> to vector<1x32xf32>
    %223 = vector.broadcast %222 : vector<1x32xf32> to vector<8x32xf32>
    %224 = arith.addf %221, %223 : vector<8x32xf32>
    %225 = arith.truncf %224 : vector<8x32xf32> to vector<8x32xbf16>
    %c0_88 = arith.constant 0 : index
    %c0_89 = arith.constant 0 : index
    %226 = vector.load %arg18[%c0_88, %c0_89] : memref<1x32xf32, #tpu.memory_space<vmem>>, vector<1x32xf32>
    %227 = vector.shape_cast %226 : vector<1x32xf32> to vector<32xf32>
    %228 = vector.shape_cast %227 : vector<32xf32> to vector<1x32xf32>
    %229 = vector.broadcast %228 : vector<1x32xf32> to vector<8x32xf32>
    %230 = arith.addf %196, %229 : vector<8x32xf32>
    %c0_90 = arith.constant 0 : index
    %c0_91 = arith.constant 0 : index
    %231 = vector.load %arg15[%c0_90, %c0_91] : memref<32x128xbf16, #tpu.memory_space<vmem>>, vector<32x128xbf16>
    %cst_92 = arith.constant dense<0.000000e+00> : vector<8x128xf32>
    %232 = tpu.matmul %225, %231, %cst_92 {dimension_numbers = #tpu.dot_dimension_numbers<[1], [0], [0], [1], [0, 0, 1, 1], [], []>} : vector<8x32xbf16>, vector<32x128xbf16>, vector<8x128xf32> -> vector<8x128xf32>
    %c0_93 = arith.constant 0 : index
    %c0_94 = arith.constant 0 : index
    %233 = vector.load %arg16[%c0_93, %c0_94] : memref<1x128xf32, #tpu.memory_space<vmem>>, vector<1x128xf32>
    %234 = vector.shape_cast %233 : vector<1x128xf32> to vector<128xf32>
    %235 = vector.shape_cast %234 : vector<128xf32> to vector<1x128xf32>
    %236 = vector.broadcast %235 : vector<1x128xf32> to vector<8x128xf32>
    %237 = arith.addf %232, %236 : vector<8x128xf32>
    %cst_95 = arith.constant 5.000000e-01 : f32
    %238 = vector.broadcast %cst_95 : f32 to vector<8x128xf32>
    %239 = arith.mulf %238, %237 : vector<8x128xf32>
    %cst_96 = arith.constant 4.471500e-02 : f32
    %240 = vector.broadcast %cst_96 : f32 to vector<8x128xf32>
    %241 = arith.mulf %240, %237 : vector<8x128xf32>
    %242 = arith.mulf %241, %237 : vector<8x128xf32>
    %243 = arith.mulf %242, %237 : vector<8x128xf32>
    %244 = arith.addf %237, %243 : vector<8x128xf32>
    %cst_97 = arith.constant 0.797884583 : f32
    %245 = vector.broadcast %cst_97 : f32 to vector<8x128xf32>
    %246 = arith.mulf %245, %244 : vector<8x128xf32>
    %247 = math.tanh %246 : vector<8x128xf32>
    %cst_98 = arith.constant 1.000000e+00 : f32
    %248 = vector.broadcast %cst_98 : f32 to vector<8x128xf32>
    %249 = arith.addf %248, %247 : vector<8x128xf32>
    %250 = arith.mulf %239, %249 : vector<8x128xf32>
    %251 = arith.truncf %250 : vector<8x128xf32> to vector<8x128xbf16>
    %c0_99 = arith.constant 0 : index
    %c0_100 = arith.constant 0 : index
    %252 = vector.load %arg17[%c0_99, %c0_100] : memref<128x32xbf16, #tpu.memory_space<vmem>>, vector<128x32xbf16>
    %cst_101 = arith.constant dense<0.000000e+00> : vector<8x32xf32>
    %253 = tpu.matmul %251, %252, %cst_101 {dimension_numbers = #tpu.dot_dimension_numbers<[1], [0], [0], [1], [0, 0, 1, 1], [], []>} : vector<8x128xbf16>, vector<128x32xbf16>, vector<8x32xf32> -> vector<8x32xf32>
    %254 = arith.addf %230, %253 : vector<8x32xf32>
    %c0_102 = arith.constant 0 : index
    %c0_103 = arith.constant 0 : index
    %c0_104 = arith.constant 0 : index
    %255 = vector.load %arg19[%c0_102, %c0_103, %c0_104] : memref<1x8x32xf32, #tpu.memory_space<vmem>>, vector<1x8x32xf32>
    %256 = vector.shape_cast %255 : vector<1x8x32xf32> to vector<8x32xf32>
    %257 = vector.shape_cast %254 : vector<8x32xf32> to vector<1x8x32xf32>
    tpu.vector_store %arg19[%c0_102, %c0_103, %c0_104], %257 {strides = array<i32>} : memref<1x8x32xf32, #tpu.memory_space<vmem>>, vector<1x8x32xf32>,
    return
  }
  func.func @transform_0(%arg0: i32, %arg1: i32) -> (i32, i32, i32) {
    %c0_i32 = arith.constant 0 : i32
    %c0_i32_0 = arith.constant 0 : i32
    %c0_i32_1 = arith.constant 0 : i32
    return %arg0, %c0_i32, %c0_i32_0 : i32, i32, i32
  }
  func.func @transform_1(%arg0: i32, %arg1: i32) -> (i32, i32) {
    %c0_i32 = arith.constant 0 : i32
    %c0_i32_0 = arith.constant 0 : i32
    %c0_i32_1 = arith.constant 0 : i32
    return %c0_i32, %c0_i32_0 : i32, i32
  }
  func.func @transform_2(%arg0: i32, %arg1: i32) -> (i32, i32) {
    %c0_i32 = arith.constant 0 : i32
    %c0_i32_0 = arith.constant 0 : i32
    %c0_i32_1 = arith.constant 0 : i32
    return %c0_i32, %c0_i32_0 : i32, i32
  }
  func.func @transform_3(%arg0: i32, %arg1: i32) -> (i32, i32) {
    %c0_i32 = arith.constant 0 : i32
    %c0_i32_0 = arith.constant 0 : i32
    %c0_i32_1 = arith.constant 0 : i32
    return %c0_i32, %c0_i32_0 : i32, i32
  }
  func.func @transform_4(%arg0: i32, %arg1: i32) -> (i32, i32) {
    %c0_i32 = arith.constant 0 : i32
    %c0_i32_0 = arith.constant 0 : i32
    %c0_i32_1 = arith.constant 0 : i32
    return %c0_i32, %c0_i32_0 : i32, i32
  }
  func.func @transform_5(%arg0: i32, %arg1: i32) -> (i32, i32) {
    %c0_i32 = arith.constant 0 : i32
    %c0_i32_0 = arith.constant 0 : i32
    %c0_i32_1 = arith.constant 0 : i32
    return %c0_i32, %c0_i32_0 : i32, i32
  }
  func.func @transform_6(%arg0: i32, %arg1: i32) -> (i32, i32) {
    %c0_i32 = arith.constant 0 : i32
    %c0_i32_0 = arith.constant 0 : i32
    %c0_i32_1 = arith.constant 0 : i32
    return %c0_i32, %c0_i32_0 : i32, i32
  }
  func.func @transform_7(%arg0: i32, %arg1: i32) -> (i32, i32) {
    %c0_i32 = arith.constant 0 : i32
    %c0_i32_0 = arith.constant 0 : i32
    %c0_i32_1 = arith.constant 0 : i32
    return %c0_i32, %c0_i32_0 : i32, i32
  }
  func.func @transform_8(%arg0: i32, %arg1: i32) -> (i32, i32) {
    %c0_i32 = arith.constant 0 : i32
    %c0_i32_0 = arith.constant 0 : i32
    %c0_i32_1 = arith.constant 0 : i32
    return %c0_i32, %c0_i32_0 : i32, i32
  }
  func.func @transform_9(%arg0: i32, %arg1: i32) -> (i32, i32) {
    %c0_i32 = arith.constant 0 : i32
    %c0_i32_0 = arith.constant 0 : i32
    %c0_i32_1 = arith.constant 0 : i32
    return %c0_i32, %c0_i32_0 : i32, i32
  }
  func.func @transform_10(%arg0: i32, %arg1: i32) -> (i32, i32) {
    %c0_i32 = arith.constant 0 : i32
    %c0_i32_0 = arith.constant 0 : i32
    %c0_i32_1 = arith.constant 0 : i32
    return %c0_i32, %c0_i32_0 : i32, i32
  }
  func.func @transform_11(%arg0: i32, %arg1: i32) -> (i32, i32) {
    %c0_i32 = arith.constant 0 : i32
    %c0_i32_0 = arith.constant 0 : i32
    %c0_i32_1 = arith.constant 0 : i32
    return %c0_i32, %c0_i32_0 : i32, i32
  }
  func.func @transform_12(%arg0: i32, %arg1: i32) -> (i32, i32) {
    %c0_i32 = arith.constant 0 : i32
    %c0_i32_0 = arith.constant 0 : i32
    %c0_i32_1 = arith.constant 0 : i32
    return %c0_i32, %c0_i32_0 : i32, i32
  }
  func.func @transform_13(%arg0: i32, %arg1: i32) -> (i32, i32) {
    %c0_i32 = arith.constant 0 : i32
    %c0_i32_0 = arith.constant 0 : i32
    %c0_i32_1 = arith.constant 0 : i32
    return %c0_i32, %c0_i32_0 : i32, i32
  }
  func.func @transform_14(%arg0: i32, %arg1: i32) -> (i32, i32) {
    %c0_i32 = arith.constant 0 : i32
    %c0_i32_0 = arith.constant 0 : i32
    %c0_i32_1 = arith.constant 0 : i32
    return %c0_i32, %c0_i32_0 : i32, i32
  }
  func.func @transform_15(%arg0: i32, %arg1: i32) -> (i32, i32) {
    %c0_i32 = arith.constant 0 : i32
    %c0_i32_0 = arith.constant 0 : i32
    %c0_i32_1 = arith.constant 0 : i32
    return %c0_i32, %c0_i32_0 : i32, i32
  }
  func.func @transform_16(%arg0: i32, %arg1: i32) -> (i32, i32) {
    %c0_i32 = arith.constant 0 : i32
    %c0_i32_0 = arith.constant 0 : i32
    %c0_i32_1 = arith.constant 0 : i32
    return %c0_i32, %c0_i32_0 : i32, i32
  }
  func.func @transform_17(%arg0: i32, %arg1: i32) -> (i32, i32, i32) {
    %c0_i32 = arith.constant 0 : i32
    %c0_i32_0 = arith.constant 0 : i32
    return %arg0, %arg1, %c0_i32 : i32, i32, i32
  }
}

module attributes {stable_mosaic.version = 11 : i64} {
  func.func @transformer_kernel(%arg0: i32, %arg1: i32, %arg2: memref<1x8x32xf32, #tpu.memory_space<vmem>>, %arg3: memref<1x32xf32, #tpu.memory_space<vmem>>, %arg4: memref<1x32xf32, #tpu.memory_space<vmem>>, %arg5: memref<32x32xbf16, #tpu.memory_space<vmem>>, %arg6: memref<32x32xbf16, #tpu.memory_space<vmem>>, %arg7: memref<32x32xbf16, #tpu.memory_space<vmem>>, %arg8: memref<1x32xf32, #tpu.memory_space<vmem>>, %arg9: memref<1x32xf32, #tpu.memory_space<vmem>>, %arg10: memref<1x32xf32, #tpu.memory_space<vmem>>, %arg11: memref<32x32xbf16, #tpu.memory_space<vmem>>, %arg12: memref<1x32xf32, #tpu.memory_space<vmem>>, %arg13: memref<1x32xf32, #tpu.memory_space<vmem>>, %arg14: memref<1x32xf32, #tpu.memory_space<vmem>>, %arg15: memref<32x128xbf16, #tpu.memory_space<vmem>>, %arg16: memref<1x128xf32, #tpu.memory_space<vmem>>, %arg17: memref<128x32xbf16, #tpu.memory_space<vmem>>, %arg18: memref<1x32xf32, #tpu.memory_space<vmem>>, %arg19: memref<1x8x32xf32, #tpu.memory_space<vmem>>, %arg20: memref<4x8x8xbf16, #tpu.memory_space<vmem>>, %arg21: memref<4x8x8xbf16, #tpu.memory_space<vmem>>, %arg22: memref<8x32xbf16, #tpu.memory_space<vmem>>, %arg23: memref<8x32xbf16, #tpu.memory_space<vmem>>) attributes {dimension_semantics = [#tpu.dimension_semantics<parallel>, #tpu.dimension_semantics<arbitrary>], iteration_bounds = array<i64: 2, 1>, scalar_prefetch = 0 : i64, scratch_operands = 4 : i64, tpu.core_type = #tpu.core_type<tc>, window_params = [{transform_indices = @transform_0, window_bounds = array<i64: 1, 8, 32>}, {pipeline_mode = #tpu.pipeline_mode<synchronous>, transform_indices = @transform_1, window_bounds = array<i64: 1, 32>}, {pipeline_mode = #tpu.pipeline_mode<synchronous>, transform_indices = @transform_2, window_bounds = array<i64: 1, 32>}, {pipeline_mode = #tpu.pipeline_mode<synchronous>, transform_indices = @transform_3, window_bounds = array<i64: 32, 32>}, {pipeline_mode = #tpu.pipeline_mode<synchronous>, transform_indices = @transform_4, window_bounds = array<i64: 32, 32>}, {pipeline_mode = #tpu.pipeline_mode<synchronous>, transform_indices = @transform_5, window_bounds = array<i64: 32, 32>}, {pipeline_mode = #tpu.pipeline_mode<synchronous>, transform_indices = @transform_6, window_bounds = array<i64: 1, 32>}, {pipeline_mode = #tpu.pipeline_mode<synchronous>, transform_indices = @transform_7, window_bounds = array<i64: 1, 32>}, {pipeline_mode = #tpu.pipeline_mode<synchronous>, transform_indices = @transform_8, window_bounds = array<i64: 1, 32>}, {pipeline_mode = #tpu.pipeline_mode<synchronous>, transform_indices = @transform_9, window_bounds = array<i64: 32, 32>}, {pipeline_mode = #tpu.pipeline_mode<synchronous>, transform_indices = @transform_10, window_bounds = array<i64: 1, 32>}, {pipeline_mode = #tpu.pipeline_mode<synchronous>, transform_indices = @transform_11, window_bounds = array<i64: 1, 32>}, {pipeline_mode = #tpu.pipeline_mode<synchronous>, transform_indices = @transform_12, window_bounds = array<i64: 1, 32>}, {pipeline_mode = #tpu.pipeline_mode<synchronous>, transform_indices = @transform_13, window_bounds = array<i64: 32, 128>}, {pipeline_mode = #tpu.pipeline_mode<synchronous>, transform_indices = @transform_14, window_bounds = array<i64: 1, 128>}, {pipeline_mode = #tpu.pipeline_mode<synchronous>, transform_indices = @transform_15, window_bounds = array<i64: 128, 32>}, {pipeline_mode = #tpu.pipeline_mode<synchronous>, transform_indices = @transform_16, window_bounds = array<i64: 1, 32>}, {transform_indices = @transform_17, window_bounds = array<i64: 1, 8, 32>}]} {
    %c0 = arith.constant 0 : index
    %c0_0 = arith.constant 0 : index
    %0 = vector.load %arg3[%c0, %c0_0] : memref<1x32xf32, #tpu.memory_space<vmem>>, vector<1x32xf32>
    %1 = vector.shape_cast %0 : vector<1x32xf32> to vector<32xf32>
    %c0_1 = arith.constant 0 : index
    %c0_2 = arith.constant 0 : index
    %2 = vector.load %arg4[%c0_1, %c0_2] : memref<1x32xf32, #tpu.memory_space<vmem>>, vector<1x32xf32>
    %3 = vector.shape_cast %2 : vector<1x32xf32> to vector<32xf32>
    %c0_i32 = arith.constant 0 : i32
    %4 = arith.cmpi eq, %arg1, %c0_i32 : i32
    %5 = arith.extui %4 : i1 to i32
    %c0_i32_3 = arith.constant 0 : i32
    %6 = arith.cmpi ne, %5, %c0_i32_3 : i32
    scf.if %6 {
      %c0_i32_105 = arith.constant 0 : i32
      %c8_i32_106 = arith.constant 8 : i32
      %258 = arith.muli %c0_i32_105, %c8_i32_106 : i32
      %259 = tpu.assume_multiple %258, 8 : i32
      %c0_107 = arith.constant 0 : index
      %260 = arith.index_cast %259 : i32 to index
      %c0_108 = arith.constant 0 : index
      %261 = vector.load %arg2[%c0_107, %260, %c0_108] : memref<1x8x32xf32, #tpu.memory_space<vmem>>, vector<1x8x32xf32>
      %262 = vector.shape_cast %261 : vector<1x8x32xf32> to vector<8x32xf32>
      %cst_109 = arith.constant dense<0.000000e+00> : vector<8xf32>
      %263 = vector.multi_reduction <add>, %262, %cst_109 [1] : vector<8x32xf32> to vector<8xf32>
      %264 = vector.shape_cast %263 : vector<8xf32> to vector<8x1xf32>
      %cst_110 = arith.constant 3.200000e+01 : f32
      %265 = vector.broadcast %cst_110 : f32 to vector<8x1xf32>
      %266 = arith.divf %264, %265 : vector<8x1xf32>
      %267 = vector.broadcast %266 : vector<8x1xf32> to vector<8x32xf32>
      %268 = arith.subf %262, %267 : vector<8x32xf32>
      %269 = arith.mulf %268, %268 : vector<8x32xf32>
      %cst_111 = arith.constant dense<0.000000e+00> : vector<8xf32>
      %270 = vector.multi_reduction <add>, %269, %cst_111 [1] : vector<8x32xf32> to vector<8xf32>
      %271 = vector.shape_cast %270 : vector<8xf32> to vector<8x1xf32>
      %cst_112 = arith.constant 3.200000e+01 : f32
      %272 = vector.broadcast %cst_112 : f32 to vector<8x1xf32>
      %273 = arith.divf %271, %272 : vector<8x1xf32>
      %274 = vector.broadcast %266 : vector<8x1xf32> to vector<8x32xf32>
      %275 = arith.subf %262, %274 : vector<8x32xf32>
      %cst_113 = arith.constant 9.99999974E-6 : f32
      %276 = vector.broadcast %cst_113 : f32 to vector<8x1xf32>
      %277 = arith.addf %273, %276 : vector<8x1xf32>
      %278 = math.rsqrt %277 : vector<8x1xf32>
      %279 = vector.broadcast %278 : vector<8x1xf32> to vector<8x32xf32>
      %280 = arith.mulf %275, %279 : vector<8x32xf32>
      %281 = vector.shape_cast %1 : vector<32xf32> to vector<1x32xf32>
      %282 = vector.broadcast %281 : vector<1x32xf32> to vector<8x32xf32>
      %283 = arith.mulf %280, %282 : vector<8x32xf32>
      %284 = vector.shape_cast %3 : vector<32xf32> to vector<1x32xf32>
      %285 = vector.broadcast %284 : vector<1x32xf32> to vector<8x32xf32>
      %286 = arith.addf %283, %285 : vector<8x32xf32>
      %287 = arith.truncf %286 : vector<8x32xf32> to vector<8x32xbf16>
      %288 = arith.index_cast %259 : i32 to index
      %c0_114 = arith.constant 0 : index
      %289 = vector.load %arg22[%288, %c0_114] : memref<8x32xbf16, #tpu.memory_space<vmem>>, vector<8x32xbf16>
      tpu.vector_store %arg22[%288, %c0_114], %287 {strides = array<i32>} : memref<8x32xbf16, #tpu.memory_space<vmem>>, vector<8x32xbf16>,
      %c0_115 = arith.constant 0 : index
      %c0_116 = arith.constant 0 : index
      %290 = vector.load %arg6[%c0_115, %c0_116] : memref<32x32xbf16, #tpu.memory_space<vmem>>, vector<32x32xbf16>
      %cst_117 = arith.constant dense<0.000000e+00> : vector<8x32xf32>
      %291 = tpu.matmul %287, %290, %cst_117 {dimension_numbers = #tpu.dot_dimension_numbers<[1], [0], [0], [1], [0, 0, 1, 1], [], []>} : vector<8x32xbf16>, vector<32x32xbf16>, vector<8x32xf32> -> vector<8x32xf32>
      %c0_118 = arith.constant 0 : index
      %c0_119 = arith.constant 0 : index
      %292 = vector.load %arg9[%c0_118, %c0_119] : memref<1x32xf32, #tpu.memory_space<vmem>>, vector<1x32xf32>
      %293 = vector.shape_cast %292 : vector<1x32xf32> to vector<32xf32>
      %294 = vector.shape_cast %293 : vector<32xf32> to vector<1x32xf32>
      %295 = vector.broadcast %294 : vector<1x32xf32> to vector<8x32xf32>
      %296 = arith.addf %291, %295 : vector<8x32xf32>
      %297 = arith.truncf %296 : vector<8x32xf32> to vector<8x32xbf16>
      %c0_120 = arith.constant 0 : index
      %c0_121 = arith.constant 0 : index
      %298 = vector.load %arg7[%c0_120, %c0_121] : memref<32x32xbf16, #tpu.memory_space<vmem>>, vector<32x32xbf16>
      %cst_122 = arith.constant dense<0.000000e+00> : vector<8x32xf32>
      %299 = tpu.matmul %287, %298, %cst_122 {dimension_numbers = #tpu.dot_dimension_numbers<[1], [0], [0], [1], [0, 0, 1, 1], [], []>} : vector<8x32xbf16>, vector<32x32xbf16>, vector<8x32xf32> -> vector<8x32xf32>
      %c0_123 = arith.constant 0 : index
      %c0_124 = arith.constant 0 : index
      %300 = vector.load %arg10[%c0_123, %c0_124] : memref<1x32xf32, #tpu.memory_space<vmem>>, vector<1x32xf32>
      %301 = vector.shape_cast %300 : vector<1x32xf32> to vector<32xf32>
      %302 = vector.shape_cast %301 : vector<32xf32> to vector<1x32xf32>
      %303 = vector.broadcast %302 : vector<1x32xf32> to vector<8x32xf32>
      %304 = arith.addf %299, %303 : vector<8x32xf32>
      %305 = arith.truncf %304 : vector<8x32xf32> to vector<8x32xbf16>
      %306 = vector.extract_strided_slice %297 {offsets = [0, 0], sizes = [8, 8], strides = [1, 1]} : vector<8x32xbf16> to vector<8x8xbf16>
      %c0_125 = arith.constant 0 : index
      %307 = arith.index_cast %259 : i32 to index
      %c0_126 = arith.constant 0 : index
      %308 = vector.load %arg20[%c0_125, %307, %c0_126] : memref<4x8x8xbf16, #tpu.memory_space<vmem>>, vector<1x8x8xbf16>
      %309 = vector.shape_cast %308 : vector<1x8x8xbf16> to vector<8x8xbf16>
      %310 = vector.shape_cast %306 : vector<8x8xbf16> to vector<1x8x8xbf16>
      tpu.vector_store %arg20[%c0_125, %307, %c0_126], %310 {strides = array<i32>} : memref<4x8x8xbf16, #tpu.memory_space<vmem>>, vector<1x8x8xbf16>,
      %311 = vector.extract_strided_slice %305 {offsets = [0, 0], sizes = [8, 8], strides = [1, 1]} : vector<8x32xbf16> to vector<8x8xbf16>
      %c0_127 = arith.constant 0 : index
      %312 = arith.index_cast %259 : i32 to index
      %c0_128 = arith.constant 0 : index
      %313 = vector.load %arg21[%c0_127, %312, %c0_128] : memref<4x8x8xbf16, #tpu.memory_space<vmem>>, vector<1x8x8xbf16>
      %314 = vector.shape_cast %313 : vector<1x8x8xbf16> to vector<8x8xbf16>
      %315 = vector.shape_cast %311 : vector<8x8xbf16> to vector<1x8x8xbf16>
      tpu.vector_store %arg21[%c0_127, %312, %c0_128], %315 {strides = array<i32>} : memref<4x8x8xbf16, #tpu.memory_space<vmem>>, vector<1x8x8xbf16>,
      %316 = vector.extract_strided_slice %297 {offsets = [0, 8], sizes = [8, 8], strides = [1, 1]} : vector<8x32xbf16> to vector<8x8xbf16>
      %c1_129 = arith.constant 1 : index
      %317 = arith.index_cast %259 : i32 to index
      %c0_130 = arith.constant 0 : index
      %318 = vector.load %arg20[%c1_129, %317, %c0_130] : memref<4x8x8xbf16, #tpu.memory_space<vmem>>, vector<1x8x8xbf16>
      %319 = vector.shape_cast %318 : vector<1x8x8xbf16> to vector<8x8xbf16>
      %320 = vector.shape_cast %316 : vector<8x8xbf16> to vector<1x8x8xbf16>
      tpu.vector_store %arg20[%c1_129, %317, %c0_130], %320 {strides = array<i32>} : memref<4x8x8xbf16, #tpu.memory_space<vmem>>, vector<1x8x8xbf16>,
      %321 = vector.extract_strided_slice %305 {offsets = [0, 8], sizes = [8, 8], strides = [1, 1]} : vector<8x32xbf16> to vector<8x8xbf16>
      %c1_131 = arith.constant 1 : index
      %322 = arith.index_cast %259 : i32 to index
      %c0_132 = arith.constant 0 : index
      %323 = vector.load %arg21[%c1_131, %322, %c0_132] : memref<4x8x8xbf16, #tpu.memory_space<vmem>>, vector<1x8x8xbf16>
      %324 = vector.shape_cast %323 : vector<1x8x8xbf16> to vector<8x8xbf16>
      %325 = vector.shape_cast %321 : vector<8x8xbf16> to vector<1x8x8xbf16>
      tpu.vector_store %arg21[%c1_131, %322, %c0_132], %325 {strides = array<i32>} : memref<4x8x8xbf16, #tpu.memory_space<vmem>>, vector<1x8x8xbf16>,
      %326 = vector.extract_strided_slice %297 {offsets = [0, 16], sizes = [8, 8], strides = [1, 1]} : vector<8x32xbf16> to vector<8x8xbf16>
      %c2_133 = arith.constant 2 : index
      %327 = arith.index_cast %259 : i32 to index
      %c0_134 = arith.constant 0 : index
      %328 = vector.load %arg20[%c2_133, %327, %c0_134] : memref<4x8x8xbf16, #tpu.memory_space<vmem>>, vector<1x8x8xbf16>
      %329 = vector.shape_cast %328 : vector<1x8x8xbf16> to vector<8x8xbf16>
      %330 = vector.shape_cast %326 : vector<8x8xbf16> to vector<1x8x8xbf16>
      tpu.vector_store %arg20[%c2_133, %327, %c0_134], %330 {strides = array<i32>} : memref<4x8x8xbf16, #tpu.memory_space<vmem>>, vector<1x8x8xbf16>,
      %331 = vector.extract_strided_slice %305 {offsets = [0, 16], sizes = [8, 8], strides = [1, 1]} : vector<8x32xbf16> to vector<8x8xbf16>
      %c2_135 = arith.constant 2 : index
      %332 = arith.index_cast %259 : i32 to index
      %c0_136 = arith.constant 0 : index
      %333 = vector.load %arg21[%c2_135, %332, %c0_136] : memref<4x8x8xbf16, #tpu.memory_space<vmem>>, vector<1x8x8xbf16>
      %334 = vector.shape_cast %333 : vector<1x8x8xbf16> to vector<8x8xbf16>
      %335 = vector.shape_cast %331 : vector<8x8xbf16> to vector<1x8x8xbf16>
      tpu.vector_store %arg21[%c2_135, %332, %c0_136], %335 {strides = array<i32>} : memref<4x8x8xbf16, #tpu.memory_space<vmem>>, vector<1x8x8xbf16>,
      %336 = vector.extract_strided_slice %297 {offsets = [0, 24], sizes = [8, 8], strides = [1, 1]} : vector<8x32xbf16> to vector<8x8xbf16>
      %c3_137 = arith.constant 3 : index
      %337 = arith.index_cast %259 : i32 to index
      %c0_138 = arith.constant 0 : index
      %338 = vector.load %arg20[%c3_137, %337, %c0_138] : memref<4x8x8xbf16, #tpu.memory_space<vmem>>, vector<1x8x8xbf16>
      %339 = vector.shape_cast %338 : vector<1x8x8xbf16> to vector<8x8xbf16>
      %340 = vector.shape_cast %336 : vector<8x8xbf16> to vector<1x8x8xbf16>
      tpu.vector_store %arg20[%c3_137, %337, %c0_138], %340 {strides = array<i32>} : memref<4x8x8xbf16, #tpu.memory_space<vmem>>, vector<1x8x8xbf16>,
      %341 = vector.extract_strided_slice %305 {offsets = [0, 24], sizes = [8, 8], strides = [1, 1]} : vector<8x32xbf16> to vector<8x8xbf16>
      %c3_139 = arith.constant 3 : index
      %342 = arith.index_cast %259 : i32 to index
      %c0_140 = arith.constant 0 : index
      %343 = vector.load %arg21[%c3_139, %342, %c0_140] : memref<4x8x8xbf16, #tpu.memory_space<vmem>>, vector<1x8x8xbf16>
      %344 = vector.shape_cast %343 : vector<1x8x8xbf16> to vector<8x8xbf16>
      %345 = vector.shape_cast %341 : vector<8x8xbf16> to vector<1x8x8xbf16>
      tpu.vector_store %arg21[%c3_139, %342, %c0_140], %345 {strides = array<i32>} : memref<4x8x8xbf16, #tpu.memory_space<vmem>>, vector<1x8x8xbf16>,
      %c1_i32_141 = arith.constant 1 : i32
    } else {
    }
    %c8_i32 = arith.constant 8 : i32
    %7 = arith.muli %arg1, %c8_i32 : i32
    %8 = tpu.assume_multiple %7, 8 : i32
    %c0_4 = arith.constant 0 : index
    %9 = arith.index_cast %8 : i32 to index
    %c0_5 = arith.constant 0 : index
    %10 = vector.load %arg2[%c0_4, %9, %c0_5] : memref<1x8x32xf32, #tpu.memory_space<vmem>>, vector<1x8x32xf32>
    %11 = vector.shape_cast %10 : vector<1x8x32xf32> to vector<8x32xf32>
    %12 = arith.index_cast %8 : i32 to index
    %c0_6 = arith.constant 0 : index
    %13 = vector.load %arg22[%12, %c0_6] : memref<8x32xbf16, #tpu.memory_space<vmem>>, vector<8x32xbf16>
    %c0_7 = arith.constant 0 : index
    %c0_8 = arith.constant 0 : index
    %14 = vector.load %arg5[%c0_7, %c0_8] : memref<32x32xbf16, #tpu.memory_space<vmem>>, vector<32x32xbf16>
    %cst = arith.constant dense<0.000000e+00> : vector<8x32xf32>
    %15 = tpu.matmul %13, %14, %cst {dimension_numbers = #tpu.dot_dimension_numbers<[1], [0], [0], [1], [0, 0, 1, 1], [], []>} : vector<8x32xbf16>, vector<32x32xbf16>, vector<8x32xf32> -> vector<8x32xf32>
    %c0_9 = arith.constant 0 : index
    %c0_10 = arith.constant 0 : index
    %16 = vector.load %arg8[%c0_9, %c0_10] : memref<1x32xf32, #tpu.memory_space<vmem>>, vector<1x32xf32>
    %17 = vector.shape_cast %16 : vector<1x32xf32> to vector<32xf32>
    %18 = vector.shape_cast %17 : vector<32xf32> to vector<1x32xf32>
    %19 = vector.broadcast %18 : vector<1x32xf32> to vector<8x32xf32>
    %20 = arith.addf %15, %19 : vector<8x32xf32>
    %21 = tpu.iota {dimensions = array<i32: 1>} : vector<8x8xi32>
    %22 = tpu.iota {dimensions = array<i32: 0>} : vector<8x8xi32>
    %23 = arith.cmpi sle, %21, %22 : vector<8x8xi32>
    %24 = vector.extract_strided_slice %20 {offsets = [0, 0], sizes = [8, 8], strides = [1, 1]} : vector<8x32xf32> to vector<8x8xf32>
    %25 = arith.truncf %24 : vector<8x8xf32> to vector<8x8xbf16>
    %cst_11 = arith.constant -1.000000e+30 : f32
    %26 = vector.broadcast %cst_11 : f32 to vector<8x1xf32>
    %cst_12 = arith.constant 0.000000e+00 : f32
    %27 = vector.broadcast %cst_12 : f32 to vector<8x1xf32>
    %cst_13 = arith.constant 0.000000e+00 : f32
    %28 = vector.broadcast %cst_13 : f32 to vector<8x8xf32>
    %c0_i32_14 = arith.constant 0 : i32
    %29 = arith.subi %arg1, %c0_i32_14 : i32
    %30 = arith.addi %c0_i32_14, %29 : i32
    %c1_i32 = arith.constant 1 : i32
    %31:3 = scf.for %arg24 = %c0_i32_14 to %30 step %c1_i32 iter_args(%arg25 = %26, %arg26 = %27, %arg27 = %28) -> (vector<8x1xf32>, vector<8x1xf32>, vector<8x8xf32>)  : i32 {
      %c8_i32_105 = arith.constant 8 : i32
      %258 = arith.muli %arg24, %c8_i32_105 : i32
      %259 = tpu.assume_multiple %258, 8 : i32
      %c0_106 = arith.constant 0 : index
      %260 = arith.index_cast %259 : i32 to index
      %c0_107 = arith.constant 0 : index
      %261 = vector.load %arg20[%c0_106, %260, %c0_107] : memref<4x8x8xbf16, #tpu.memory_space<vmem>>, vector<1x8x8xbf16>
      %262 = vector.shape_cast %261 : vector<1x8x8xbf16> to vector<8x8xbf16>
      %c0_108 = arith.constant 0 : index
      %263 = arith.index_cast %259 : i32 to index
      %c0_109 = arith.constant 0 : index
      %264 = vector.load %arg21[%c0_108, %263, %c0_109] : memref<4x8x8xbf16, #tpu.memory_space<vmem>>, vector<1x8x8xbf16>
      %265 = vector.shape_cast %264 : vector<1x8x8xbf16> to vector<8x8xbf16>
      %cst_110 = arith.constant dense<0.000000e+00> : vector<8x8xf32>
      %266 = tpu.matmul %25, %262, %cst_110 {dimension_numbers = #tpu.dot_dimension_numbers<[1], [1], [0], [0], [0, 0, 1, 0], [], []>} : vector<8x8xbf16>, vector<8x8xbf16>, vector<8x8xf32> -> vector<8x8xf32>
      %cst_111 = arith.constant dense<0xFF800000> : vector<8xf32>
      %267 = vector.multi_reduction <maximumf>, %266, %cst_111 [1] : vector<8x8xf32> to vector<8xf32>
      %268 = vector.shape_cast %267 : vector<8xf32> to vector<8x1xf32>
      %269 = arith.maximumf %arg25, %268 : vector<8x1xf32>
      %270 = arith.subf %arg25, %269 : vector<8x1xf32>
      %271 = math.exp %270 : vector<8x1xf32>
      %272 = vector.broadcast %269 : vector<8x1xf32> to vector<8x8xf32>
      %273 = arith.subf %266, %272 : vector<8x8xf32>
      %274 = math.exp %273 : vector<8x8xf32>
      %275 = arith.mulf %271, %arg26 : vector<8x1xf32>
      %cst_112 = arith.constant dense<0.000000e+00> : vector<8xf32>
      %276 = vector.multi_reduction <add>, %274, %cst_112 [1] : vector<8x8xf32> to vector<8xf32>
      %277 = vector.shape_cast %276 : vector<8xf32> to vector<8x1xf32>
      %278 = arith.addf %275, %277 : vector<8x1xf32>
      %279 = vector.broadcast %271 : vector<8x1xf32> to vector<8x8xf32>
      %280 = arith.mulf %279, %arg27 : vector<8x8xf32>
      %281 = arith.truncf %274 : vector<8x8xf32> to vector<8x8xbf16>
      %cst_113 = arith.constant dense<0.000000e+00> : vector<8x8xf32>
      %282 = tpu.matmul %281, %265, %cst_113 {dimension_numbers = #tpu.dot_dimension_numbers<[1], [0], [0], [1], [0, 0, 1, 1], [], []>} : vector<8x8xbf16>, vector<8x8xbf16>, vector<8x8xf32> -> vector<8x8xf32>
      %283 = arith.addf %280, %282 : vector<8x8xf32>
      scf.yield %269, %278, %283 : vector<8x1xf32>, vector<8x1xf32>, vector<8x8xf32>
    }
    %c8_i32_15 = arith.constant 8 : i32
    %32 = arith.muli %arg1, %c8_i32_15 : i32
    %33 = tpu.assume_multiple %32, 8 : i32
    %c0_16 = arith.constant 0 : index
    %34 = arith.index_cast %33 : i32 to index
    %c0_17 = arith.constant 0 : index
    %35 = vector.load %arg20[%c0_16, %34, %c0_17] : memref<4x8x8xbf16, #tpu.memory_space<vmem>>, vector<1x8x8xbf16>
    %36 = vector.shape_cast %35 : vector<1x8x8xbf16> to vector<8x8xbf16>
    %c0_18 = arith.constant 0 : index
    %37 = arith.index_cast %33 : i32 to index
    %c0_19 = arith.constant 0 : index
    %38 = vector.load %arg21[%c0_18, %37, %c0_19] : memref<4x8x8xbf16, #tpu.memory_space<vmem>>, vector<1x8x8xbf16>
    %39 = vector.shape_cast %38 : vector<1x8x8xbf16> to vector<8x8xbf16>
    %cst_20 = arith.constant dense<0.000000e+00> : vector<8x8xf32>
    %40 = tpu.matmul %25, %36, %cst_20 {dimension_numbers = #tpu.dot_dimension_numbers<[1], [1], [0], [0], [0, 0, 1, 0], [], []>} : vector<8x8xbf16>, vector<8x8xbf16>, vector<8x8xf32> -> vector<8x8xf32>
    %cst_21 = arith.constant -1.000000e+30 : f32
    %41 = vector.broadcast %cst_21 : f32 to vector<8x8xf32>
    %42 = arith.select %23, %40, %41 : vector<8x8xi1>, vector<8x8xf32>
    %cst_22 = arith.constant dense<0xFF800000> : vector<8xf32>
    %43 = vector.multi_reduction <maximumf>, %42, %cst_22 [1] : vector<8x8xf32> to vector<8xf32>
    %44 = vector.shape_cast %43 : vector<8xf32> to vector<8x1xf32>
    %45 = arith.maximumf %31#0, %44 : vector<8x1xf32>
    %46 = arith.subf %31#0, %45 : vector<8x1xf32>
    %47 = math.exp %46 : vector<8x1xf32>
    %48 = vector.broadcast %45 : vector<8x1xf32> to vector<8x8xf32>
    %49 = arith.subf %42, %48 : vector<8x8xf32>
    %50 = math.exp %49 : vector<8x8xf32>
    %51 = arith.mulf %47, %31#1 : vector<8x1xf32>
    %cst_23 = arith.constant dense<0.000000e+00> : vector<8xf32>
    %52 = vector.multi_reduction <add>, %50, %cst_23 [1] : vector<8x8xf32> to vector<8xf32>
    %53 = vector.shape_cast %52 : vector<8xf32> to vector<8x1xf32>
    %54 = arith.addf %51, %53 : vector<8x1xf32>
    %55 = vector.broadcast %47 : vector<8x1xf32> to vector<8x8xf32>
    %56 = arith.mulf %55, %31#2 : vector<8x8xf32>
    %57 = arith.truncf %50 : vector<8x8xf32> to vector<8x8xbf16>
    %cst_24 = arith.constant dense<0.000000e+00> : vector<8x8xf32>
    %58 = tpu.matmul %57, %39, %cst_24 {dimension_numbers = #tpu.dot_dimension_numbers<[1], [0], [0], [1], [0, 0, 1, 1], [], []>} : vector<8x8xbf16>, vector<8x8xbf16>, vector<8x8xf32> -> vector<8x8xf32>
    %59 = arith.addf %56, %58 : vector<8x8xf32>
    %60 = tpu.reciprocal %54 {approx = true} : vector<8x1xf32> -> vector<8x1xf32>
    %61 = vector.broadcast %60 : vector<8x1xf32> to vector<8x8xf32>
    %62 = arith.mulf %59, %61 : vector<8x8xf32>
    %63 = arith.truncf %62 : vector<8x8xf32> to vector<8x8xbf16>
    %c0_25 = arith.constant 0 : index
    %c0_26 = arith.constant 0 : index
    %64 = vector.load %arg23[%c0_25, %c0_26] : memref<8x32xbf16, #tpu.memory_space<vmem>>, vector<8x8xbf16>
    tpu.vector_store %arg23[%c0_25, %c0_26], %63 {strides = array<i32>} : memref<8x32xbf16, #tpu.memory_space<vmem>>, vector<8x8xbf16>,
    %65 = vector.extract_strided_slice %20 {offsets = [0, 8], sizes = [8, 8], strides = [1, 1]} : vector<8x32xf32> to vector<8x8xf32>
    %66 = arith.truncf %65 : vector<8x8xf32> to vector<8x8xbf16>
    %cst_27 = arith.constant -1.000000e+30 : f32
    %67 = vector.broadcast %cst_27 : f32 to vector<8x1xf32>
    %cst_28 = arith.constant 0.000000e+00 : f32
    %68 = vector.broadcast %cst_28 : f32 to vector<8x1xf32>
    %cst_29 = arith.constant 0.000000e+00 : f32
    %69 = vector.broadcast %cst_29 : f32 to vector<8x8xf32>
    %c0_i32_30 = arith.constant 0 : i32
    %70 = arith.subi %arg1, %c0_i32_30 : i32
    %71 = arith.addi %c0_i32_30, %70 : i32
    %c1_i32_31 = arith.constant 1 : i32
    %72:3 = scf.for %arg24 = %c0_i32_30 to %71 step %c1_i32_31 iter_args(%arg25 = %67, %arg26 = %68, %arg27 = %69) -> (vector<8x1xf32>, vector<8x1xf32>, vector<8x8xf32>)  : i32 {
      %c8_i32_105 = arith.constant 8 : i32
      %258 = arith.muli %arg24, %c8_i32_105 : i32
      %259 = tpu.assume_multiple %258, 8 : i32
      %c1_106 = arith.constant 1 : index
      %260 = arith.index_cast %259 : i32 to index
      %c0_107 = arith.constant 0 : index
      %261 = vector.load %arg20[%c1_106, %260, %c0_107] : memref<4x8x8xbf16, #tpu.memory_space<vmem>>, vector<1x8x8xbf16>
      %262 = vector.shape_cast %261 : vector<1x8x8xbf16> to vector<8x8xbf16>
      %c1_108 = arith.constant 1 : index
      %263 = arith.index_cast %259 : i32 to index
      %c0_109 = arith.constant 0 : index
      %264 = vector.load %arg21[%c1_108, %263, %c0_109] : memref<4x8x8xbf16, #tpu.memory_space<vmem>>, vector<1x8x8xbf16>
      %265 = vector.shape_cast %264 : vector<1x8x8xbf16> to vector<8x8xbf16>
      %cst_110 = arith.constant dense<0.000000e+00> : vector<8x8xf32>
      %266 = tpu.matmul %66, %262, %cst_110 {dimension_numbers = #tpu.dot_dimension_numbers<[1], [1], [0], [0], [0, 0, 1, 0], [], []>} : vector<8x8xbf16>, vector<8x8xbf16>, vector<8x8xf32> -> vector<8x8xf32>
      %cst_111 = arith.constant dense<0xFF800000> : vector<8xf32>
      %267 = vector.multi_reduction <maximumf>, %266, %cst_111 [1] : vector<8x8xf32> to vector<8xf32>
      %268 = vector.shape_cast %267 : vector<8xf32> to vector<8x1xf32>
      %269 = arith.maximumf %arg25, %268 : vector<8x1xf32>
      %270 = arith.subf %arg25, %269 : vector<8x1xf32>
      %271 = math.exp %270 : vector<8x1xf32>
      %272 = vector.broadcast %269 : vector<8x1xf32> to vector<8x8xf32>
      %273 = arith.subf %266, %272 : vector<8x8xf32>
      %274 = math.exp %273 : vector<8x8xf32>
      %275 = arith.mulf %271, %arg26 : vector<8x1xf32>
      %cst_112 = arith.constant dense<0.000000e+00> : vector<8xf32>
      %276 = vector.multi_reduction <add>, %274, %cst_112 [1] : vector<8x8xf32> to vector<8xf32>
      %277 = vector.shape_cast %276 : vector<8xf32> to vector<8x1xf32>
      %278 = arith.addf %275, %277 : vector<8x1xf32>
      %279 = vector.broadcast %271 : vector<8x1xf32> to vector<8x8xf32>
      %280 = arith.mulf %279, %arg27 : vector<8x8xf32>
      %281 = arith.truncf %274 : vector<8x8xf32> to vector<8x8xbf16>
      %cst_113 = arith.constant dense<0.000000e+00> : vector<8x8xf32>
      %282 = tpu.matmul %281, %265, %cst_113 {dimension_numbers = #tpu.dot_dimension_numbers<[1], [0], [0], [1], [0, 0, 1, 1], [], []>} : vector<8x8xbf16>, vector<8x8xbf16>, vector<8x8xf32> -> vector<8x8xf32>
      %283 = arith.addf %280, %282 : vector<8x8xf32>
      scf.yield %269, %278, %283 : vector<8x1xf32>, vector<8x1xf32>, vector<8x8xf32>
    }
    %c8_i32_32 = arith.constant 8 : i32
    %73 = arith.muli %arg1, %c8_i32_32 : i32
    %74 = tpu.assume_multiple %73, 8 : i32
    %c1 = arith.constant 1 : index
    %75 = arith.index_cast %74 : i32 to index
    %c0_33 = arith.constant 0 : index
    %76 = vector.load %arg20[%c1, %75, %c0_33] : memref<4x8x8xbf16, #tpu.memory_space<vmem>>, vector<1x8x8xbf16>
    %77 = vector.shape_cast %76 : vector<1x8x8xbf16> to vector<8x8xbf16>
    %c1_34 = arith.constant 1 : index
    %78 = arith.index_cast %74 : i32 to index
    %c0_35 = arith.constant 0 : index
    %79 = vector.load %arg21[%c1_34, %78, %c0_35] : memref<4x8x8xbf16, #tpu.memory_space<vmem>>, vector<1x8x8xbf16>
    %80 = vector.shape_cast %79 : vector<1x8x8xbf16> to vector<8x8xbf16>
    %cst_36 = arith.constant dense<0.000000e+00> : vector<8x8xf32>
    %81 = tpu.matmul %66, %77, %cst_36 {dimension_numbers = #tpu.dot_dimension_numbers<[1], [1], [0], [0], [0, 0, 1, 0], [], []>} : vector<8x8xbf16>, vector<8x8xbf16>, vector<8x8xf32> -> vector<8x8xf32>
    %cst_37 = arith.constant -1.000000e+30 : f32
    %82 = vector.broadcast %cst_37 : f32 to vector<8x8xf32>
    %83 = arith.select %23, %81, %82 : vector<8x8xi1>, vector<8x8xf32>
    %cst_38 = arith.constant dense<0xFF800000> : vector<8xf32>
    %84 = vector.multi_reduction <maximumf>, %83, %cst_38 [1] : vector<8x8xf32> to vector<8xf32>
    %85 = vector.shape_cast %84 : vector<8xf32> to vector<8x1xf32>
    %86 = arith.maximumf %72#0, %85 : vector<8x1xf32>
    %87 = arith.subf %72#0, %86 : vector<8x1xf32>
    %88 = math.exp %87 : vector<8x1xf32>
    %89 = vector.broadcast %86 : vector<8x1xf32> to vector<8x8xf32>
    %90 = arith.subf %83, %89 : vector<8x8xf32>
    %91 = math.exp %90 : vector<8x8xf32>
    %92 = arith.mulf %88, %72#1 : vector<8x1xf32>
    %cst_39 = arith.constant dense<0.000000e+00> : vector<8xf32>
    %93 = vector.multi_reduction <add>, %91, %cst_39 [1] : vector<8x8xf32> to vector<8xf32>
    %94 = vector.shape_cast %93 : vector<8xf32> to vector<8x1xf32>
    %95 = arith.addf %92, %94 : vector<8x1xf32>
    %96 = vector.broadcast %88 : vector<8x1xf32> to vector<8x8xf32>
    %97 = arith.mulf %96, %72#2 : vector<8x8xf32>
    %98 = arith.truncf %91 : vector<8x8xf32> to vector<8x8xbf16>
    %cst_40 = arith.constant dense<0.000000e+00> : vector<8x8xf32>
    %99 = tpu.matmul %98, %80, %cst_40 {dimension_numbers = #tpu.dot_dimension_numbers<[1], [0], [0], [1], [0, 0, 1, 1], [], []>} : vector<8x8xbf16>, vector<8x8xbf16>, vector<8x8xf32> -> vector<8x8xf32>
    %100 = arith.addf %97, %99 : vector<8x8xf32>
    %101 = tpu.reciprocal %95 {approx = true} : vector<8x1xf32> -> vector<8x1xf32>
    %102 = vector.broadcast %101 : vector<8x1xf32> to vector<8x8xf32>
    %103 = arith.mulf %100, %102 : vector<8x8xf32>
    %104 = arith.truncf %103 : vector<8x8xf32> to vector<8x8xbf16>
    %c0_41 = arith.constant 0 : index
    %c8 = arith.constant 8 : index
    %105 = vector.load %arg23[%c0_41, %c8] : memref<8x32xbf16, #tpu.memory_space<vmem>>, vector<8x8xbf16>
    tpu.vector_store %arg23[%c0_41, %c8], %104 {strides = array<i32>} : memref<8x32xbf16, #tpu.memory_space<vmem>>, vector<8x8xbf16>,
    %106 = vector.extract_strided_slice %20 {offsets = [0, 16], sizes = [8, 8], strides = [1, 1]} : vector<8x32xf32> to vector<8x8xf32>
    %107 = arith.truncf %106 : vector<8x8xf32> to vector<8x8xbf16>
    %cst_42 = arith.constant -1.000000e+30 : f32
    %108 = vector.broadcast %cst_42 : f32 to vector<8x1xf32>
    %cst_43 = arith.constant 0.000000e+00 : f32
    %109 = vector.broadcast %cst_43 : f32 to vector<8x1xf32>
    %cst_44 = arith.constant 0.000000e+00 : f32
    %110 = vector.broadcast %cst_44 : f32 to vector<8x8xf32>
    %c0_i32_45 = arith.constant 0 : i32
    %111 = arith.subi %arg1, %c0_i32_45 : i32
    %112 = arith.addi %c0_i32_45, %111 : i32
    %c1_i32_46 = arith.constant 1 : i32
    %113:3 = scf.for %arg24 = %c0_i32_45 to %112 step %c1_i32_46 iter_args(%arg25 = %108, %arg26 = %109, %arg27 = %110) -> (vector<8x1xf32>, vector<8x1xf32>, vector<8x8xf32>)  : i32 {
      %c8_i32_105 = arith.constant 8 : i32
      %258 = arith.muli %arg24, %c8_i32_105 : i32
      %259 = tpu.assume_multiple %258, 8 : i32
      %c2_106 = arith.constant 2 : index
      %260 = arith.index_cast %259 : i32 to index
      %c0_107 = arith.constant 0 : index
      %261 = vector.load %arg20[%c2_106, %260, %c0_107] : memref<4x8x8xbf16, #tpu.memory_space<vmem>>, vector<1x8x8xbf16>
      %262 = vector.shape_cast %261 : vector<1x8x8xbf16> to vector<8x8xbf16>
      %c2_108 = arith.constant 2 : index
      %263 = arith.index_cast %259 : i32 to index
      %c0_109 = arith.constant 0 : index
      %264 = vector.load %arg21[%c2_108, %263, %c0_109] : memref<4x8x8xbf16, #tpu.memory_space<vmem>>, vector<1x8x8xbf16>
      %265 = vector.shape_cast %264 : vector<1x8x8xbf16> to vector<8x8xbf16>
      %cst_110 = arith.constant dense<0.000000e+00> : vector<8x8xf32>
      %266 = tpu.matmul %107, %262, %cst_110 {dimension_numbers = #tpu.dot_dimension_numbers<[1], [1], [0], [0], [0, 0, 1, 0], [], []>} : vector<8x8xbf16>, vector<8x8xbf16>, vector<8x8xf32> -> vector<8x8xf32>
      %cst_111 = arith.constant dense<0xFF800000> : vector<8xf32>
      %267 = vector.multi_reduction <maximumf>, %266, %cst_111 [1] : vector<8x8xf32> to vector<8xf32>
      %268 = vector.shape_cast %267 : vector<8xf32> to vector<8x1xf32>
      %269 = arith.maximumf %arg25, %268 : vector<8x1xf32>
      %270 = arith.subf %arg25, %269 : vector<8x1xf32>
      %271 = math.exp %270 : vector<8x1xf32>
      %272 = vector.broadcast %269 : vector<8x1xf32> to vector<8x8xf32>
      %273 = arith.subf %266, %272 : vector<8x8xf32>
      %274 = math.exp %273 : vector<8x8xf32>
      %275 = arith.mulf %271, %arg26 : vector<8x1xf32>
      %cst_112 = arith.constant dense<0.000000e+00> : vector<8xf32>
      %276 = vector.multi_reduction <add>, %274, %cst_112 [1] : vector<8x8xf32> to vector<8xf32>
      %277 = vector.shape_cast %276 : vector<8xf32> to vector<8x1xf32>
      %278 = arith.addf %275, %277 : vector<8x1xf32>
      %279 = vector.broadcast %271 : vector<8x1xf32> to vector<8x8xf32>
      %280 = arith.mulf %279, %arg27 : vector<8x8xf32>
      %281 = arith.truncf %274 : vector<8x8xf32> to vector<8x8xbf16>
      %cst_113 = arith.constant dense<0.000000e+00> : vector<8x8xf32>
      %282 = tpu.matmul %281, %265, %cst_113 {dimension_numbers = #tpu.dot_dimension_numbers<[1], [0], [0], [1], [0, 0, 1, 1], [], []>} : vector<8x8xbf16>, vector<8x8xbf16>, vector<8x8xf32> -> vector<8x8xf32>
      %283 = arith.addf %280, %282 : vector<8x8xf32>
      scf.yield %269, %278, %283 : vector<8x1xf32>, vector<8x1xf32>, vector<8x8xf32>
    }
    %c8_i32_47 = arith.constant 8 : i32
    %114 = arith.muli %arg1, %c8_i32_47 : i32
    %115 = tpu.assume_multiple %114, 8 : i32
    %c2 = arith.constant 2 : index
    %116 = arith.index_cast %115 : i32 to index
    %c0_48 = arith.constant 0 : index
    %117 = vector.load %arg20[%c2, %116, %c0_48] : memref<4x8x8xbf16, #tpu.memory_space<vmem>>, vector<1x8x8xbf16>
    %118 = vector.shape_cast %117 : vector<1x8x8xbf16> to vector<8x8xbf16>
    %c2_49 = arith.constant 2 : index
    %119 = arith.index_cast %115 : i32 to index
    %c0_50 = arith.constant 0 : index
    %120 = vector.load %arg21[%c2_49, %119, %c0_50] : memref<4x8x8xbf16, #tpu.memory_space<vmem>>, vector<1x8x8xbf16>
    %121 = vector.shape_cast %120 : vector<1x8x8xbf16> to vector<8x8xbf16>
    %cst_51 = arith.constant dense<0.000000e+00> : vector<8x8xf32>
    %122 = tpu.matmul %107, %118, %cst_51 {dimension_numbers = #tpu.dot_dimension_numbers<[1], [1], [0], [0], [0, 0, 1, 0], [], []>} : vector<8x8xbf16>, vector<8x8xbf16>, vector<8x8xf32> -> vector<8x8xf32>
    %cst_52 = arith.constant -1.000000e+30 : f32
    %123 = vector.broadcast %cst_52 : f32 to vector<8x8xf32>
    %124 = arith.select %23, %122, %123 : vector<8x8xi1>, vector<8x8xf32>
    %cst_53 = arith.constant dense<0xFF800000> : vector<8xf32>
    %125 = vector.multi_reduction <maximumf>, %124, %cst_53 [1] : vector<8x8xf32> to vector<8xf32>
    %126 = vector.shape_cast %125 : vector<8xf32> to vector<8x1xf32>
    %127 = arith.maximumf %113#0, %126 : vector<8x1xf32>
    %128 = arith.subf %113#0, %127 : vector<8x1xf32>
    %129 = math.exp %128 : vector<8x1xf32>
    %130 = vector.broadcast %127 : vector<8x1xf32> to vector<8x8xf32>
    %131 = arith.subf %124, %130 : vector<8x8xf32>
    %132 = math.exp %131 : vector<8x8xf32>
    %133 = arith.mulf %129, %113#1 : vector<8x1xf32>
    %cst_54 = arith.constant dense<0.000000e+00> : vector<8xf32>
    %134 = vector.multi_reduction <add>, %132, %cst_54 [1] : vector<8x8xf32> to vector<8xf32>
    %135 = vector.shape_cast %134 : vector<8xf32> to vector<8x1xf32>
    %136 = arith.addf %133, %135 : vector<8x1xf32>
    %137 = vector.broadcast %129 : vector<8x1xf32> to vector<8x8xf32>
    %138 = arith.mulf %137, %113#2 : vector<8x8xf32>
    %139 = arith.truncf %132 : vector<8x8xf32> to vector<8x8xbf16>
    %cst_55 = arith.constant dense<0.000000e+00> : vector<8x8xf32>
    %140 = tpu.matmul %139, %121, %cst_55 {dimension_numbers = #tpu.dot_dimension_numbers<[1], [0], [0], [1], [0, 0, 1, 1], [], []>} : vector<8x8xbf16>, vector<8x8xbf16>, vector<8x8xf32> -> vector<8x8xf32>
    %141 = arith.addf %138, %140 : vector<8x8xf32>
    %142 = tpu.reciprocal %136 {approx = true} : vector<8x1xf32> -> vector<8x1xf32>
    %143 = vector.broadcast %142 : vector<8x1xf32> to vector<8x8xf32>
    %144 = arith.mulf %141, %143 : vector<8x8xf32>
    %145 = arith.truncf %144 : vector<8x8xf32> to vector<8x8xbf16>
    %c0_56 = arith.constant 0 : index
    %c16 = arith.constant 16 : index
    %146 = vector.load %arg23[%c0_56, %c16] : memref<8x32xbf16, #tpu.memory_space<vmem>>, vector<8x8xbf16>
    tpu.vector_store %arg23[%c0_56, %c16], %145 {strides = array<i32>} : memref<8x32xbf16, #tpu.memory_space<vmem>>, vector<8x8xbf16>,
    %147 = vector.extract_strided_slice %20 {offsets = [0, 24], sizes = [8, 8], strides = [1, 1]} : vector<8x32xf32> to vector<8x8xf32>
    %148 = arith.truncf %147 : vector<8x8xf32> to vector<8x8xbf16>
    %cst_57 = arith.constant -1.000000e+30 : f32
    %149 = vector.broadcast %cst_57 : f32 to vector<8x1xf32>
    %cst_58 = arith.constant 0.000000e+00 : f32
    %150 = vector.broadcast %cst_58 : f32 to vector<8x1xf32>
    %cst_59 = arith.constant 0.000000e+00 : f32
    %151 = vector.broadcast %cst_59 : f32 to vector<8x8xf32>
    %c0_i32_60 = arith.constant 0 : i32
    %152 = arith.subi %arg1, %c0_i32_60 : i32
    %153 = arith.addi %c0_i32_60, %152 : i32
    %c1_i32_61 = arith.constant 1 : i32
    %154:3 = scf.for %arg24 = %c0_i32_60 to %153 step %c1_i32_61 iter_args(%arg25 = %149, %arg26 = %150, %arg27 = %151) -> (vector<8x1xf32>, vector<8x1xf32>, vector<8x8xf32>)  : i32 {
      %c8_i32_105 = arith.constant 8 : i32
      %258 = arith.muli %arg24, %c8_i32_105 : i32
      %259 = tpu.assume_multiple %258, 8 : i32
      %c3_106 = arith.constant 3 : index
      %260 = arith.index_cast %259 : i32 to index
      %c0_107 = arith.constant 0 : index
      %261 = vector.load %arg20[%c3_106, %260, %c0_107] : memref<4x8x8xbf16, #tpu.memory_space<vmem>>, vector<1x8x8xbf16>
      %262 = vector.shape_cast %261 : vector<1x8x8xbf16> to vector<8x8xbf16>
      %c3_108 = arith.constant 3 : index
      %263 = arith.index_cast %259 : i32 to index
      %c0_109 = arith.constant 0 : index
      %264 = vector.load %arg21[%c3_108, %263, %c0_109] : memref<4x8x8xbf16, #tpu.memory_space<vmem>>, vector<1x8x8xbf16>
      %265 = vector.shape_cast %264 : vector<1x8x8xbf16> to vector<8x8xbf16>
      %cst_110 = arith.constant dense<0.000000e+00> : vector<8x8xf32>
      %266 = tpu.matmul %148, %262, %cst_110 {dimension_numbers = #tpu.dot_dimension_numbers<[1], [1], [0], [0], [0, 0, 1, 0], [], []>} : vector<8x8xbf16>, vector<8x8xbf16>, vector<8x8xf32> -> vector<8x8xf32>
      %cst_111 = arith.constant dense<0xFF800000> : vector<8xf32>
      %267 = vector.multi_reduction <maximumf>, %266, %cst_111 [1] : vector<8x8xf32> to vector<8xf32>
      %268 = vector.shape_cast %267 : vector<8xf32> to vector<8x1xf32>
      %269 = arith.maximumf %arg25, %268 : vector<8x1xf32>
      %270 = arith.subf %arg25, %269 : vector<8x1xf32>
      %271 = math.exp %270 : vector<8x1xf32>
      %272 = vector.broadcast %269 : vector<8x1xf32> to vector<8x8xf32>
      %273 = arith.subf %266, %272 : vector<8x8xf32>
      %274 = math.exp %273 : vector<8x8xf32>
      %275 = arith.mulf %271, %arg26 : vector<8x1xf32>
      %cst_112 = arith.constant dense<0.000000e+00> : vector<8xf32>
      %276 = vector.multi_reduction <add>, %274, %cst_112 [1] : vector<8x8xf32> to vector<8xf32>
      %277 = vector.shape_cast %276 : vector<8xf32> to vector<8x1xf32>
      %278 = arith.addf %275, %277 : vector<8x1xf32>
      %279 = vector.broadcast %271 : vector<8x1xf32> to vector<8x8xf32>
      %280 = arith.mulf %279, %arg27 : vector<8x8xf32>
      %281 = arith.truncf %274 : vector<8x8xf32> to vector<8x8xbf16>
      %cst_113 = arith.constant dense<0.000000e+00> : vector<8x8xf32>
      %282 = tpu.matmul %281, %265, %cst_113 {dimension_numbers = #tpu.dot_dimension_numbers<[1], [0], [0], [1], [0, 0, 1, 1], [], []>} : vector<8x8xbf16>, vector<8x8xbf16>, vector<8x8xf32> -> vector<8x8xf32>
      %283 = arith.addf %280, %282 : vector<8x8xf32>
      scf.yield %269, %278, %283 : vector<8x1xf32>, vector<8x1xf32>, vector<8x8xf32>
    }
    %c8_i32_62 = arith.constant 8 : i32
    %155 = arith.muli %arg1, %c8_i32_62 : i32
    %156 = tpu.assume_multiple %155, 8 : i32
    %c3 = arith.constant 3 : index
    %157 = arith.index_cast %156 : i32 to index
    %c0_63 = arith.constant 0 : index
    %158 = vector.load %arg20[%c3, %157, %c0_63] : memref<4x8x8xbf16, #tpu.memory_space<vmem>>, vector<1x8x8xbf16>
    %159 = vector.shape_cast %158 : vector<1x8x8xbf16> to vector<8x8xbf16>
    %c3_64 = arith.constant 3 : index
    %160 = arith.index_cast %156 : i32 to index
    %c0_65 = arith.constant 0 : index
    %161 = vector.load %arg21[%c3_64, %160, %c0_65] : memref<4x8x8xbf16, #tpu.memory_space<vmem>>, vector<1x8x8xbf16>
    %162 = vector.shape_cast %161 : vector<1x8x8xbf16> to vector<8x8xbf16>
    %cst_66 = arith.constant dense<0.000000e+00> : vector<8x8xf32>
    %163 = tpu.matmul %148, %159, %cst_66 {dimension_numbers = #tpu.dot_dimension_numbers<[1], [1], [0], [0], [0, 0, 1, 0], [], []>} : vector<8x8xbf16>, vector<8x8xbf16>, vector<8x8xf32> -> vector<8x8xf32>
    %cst_67 = arith.constant -1.000000e+30 : f32
    %164 = vector.broadcast %cst_67 : f32 to vector<8x8xf32>
    %165 = arith.select %23, %163, %164 : vector<8x8xi1>, vector<8x8xf32>
    %cst_68 = arith.constant dense<0xFF800000> : vector<8xf32>
    %166 = vector.multi_reduction <maximumf>, %165, %cst_68 [1] : vector<8x8xf32> to vector<8xf32>
    %167 = vector.shape_cast %166 : vector<8xf32> to vector<8x1xf32>
    %168 = arith.maximumf %154#0, %167 : vector<8x1xf32>
    %169 = arith.subf %154#0, %168 : vector<8x1xf32>
    %170 = math.exp %169 : vector<8x1xf32>
    %171 = vector.broadcast %168 : vector<8x1xf32> to vector<8x8xf32>
    %172 = arith.subf %165, %171 : vector<8x8xf32>
    %173 = math.exp %172 : vector<8x8xf32>
    %174 = arith.mulf %170, %154#1 : vector<8x1xf32>
    %cst_69 = arith.constant dense<0.000000e+00> : vector<8xf32>
    %175 = vector.multi_reduction <add>, %173, %cst_69 [1] : vector<8x8xf32> to vector<8xf32>
    %176 = vector.shape_cast %175 : vector<8xf32> to vector<8x1xf32>
    %177 = arith.addf %174, %176 : vector<8x1xf32>
    %178 = vector.broadcast %170 : vector<8x1xf32> to vector<8x8xf32>
    %179 = arith.mulf %178, %154#2 : vector<8x8xf32>
    %180 = arith.truncf %173 : vector<8x8xf32> to vector<8x8xbf16>
    %cst_70 = arith.constant dense<0.000000e+00> : vector<8x8xf32>
    %181 = tpu.matmul %180, %162, %cst_70 {dimension_numbers = #tpu.dot_dimension_numbers<[1], [0], [0], [1], [0, 0, 1, 1], [], []>} : vector<8x8xbf16>, vector<8x8xbf16>, vector<8x8xf32> -> vector<8x8xf32>
    %182 = arith.addf %179, %181 : vector<8x8xf32>
    %183 = tpu.reciprocal %177 {approx = true} : vector<8x1xf32> -> vector<8x1xf32>
    %184 = vector.broadcast %183 : vector<8x1xf32> to vector<8x8xf32>
    %185 = arith.mulf %182, %184 : vector<8x8xf32>
    %186 = arith.truncf %185 : vector<8x8xf32> to vector<8x8xbf16>
    %c0_71 = arith.constant 0 : index
    %c24 = arith.constant 24 : index
    %187 = vector.load %arg23[%c0_71, %c24] : memref<8x32xbf16, #tpu.memory_space<vmem>>, vector<8x8xbf16>
    tpu.vector_store %arg23[%c0_71, %c24], %186 {strides = array<i32>} : memref<8x32xbf16, #tpu.memory_space<vmem>>, vector<8x8xbf16>,
    %c0_72 = arith.constant 0 : index
    %c0_73 = arith.constant 0 : index
    %188 = vector.load %arg23[%c0_72, %c0_73] : memref<8x32xbf16, #tpu.memory_space<vmem>>, vector<8x32xbf16>
    %c0_74 = arith.constant 0 : index
    %c0_75 = arith.constant 0 : index
    %189 = vector.load %arg11[%c0_74, %c0_75] : memref<32x32xbf16, #tpu.memory_space<vmem>>, vector<32x32xbf16>
    %cst_76 = arith.constant dense<0.000000e+00> : vector<8x32xf32>
    %190 = tpu.matmul %188, %189, %cst_76 {dimension_numbers = #tpu.dot_dimension_numbers<[1], [0], [0], [1], [0, 0, 1, 1], [], []>} : vector<8x32xbf16>, vector<32x32xbf16>, vector<8x32xf32> -> vector<8x32xf32>
    %191 = arith.addf %11, %190 : vector<8x32xf32>
    %c0_77 = arith.constant 0 : index
    %c0_78 = arith.constant 0 : index
    %192 = vector.load %arg12[%c0_77, %c0_78] : memref<1x32xf32, #tpu.memory_space<vmem>>, vector<1x32xf32>
    %193 = vector.shape_cast %192 : vector<1x32xf32> to vector<32xf32>
    %194 = vector.shape_cast %193 : vector<32xf32> to vector<1x32xf32>
    %195 = vector.broadcast %194 : vector<1x32xf32> to vector<8x32xf32>
    %196 = arith.addf %191, %195 : vector<8x32xf32>
    %c0_79 = arith.constant 0 : index
    %c0_80 = arith.constant 0 : index
    %197 = vector.load %arg13[%c0_79, %c0_80] : memref<1x32xf32, #tpu.memory_space<vmem>>, vector<1x32xf32>
    %198 = vector.shape_cast %197 : vector<1x32xf32> to vector<32xf32>
    %c0_81 = arith.constant 0 : index
    %c0_82 = arith.constant 0 : index
    %199 = vector.load %arg14[%c0_81, %c0_82] : memref<1x32xf32, #tpu.memory_space<vmem>>, vector<1x32xf32>
    %200 = vector.shape_cast %199 : vector<1x32xf32> to vector<32xf32>
    %cst_83 = arith.constant dense<0.000000e+00> : vector<8xf32>
    %201 = vector.multi_reduction <add>, %196, %cst_83 [1] : vector<8x32xf32> to vector<8xf32>
    %202 = vector.shape_cast %201 : vector<8xf32> to vector<8x1xf32>
    %cst_84 = arith.constant 3.200000e+01 : f32
    %203 = vector.broadcast %cst_84 : f32 to vector<8x1xf32>
    %204 = arith.divf %202, %203 : vector<8x1xf32>
    %205 = vector.broadcast %204 : vector<8x1xf32> to vector<8x32xf32>
    %206 = arith.subf %196, %205 : vector<8x32xf32>
    %207 = arith.mulf %206, %206 : vector<8x32xf32>
    %cst_85 = arith.constant dense<0.000000e+00> : vector<8xf32>
    %208 = vector.multi_reduction <add>, %207, %cst_85 [1] : vector<8x32xf32> to vector<8xf32>
    %209 = vector.shape_cast %208 : vector<8xf32> to vector<8x1xf32>
    %cst_86 = arith.constant 3.200000e+01 : f32
    %210 = vector.broadcast %cst_86 : f32 to vector<8x1xf32>
    %211 = arith.divf %209, %210 : vector<8x1xf32>
    %212 = vector.broadcast %204 : vector<8x1xf32> to vector<8x32xf32>
    %213 = arith.subf %196, %212 : vector<8x32xf32>
    %cst_87 = arith.constant 9.99999974E-6 : f32
    %214 = vector.broadcast %cst_87 : f32 to vector<8x1xf32>
    %215 = arith.addf %211, %214 : vector<8x1xf32>
    %216 = math.rsqrt %215 : vector<8x1xf32>
    %217 = vector.broadcast %216 : vector<8x1xf32> to vector<8x32xf32>
    %218 = arith.mulf %213, %217 : vector<8x32xf32>
    %219 = vector.shape_cast %198 : vector<32xf32> to vector<1x32xf32>
    %220 = vector.broadcast %219 : vector<1x32xf32> to vector<8x32xf32>
    %221 = arith.mulf %218, %220 : vector<8x32xf32>
    %222 = vector.shape_cast %200 : vector<32xf32> to vector<1x32xf32>
    %223 = vector.broadcast %222 : vector<1x32xf32> to vector<8x32xf32>
    %224 = arith.addf %221, %223 : vector<8x32xf32>
    %225 = arith.truncf %224 : vector<8x32xf32> to vector<8x32xbf16>
    %c0_88 = arith.constant 0 : index
    %c0_89 = arith.constant 0 : index
    %226 = vector.load %arg18[%c0_88, %c0_89] : memref<1x32xf32, #tpu.memory_space<vmem>>, vector<1x32xf32>
    %227 = vector.shape_cast %226 : vector<1x32xf32> to vector<32xf32>
    %228 = vector.shape_cast %227 : vector<32xf32> to vector<1x32xf32>
    %229 = vector.broadcast %228 : vector<1x32xf32> to vector<8x32xf32>
    %230 = arith.addf %196, %229 : vector<8x32xf32>
    %c0_90 = arith.constant 0 : index
    %c0_91 = arith.constant 0 : index
    %231 = vector.load %arg15[%c0_90, %c0_91] : memref<32x128xbf16, #tpu.memory_space<vmem>>, vector<32x128xbf16>
    %cst_92 = arith.constant dense<0.000000e+00> : vector<8x128xf32>
    %232 = tpu.matmul %225, %231, %cst_92 {dimension_numbers = #tpu.dot_dimension_numbers<[1], [0], [0], [1], [0, 0, 1, 1], [], []>} : vector<8x32xbf16>, vector<32x128xbf16>, vector<8x128xf32> -> vector<8x128xf32>
    %c0_93 = arith.constant 0 : index
    %c0_94 = arith.constant 0 : index
    %233 = vector.load %arg16[%c0_93, %c0_94] : memref<1x128xf32, #tpu.memory_space<vmem>>, vector<1x128xf32>
    %234 = vector.shape_cast %233 : vector<1x128xf32> to vector<128xf32>
    %235 = vector.shape_cast %234 : vector<128xf32> to vector<1x128xf32>
    %236 = vector.broadcast %235 : vector<1x128xf32> to vector<8x128xf32>
    %237 = arith.addf %232, %236 : vector<8x128xf32>
    %cst_95 = arith.constant 5.000000e-01 : f32
    %238 = vector.broadcast %cst_95 : f32 to vector<8x128xf32>
    %239 = arith.mulf %238, %237 : vector<8x128xf32>
    %cst_96 = arith.constant 4.471500e-02 : f32
    %240 = vector.broadcast %cst_96 : f32 to vector<8x128xf32>
    %241 = arith.mulf %240, %237 : vector<8x128xf32>
    %242 = arith.mulf %241, %237 : vector<8x128xf32>
    %243 = arith.mulf %242, %237 : vector<8x128xf32>
    %244 = arith.addf %237, %243 : vector<8x128xf32>
    %cst_97 = arith.constant 0.797884583 : f32
    %245 = vector.broadcast %cst_97 : f32 to vector<8x128xf32>
    %246 = arith.mulf %245, %244 : vector<8x128xf32>
    %247 = math.tanh %246 : vector<8x128xf32>
    %cst_98 = arith.constant 1.000000e+00 : f32
    %248 = vector.broadcast %cst_98 : f32 to vector<8x128xf32>
    %249 = arith.addf %248, %247 : vector<8x128xf32>
    %250 = arith.mulf %239, %249 : vector<8x128xf32>
    %251 = arith.truncf %250 : vector<8x128xf32> to vector<8x128xbf16>
    %c0_99 = arith.constant 0 : index
    %c0_100 = arith.constant 0 : index
    %252 = vector.load %arg17[%c0_99, %c0_100] : memref<128x32xbf16, #tpu.memory_space<vmem>>, vector<128x32xbf16>
    %cst_101 = arith.constant dense<0.000000e+00> : vector<8x32xf32>
    %253 = tpu.matmul %251, %252, %cst_101 {dimension_numbers = #tpu.dot_dimension_numbers<[1], [0], [0], [1], [0, 0, 1, 1], [], []>} : vector<8x128xbf16>, vector<128x32xbf16>, vector<8x32xf32> -> vector<8x32xf32>
    %254 = arith.addf %230, %253 : vector<8x32xf32>
    %c0_102 = arith.constant 0 : index
    %c0_103 = arith.constant 0 : index
    %c0_104 = arith.constant 0 : index
    %255 = vector.load %arg19[%c0_102, %c0_103, %c0_104] : memref<1x8x32xf32, #tpu.memory_space<vmem>>, vector<1x8x32xf32>
    %256 = vector.shape_cast %255 : vector<1x8x32xf32> to vector<8x32xf32>
    %257 = vector.shape_cast %254 : vector<8x32xf32> to vector<1x8x32xf32>
    tpu.vector_store %arg19[%c0_102, %c0_103, %c0_104], %257 {strides = array<i32>} : memref<1x8x32xf32, #tpu.memory_space<vmem>>, vector<1x8x32xf32>,
    return
  }
  func.func @transform_0(%arg0: i32, %arg1: i32) -> (i32, i32, i32) {
    %c0_i32 = arith.constant 0 : i32
    %c0_i32_0 = arith.constant 0 : i32
    %c0_i32_1 = arith.constant 0 : i32
    return %arg0, %c0_i32, %c0_i32_0 : i32, i32, i32
  }
  func.func @transform_1(%arg0: i32, %arg1: i32) -> (i32, i32) {
    %c0_i32 = arith.constant 0 : i32
    %c0_i32_0 = arith.constant 0 : i32
    %c0_i32_1 = arith.constant 0 : i32
    return %c0_i32, %c0_i32_0 : i32, i32
  }
  func.func @transform_2(%arg0: i32, %arg1: i32) -> (i32, i32) {
    %c0_i32 = arith.constant 0 : i32
    %c0_i32_0 = arith.constant 0 : i32
    %c0_i32_1 = arith.constant 0 : i32
    return %c0_i32, %c0_i32_0 : i32, i32
  }
  func.func @transform_3(%arg0: i32, %arg1: i32) -> (i32, i32) {
    %c0_i32 = arith.constant 0 : i32
    %c0_i32_0 = arith.constant 0 : i32
    %c0_i32_1 = arith.constant 0 : i32
    return %c0_i32, %c0_i32_0 : i32, i32
  }
  func.func @transform_4(%arg0: i32, %arg1: i32) -> (i32, i32) {
    %c0_i32 = arith.constant 0 : i32
    %c0_i32_0 = arith.constant 0 : i32
    %c0_i32_1 = arith.constant 0 : i32
    return %c0_i32, %c0_i32_0 : i32, i32
  }
  func.func @transform_5(%arg0: i32, %arg1: i32) -> (i32, i32) {
    %c0_i32 = arith.constant 0 : i32
    %c0_i32_0 = arith.constant 0 : i32
    %c0_i32_1 = arith.constant 0 : i32
    return %c0_i32, %c0_i32_0 : i32, i32
  }
  func.func @transform_6(%arg0: i32, %arg1: i32) -> (i32, i32) {
    %c0_i32 = arith.constant 0 : i32
    %c0_i32_0 = arith.constant 0 : i32
    %c0_i32_1 = arith.constant 0 : i32
    return %c0_i32, %c0_i32_0 : i32, i32
  }
  func.func @transform_7(%arg0: i32, %arg1: i32) -> (i32, i32) {
    %c0_i32 = arith.constant 0 : i32
    %c0_i32_0 = arith.constant 0 : i32
    %c0_i32_1 = arith.constant 0 : i32
    return %c0_i32, %c0_i32_0 : i32, i32
  }
  func.func @transform_8(%arg0: i32, %arg1: i32) -> (i32, i32) {
    %c0_i32 = arith.constant 0 : i32
    %c0_i32_0 = arith.constant 0 : i32
    %c0_i32_1 = arith.constant 0 : i32
    return %c0_i32, %c0_i32_0 : i32, i32
  }
  func.func @transform_9(%arg0: i32, %arg1: i32) -> (i32, i32) {
    %c0_i32 = arith.constant 0 : i32
    %c0_i32_0 = arith.constant 0 : i32
    %c0_i32_1 = arith.constant 0 : i32
    return %c0_i32, %c0_i32_0 : i32, i32
  }
  func.func @transform_10(%arg0: i32, %arg1: i32) -> (i32, i32) {
    %c0_i32 = arith.constant 0 : i32
    %c0_i32_0 = arith.constant 0 : i32
    %c0_i32_1 = arith.constant 0 : i32
    return %c0_i32, %c0_i32_0 : i32, i32
  }
  func.func @transform_11(%arg0: i32, %arg1: i32) -> (i32, i32) {
    %c0_i32 = arith.constant 0 : i32
    %c0_i32_0 = arith.constant 0 : i32
    %c0_i32_1 = arith.constant 0 : i32
    return %c0_i32, %c0_i32_0 : i32, i32
  }
  func.func @transform_12(%arg0: i32, %arg1: i32) -> (i32, i32) {
    %c0_i32 = arith.constant 0 : i32
    %c0_i32_0 = arith.constant 0 : i32
    %c0_i32_1 = arith.constant 0 : i32
    return %c0_i32, %c0_i32_0 : i32, i32
  }
  func.func @transform_13(%arg0: i32, %arg1: i32) -> (i32, i32) {
    %c0_i32 = arith.constant 0 : i32
    %c0_i32_0 = arith.constant 0 : i32
    %c0_i32_1 = arith.constant 0 : i32
    return %c0_i32, %c0_i32_0 : i32, i32
  }
  func.func @transform_14(%arg0: i32, %arg1: i32) -> (i32, i32) {
    %c0_i32 = arith.constant 0 : i32
    %c0_i32_0 = arith.constant 0 : i32
    %c0_i32_1 = arith.constant 0 : i32
    return %c0_i32, %c0_i32_0 : i32, i32
  }
  func.func @transform_15(%arg0: i32, %arg1: i32) -> (i32, i32) {
    %c0_i32 = arith.constant 0 : i32
    %c0_i32_0 = arith.constant 0 : i32
    %c0_i32_1 = arith.constant 0 : i32
    return %c0_i32, %c0_i32_0 : i32, i32
  }
  func.func @transform_16(%arg0: i32, %arg1: i32) -> (i32, i32) {
    %c0_i32 = arith.constant 0 : i32
    %c0_i32_0 = arith.constant 0 : i32
    %c0_i32_1 = arith.constant 0 : i32
    return %c0_i32, %c0_i32_0 : i32, i32
  }
  func.func @transform_17(%arg0: i32, %arg1: i32) -> (i32, i32, i32) {
    %c0_i32 = arith.constant 0 : i32
    %c0_i32_0 = arith.constant 0 : i32
    return %arg0, %arg1, %c0_i32 : i32, i32, i32
  }
}

</mosaic_0001>

<bundles_post_ra>
// kernel: tpu_custom_call.1
= control target key start
LH: loop header
LB: loop body
LE: loop exit
PB: predicated region body
PF: predicated region fallthrough
CT: control target
= control target key end

     0   :  { %s3540_s0 = inlined_call_operand.vmem [shape: f32[2,8,32], index: 0, kind: input, shape index: {}]   ;;  %s3541_s1 = inlined_call_operand.vmem [shape: f32[1,32], index: 1, kind: input, shape index: {}]   ;;  %s3542_s2 = inlined_call_operand.vmem [shape: f32[1,32], index: 2, kind: input, shape index: {}]   ;;  %s3543_s3 = inlined_call_operand.vmem [shape: bf16[32,32], index: 3, kind: input, shape index: {}]   ;;  %s3544_s4 = inlined_call_operand.vmem [shape: bf16[32,32], index: 4, kind: input, shape index: {}]   ;;  %s3545_s5 = inlined_call_operand.vmem [shape: bf16[32,32], index: 5, kind: input, shape index: {}]   ;;  %s3546_s6 = inlined_call_operand.hbm [shape: f32[1,32], index: 6, kind: input, shape index: {}]   ;;  %s3547_s7 = inlined_call_operand.hbm [shape: f32[1,32], index: 7, kind: input, shape index: {}]   ;;  %s3548_s8 = inlined_call_operand.hbm [shape: f32[1,32], index: 8, kind: input, shape index: {}]   ;;  %s3549_s9 = inlined_call_operand.vmem [shape: bf16[32,32], index: 9, kind: input, shape index: {}]   ;;  %s3550_s10 = inlined_call_operand.vmem [shape: f32[1,32], index: 10, kind: input, shape index: {}]   ;;  %s3551_s11 = inlined_call_operand.vmem [shape: f32[1,32], index: 11, kind: input, shape index: {}]   ;;  %s3552_s12 = inlined_call_operand.vmem [shape: f32[1,32], index: 12, kind: input, shape index: {}]   ;;  %s3553_s13 = inlined_call_operand.vmem [shape: bf16[32,128], index: 13, kind: input, shape index: {}]   ;;  %s3554_s14 = inlined_call_operand.vmem [shape: f32[1,128], index: 14, kind: input, shape index: {}]   ;;  %s3555_s15 = inlined_call_operand.vmem [shape: bf16[128,32], index: 15, kind: input, shape index: {}]   ;;  %s3556_s16 = inlined_call_operand.vmem [shape: f32[1,32], index: 16, kind: input, shape index: {}]   ;;  %s3557_s17 = inlined_call_operand.hbm [shape: f32[2,8,32], index: 17, kind: output, shape index: {}]  }
   0x1   :  { %3572 = sst [smem:[#allocation24_spill]] %s3540_s0 }
   0x2   :  { %3573 = sst [smem:[#allocation25_spill]] %s3541_s1 }
   0x3   :  { %3574 = sst [smem:[#allocation26_spill]] %s3547_s7 }
   0x4   :  { %3575 = sst [smem:[#allocation27_spill]] %s3556_s16 }
   0x5   :  { %3576 = sst [smem:[#allocation28_spill]] %s3557_s17 }
   0x6   :  { %22 = vsyncpa [#allocation7], 0 }
   0x7   :  { %23 = vsyncpa [#allocation10], 0 }
   0x8   :  { %24 = vsyncpa [#allocation8], 0 }
   0x9   :  { %26 = vsyncpa [#allocation8 + $0x1], 0  ;;  %s3116_s24 = smov 0   ;;  %s3118_s25 = smov 0  }
   0xa   :  { %s3120_s26 = smov 0   ;;  %s3122_s27 = smov 0  }
   0xb   :  { %s3124_s28 = smov 0   ;;  %s3126_s29 = smov 0  }
   0xc LB: > { %3577 = sst [smem:[#allocation16_spill]] %s2992_s24  ;;  %s2452_s0 = sadd.s32 4294967295, %s3012_s29   ;;  %s3012_s29 = sphi %s3126_s29, %s32_s29   ;;  %s3008_s28 = sphi %s3124_s28, %s3607_s28   ;;  %s3004_s27 = sphi %s3122_s27, %s3606_s27   ;;  %s3000_s26 = sphi %s3120_s26, %s3605_s26   ;;  %s2996_s25 = sphi %s3118_s25, %s3609_s25   ;;  %s2992_s24 = sphi %s3116_s24, %s3608_s24  }
   0xd   : > { %3578 = sst [smem:[#allocation17_spill]] %s3000_s26  ;;  %s2453_s30 = sadd.s32 4294967294, %s3012_s29  }
   0xe   : > { %3579 = sst [smem:[#allocation18_spill]] %s3008_s28  ;;  %s44_s18 = sadd.s32 1, %s3008_s28 }
   0xf   : > { %3580 = sst [smem:[#allocation19_spill]] %s3012_s29  ;;  %s415_s19 = sadd.s32 1, %s3000_s26 }
  0x10   : > { %p46_p0 = scmp.ge.s32.totalorder %s44_s18, 2  ;;  %p425_p1 = scmp.ne.s32.totalorder %s3000_s26, %s2996_s25 }
  0x11   : > { %p426_p2 = scmp.eq.s32.totalorder %s2452_s0, 1  ;;  %p431_p3 = scmp.ne.s32.totalorder %s2996_s25, %s2992_s24 }
  0x12   : > { %s3611_s18 = smov (%p46_p0, %s44_s18), 0  ;;  %p432_p5 = scmp.eq.s32.totalorder %s2453_s30, 1 }
  0x13   : > { %3581 = sst [smem:[#allocation20_spill]] %s3611_s18  ;;  %p3156_p4 = por %p426_p2, %p425_p1 }
  0x14   : > { %s410_s20 = ssub.s32 %s3008_s28, %s3611_s18  ;;  %p2454_p6 = scmp.ge.s32.totalorder %s3012_s29, 1 }
  0x15   : > { %s3582_s1 = scalar_select %p3156_p4, 1, 0 }
  0x16   : > { %p413_p7 = scmp.eq.s32.totalorder %s410_s20, 0  ;;  %p3163_p8 = por %p432_p5, %p431_p3 }
  0x17   : > { %3583 = sst [smem:[#allocation21_spill]] %s3582_s1  ;;  %p439_p9 = scmp.lt.s32.totalorder %s3012_s29, 3 }
  0x18   : > { %s3584_s21 = scalar_select %p3163_p8, 1, 0 }
  0x19   : > { %s3169_s22 = scalar_select %p413_p7, %s3000_s26, %s415_s19  }
  0x1a   : > { %3585 = sst [smem:[#allocation22_spill]] %s3584_s21  ;;  %p3171_p10 = pnand %p2454_p6, %p439_p9 }
  0x1b   : > { %3586 = sst [smem:[#allocation23_spill]] %s3169_s22  ;;  %p3175_p11 = scmp.eq.s32.totalorder %s2452_s0, 0 }
  0x1c   : > { %s3587_s23 = scalar_select %p3171_p10, 1, 0 }
  0x1d   : > { %s3588_s24 = scalar_select %p3175_p11, 1, 0 }
  0x1e   : > { %p2714_p12 = pneg %p3171_p10  ;;  %s3014_s30 = smov [#allocation9]  }
  0x1f   : > { %s478_s20 = sshll.u32 %s3014_s30, 4  ;;  %s3015_s19 = smov [#allocation6]   ;;  %s479_s20 = int_to_ptr.vmem [resolvable:$true] %s478_s20 }
  0x20   : > { %p3183_p13 = pnand %p3175_p11, %p2714_p12  ;;  %s467_s28 = sshll.u32 %s3015_s19, 4  ;;  %s3187_s28 = int_to_ptr.vmem [resolvable:$true] %s467_s28 }
  0x21   : > { %s3590_s7 = sld [smem:[#allocation26_spill]] }
  0x22   : > { %p3197_p1 = pneg %p3183_p13 }
  0x27   : > { %s2842_s26 = scalar_lea.hbm %s3590_s7, 16 }
  0x28   : > { %p2843_p0 = scmp.ne.s32.totalorder %s3590_s7, %s2842_s26  ;;  %p2849_p5 = scmp.lt.u32.totalorder %s2842_s26, %s3590_s7 }
  0x2a   : > { %p2845_p2 = pnand %p3197_p1, %p2843_p0 }
  0x2c   : > { %p2846_p3 = pneg %p2845_p2 }
  0x2e   : > { %p2851_p6 = pnand %p2849_p5, %p2846_p3 }
  0x30   : > { %2854 = shalt.err (!%p2851_p6)
}
  0x31   : > { %s2855_s22 = scalar_lea.vmem %s479_s20, 16  ;;  %s2862_s29 = scalar_lea.vmem %s479_s20, 32 }
  0x32   : > { %p2856_p7 = scmp.ne.s32.totalorder %s479_s20, %s2855_s22  ;;  %p2863_p8 = scmp.lt.s32.totalorder %s479_s20, %s479_s20 }
  0x33   : > { %p2864_p4 = scmp.lt.s32.totalorder %s2862_s29, %s2855_s22 }
  0x34   : > { %p2858_p9 = pnand %p2856_p7, %p3197_p1 }
  0x35   : > { %p2865_p11 = por %p2864_p4, %p2863_p8 }
  0x36   : > { %p2859_p12 = pneg %p2858_p9 }
  0x38   : > { %p2866_p10 = pnand %p2865_p11, %p2859_p12 }
  0x3a   : > { %2869 = shalt.err (!%p2866_p10)
}
  0x3b   : > { %2720 = dma.hbm_to_vmem [thread:$0]  (!%p3183_p13), %s3590_s7, 16, %s479_s20, [#allocation10]  }
  0x3c   : > { %s2870_s19 = scalar_lea.hbm %s3546_s6, 16 }
  0x3d   : > { %p2871_p0 = scmp.ne.s32.totalorder %s3546_s6, %s2870_s19  ;;  %p2877_p8 = scmp.lt.u32.totalorder %s2870_s19, %s3546_s6 }
  0x3f   : > { %p2873_p2 = pnand %p2871_p0, %p3197_p1 }
  0x41   : > { %p2874_p4 = pneg %p2873_p2 }
  0x43   : > { %p2879_p10 = pnand %p2877_p8, %p2874_p4 }
  0x45   : > { %2882 = shalt.err (!%p2879_p10)
}
  0x46   : > { %s2883_s20 = scalar_lea.vmem %s3187_s28, 16  ;;  %s2890_s16 = scalar_lea.vmem %s3187_s28, 32 }
  0x47   : > { %p2884_p11 = scmp.ne.s32.totalorder %s3187_s28, %s2883_s20  ;;  %p2891_p6 = scmp.lt.s32.totalorder %s3187_s28, %s3187_s28 }
  0x48   : > { %p2892_p7 = scmp.lt.s32.totalorder %s2890_s16, %s2883_s20 }
  0x49   : > { %p2886_p3 = pnand %p2884_p11, %p3197_p1 }
  0x4a   : > { %p2893_p9 = por %p2892_p7, %p2891_p6 }
  0x4b   : > { %p2887_p5 = pneg %p2886_p3 }
  0x4d   : > { %p2894_p12 = pnand %p2893_p9, %p2887_p5 }
  0x4f   : > { %2897 = shalt.err (!%p2894_p12)
}
  0x50   : > { %2717 = dma.hbm_to_vmem [thread:$0]  (!%p3183_p13), %s3546_s6, 16, %s3187_s28, [#allocation7]  }
  0x51   : > { %s3016_s0 = smov [#allocation11]   ;;  %s2898_s22 = scalar_lea.hbm %s3548_s8, 16 }
  0x52   : > { %s489_s17 = sshll.u32 %s3016_s0, 4  ;;  %p2899_p0 = scmp.ne.s32.totalorder %s3548_s8, %s2898_s22  ;;  %s490_s17 = int_to_ptr.vmem [resolvable:$true] %s489_s17 }
  0x53   : > { %p2905_p8 = scmp.lt.u32.totalorder %s2898_s22, %s3548_s8 }
  0x54   : > { %p2901_p2 = pnand %p2899_p0, %p3197_p1 }
  0x56   : > { %p2902_p4 = pneg %p2901_p2 }
  0x58   : > { %p2907_p10 = pnand %p2905_p8, %p2902_p4 }
  0x5a   : > { %2910 = shalt.err (!%p2907_p10)
}
  0x5b   : > { %s2911_s28 = scalar_lea.vmem %s490_s17, 16  ;;  %s2918_s1 = scalar_lea.vmem %s490_s17, 32 }
  0x5c   : > { %p2912_p11 = scmp.ne.s32.totalorder %s490_s17, %s2911_s28  ;;  %p2919_p6 = scmp.lt.s32.totalorder %s490_s17, %s490_s17 }
  0x5d   : > { %p2920_p7 = scmp.lt.s32.totalorder %s2918_s1, %s2911_s28 }
  0x5e   : > { %p2914_p3 = pnand %p2912_p11, %p3197_p1 }
  0x5f   : > { %p2921_p9 = por %p2920_p7, %p2919_p6 }
  0x60   : > { %p2915_p5 = pneg %p2914_p3 }
  0x62   : > { %p2922_p12 = pnand %p2921_p9, %p2915_p5 }
  0x64   : > { %2925 = shalt.err (!%p2922_p12)
}
  0x65   : > { %2723 = dma.hbm_to_vmem [thread:$0]  (!%p3183_p13), %s3548_s8, 16, %s490_s17, [#allocation10]  }
  0x66   : > { %p3592_p0 = scmp.ne.s32.totalorder %s3587_s23, 0 }
  0x67   : > { %p3593_p2 = scmp.ne.s32.totalorder (!%p3592_p0), %s3588_s24, 0 }
  0x68   : > { %533 = sbr.rel (%p3592_p0) target bundleno = 2516 (0x9d4), region = 88 }
  0x6f   : > { %2979 = dma.done.wait (%p3593_p2), [#allocation7], 16  }
  0x70   : > { %2981 = vsyncadd (%p3593_p2), [#allocation7], 4294967280 }
  0x71   : > { %2983 = dma.done.wait (%p3593_p2), [#allocation10], 32  }
  0x72   : > { %2985 = vsyncadd (%p3593_p2), [#allocation10], 4294967264  ;;  %p592_p1 = scmp.lt.s32.totalorder %s3004_s27, 1  ;;  %s3594_s17 = sld [smem:[#allocation24_spill]]  ;;  %vm604_vm0 = vcmask 261120   ;;  %v2794_v7 = vld [vmem:[%s3544_s4] sm:$0xff]   ;;  %v890_v62 = vlaneseq }
  0x73   : > { %v3017_v8 = vmov 0.0   ;;  %vm3018_vm1 = vmmov 0   ;;  %v2795_v9 = vld [vmem:[%s3544_s4 + $0x8] sm:$0xff]   ;;  %s3595_s28 = sld [smem:[#allocation25_spill]]  ;;  %v2466_v16 = vld [vmem:[%s3542_s2] ss:$0 sm:$0xff] }
  0x74   : > { %s593_s7 = scalar_select %p592_p1, %s3004_s27, 1  ;;  %2592 = vmatprep.subr.bf16.mxu0 %v3017_v8  ;;  %2596 = vmatprep.mubr.msk.bf16.mxu0 %vm3018_vm1, %v3017_v8  ;;  %vm634_vm2 = vcmask 257024   ;;  %v2796_v19 = vld [vmem:[%s3545_s5] sm:$0xff]   ;;  %v2797_v21 = vld [vmem:[%s3545_s5 + $0x8] sm:$0xff]   ;;  %vm767_vm3 = vcmask 60416   ;;  %vm1032_vm4 = vcmask 64512  }
  0x75   : > { %2593 = vmatpush3.bf16.msra.mxu0 %v2794_v7  ;;  %2616 = vmatprep.subr.bf16.mxu1 %v3017_v8  ;;  %v2798_v22 = vld [vmem:[%s3543_s3] sm:$0xff]   ;;  %v2799_v23 = vld [vmem:[%s3543_s3 + $0x8] sm:$0xff]   ;;  %s3019_s19 = smov 104   ;;  %s3020_s22 = smov 120   ;;  %vm1100_vm5 = vcmask 1043456   ;;  %v891_v63 = vand.u32 127, %v890_v62 }
  0x76   : > { %s2464_s18 = sshll.u32 %s593_s7, 3  ;;  %2594 = vmatprep.subr.bf16.mxu0 %v3017_v8  ;;  %2618 = vmatprep.mubr.msk.bf16.mxu1 %vm3018_vm1, %v3017_v8  ;;  %v2467_v25 = vld [vmem:[#allocation9] ss:$0 sm:$0xff]  ;;  %v2471_v32 = vld [vmem:[#allocation11] ss:$0 sm:$0xff]  ;;  %s3021_s29 = smov 112  }
  0x77   : > { %v2477_v41 = vld [vmem:[#allocation6] ss:$0 sm:$0xff]  ;;  %s3022_s20 = smov 8   ;;  %s3023_s0 = smov 16   ;;  %vm1412_vm7 = vcmask 126016   ;;  %vm1674_vm8 = vcmask 191616  }
  0x78   : > { %s595_s26 = scalar_lea.vmem %s3594_s17, %s2464_s18  ;;  %s3024_s7 = smov 24   ;;  %vm1936_vm9 = vcmask 257216  }
  0x79   : > { %v3270_v0 = vld [vmem:[%s595_s26] sm:$0xff]  ;;  %2595 = vmatpush3.bf16.msra.mxu0 %v2795_v9  ;;  %s589_s1 = sand.u32 1, %s2996_s25   ;;  %s3596_s18 = sld [smem:[#allocation27_spill]] }
  0x7a   : > { %v605_v1 = vsel %vm604_vm0, %v3270_v0, 0.0  ;;  %2600 = vmatprep.subr.bf16.mxu0 %v3017_v8  ;;  %v2465_v14 = vld [vmem:[%s3595_s28] ss:$0 sm:$0xff]  ;;  %s2463_s21 = sshll.u32 %s589_s1, 3  ;;  %s3597_s30 = sld [smem:[#allocation21_spill]] }
  0x7b   : > { %606 = vadd.xlane.f32.xlu0 %v605_v1  ;;  %v893_v1 = vshrl.u32 %v890_v62, 7  ;;  %s2544_s23 = sshll.u32 %s3004_s27, 7  ;;  %s591_s17 = scalar_lea.vmem [#allocation12], %s2463_s21 }
  0x7c   : > { %s2243_s26 = sshll.u32 %s591_s17, 4  ;;  %s2229_s27 = scalar_lea.sflag [#allocation8], %s589_s1  ;;  %s3494_s26 = int_to_ptr.vmem [resolvable:$true] %s2243_s26 }
  0x7d   : > { %vm894_vm6 = vcmp.le.s32.totalorder %v891_v63, %v893_v1  ;;  %s3025_s16 = smov [#allocation12]  }
  0x7e   : > { %s2930_s28 = sshll.u32 %s3025_s16, 4  ;;  %s2931_s28 = int_to_ptr.vmem [resolvable:$false] %s2930_s28 }
  0x7f   : > { %s2932_s21 = scalar_lea.vmem %s2931_s28, 256  ;;  %p2933_p11 = scmp.lt.s32.totalorder %s3494_s26, %s2931_s28 }
  0x80   : > { %p3599_p4 = scmp.ne.s32.totalorder %s3597_s30, 0 }
 0x108   : > { %v607_v2 = vpop.xlane.xlu0 %606 }
 0x109   : > { %v609_v3 = vmul.f32 0.03125, %v607_v2 }
 0x10b   : > { %v610_v4 = vsub.f32 %v3270_v0, %v609_v3 }
 0x10d   : > { %v611_v5 = vmul.f32 %v610_v4, %v610_v4 }
 0x10f   : > { %v612_v6 = vsel %vm604_vm0, %v611_v5, 0.0 }
 0x110   : > { %613 = vadd.xlane.f32.xlu0 %v612_v6 }
 0x19d   : > { %v614_v10 = vpop.xlane.xlu0 %613 }
 0x19e   : > { %v615_v11 = vmul.f32 0.03125, %v614_v10 }
 0x1a0   : > { %v616_v12 = vadd.f32 1e-05, %v615_v11 }
 0x1a2   : > { %2812 = vrsqrt.f32 %v616_v12 }
 0x1ac   : > { %v2813_v13 = vpop.eup %2812 }
 0x1ad   : > { %v618_v15 = vmul.f32 %v2813_v13, %v610_v4 }
 0x1af   : > { %v625_v17 = vmul.f32 %v2465_v14, %v618_v15 }
 0x1b1   : > { %v632_v18 = vadd.f32 %v2466_v16, %v625_v17 }
 0x1b3   : > { %v633_v20 = vpack.c.bf16 %v632_v18, %v632_v18 }
 0x1b5   : > { %635 = vst.msk [vmem:[#allocation4] sm:$0xf] %vm634_vm2, %v633_v20  ;;  %2597 = vmatmul.mubr.msk.bf16.vlgmr.msra.gmra.mrb[0].mxu0 %vm604_vm0, %v633_v20 }
 0x1b6   : > { %2601 = vmatpush3.bf16.msra.mxu0 %v2796_v19  ;;  %2604 = vmatprep.mubr.msk.bf16.mxu0 %vm3018_vm1, %v3017_v8 }
 0x1b7   : > { %2602 = vmatprep.subr.bf16.mxu0 %v3017_v8 }
 0x1ba   : > { %2603 = vmatpush3.bf16.msra.mxu0 %v2797_v21 }
 0x1bb   : > { %2608 = vmatprep.subr.bf16.mxu0 %v3017_v8 }
 0x1bc   : > { %v822_v24 = vld [vmem:[#allocation4] sm:$0xf] }
 0x1bd   : > { %2605 = vmatmul.mubr.msk.bf16.vlgmr.msra.gmra.mrb[4].mxu0 %vm604_vm0, %v633_v20 }
 0x1be   : > { %2609 = vmatpush3.bf16.msra.mxu0 %v2798_v22  ;;  %2612 = vmatprep.mubr.msk.bf16.mxu0 %vm3018_vm1, %v3017_v8 }
 0x1bf   : > { %2610 = vmatprep.subr.bf16.mxu0 %v3017_v8 }
 0x1c2   : > { %2611 = vmatpush3.bf16.msra.mxu0 %v2799_v23 }
 0x1c3   : > { %2622 = vmatprep.subr.bf16.mxu0 %v3017_v8 }
 0x1c5   : > { %2613 = vmatmul.mubr.msk.bf16.vlgmr.msra.gmra.mrb[8].mxu0 %vm604_vm0, %v822_v24 }
 0x1c6   : > { %2624 = vmatprep.mubr.msk.bf16.mxu0 %vm3018_vm1, %v3017_v8 }
 0x288   : > { %v696_v26 = vpop.f32.mrb[0].mxu0 }
 0x289   : > { %v697_v27 = vadd.f32 %v2467_v25, %v696_v26  ;;  %v2598_v28 = vpop.f32.mrb[1].mxu0 }
 0x28a   : > { %v699_v29 = vpop.f32.mrb[2].mxu0 }
 0x28b   : > { %v702_v30 = vpack.c.bf16 %v697_v27, %v697_v27  ;;  %v2599_v31 = vpop.f32.mrb[3].mxu0 }
 0x28d   : > { %768 = vst.msk [vmem:[#allocation2] sm:$0xf] %vm767_vm3, %v702_v30  ;;  %802 = vrot.lane.b32.xlu0 %v702_v30, %s3019_s19  ;;  %773 = vrot.lane.b32.xlu1 %v702_v30, %s3020_s22 }
 0x290   : > { %v760_v33 = vpop.f32.mrb[4].mxu0 }
 0x291   : > { %v761_v34 = vadd.f32 %v2471_v32, %v760_v33  ;;  %789 = vrot.lane.b32.xlu1 %v702_v30, %s3021_s29  ;;  %v2606_v35 = vpop.f32.mrb[5].mxu0 }
 0x292   : > { %v763_v36 = vpop.f32.mrb[6].mxu0 }
 0x293   : > { %v3325_v37 = vpack.c.bf16 %v761_v34, %v761_v34  ;;  %v2607_v38 = vpop.f32.mrb[7].mxu0 }
 0x294   : > { %v1028_v39 = vld [vmem:[#allocation2] sm:$0xf] }
 0x295   : > { %769 = vst.msk [vmem:[#allocation3] sm:$0xf] %vm767_vm3, %v3325_v37  ;;  %v1037_v40 = vsel %vm1032_vm4, %v1028_v39, 0 }
 0x296   : > { %2617 = vmatpush3.bf16.xpose.msra.mxu1 %v1037_v40 }
 0x297   : > { %2628 = vmatprep.subr.bf16.mxu1 %v3017_v8 }
 0x298   : > { %v884_v42 = vpop.f32.mrb[8].mxu0 }
 0x299   : > { %v885_v43 = vadd.f32 %v2477_v41, %v884_v42  ;;  %v2614_v44 = vpop.f32.mrb[9].mxu0 }
 0x29a   : > { %v887_v45 = vpop.f32.mrb[10].mxu0 }
 0x29b   : > { %v895_v46 = vpack.c.bf16 %v885_v43, %v885_v43  ;;  %v2615_v47 = vpop.f32.mrb[11].mxu0 }
 0x29c   : > { %v1031_v48 = vld [vmem:[#allocation3] sm:$0xf] }
 0x29d   : > { %1290 = vrot.lane.b32.xlu1 %v895_v46, %s3020_s22  ;;  %2619 = vmatmul.mubr.msk.bf16.vlgmr.msra.gmra.mrb[0].mxu1 %vm1032_vm4, %v895_v46  ;;  %v1102_v49 = vsel %vm1100_vm5, %v1031_v48, 0 }
 0x29e   : > { %2623 = vmatpush3.bf16.msra.mxu0 %v1102_v49  ;;  %2630 = vmatprep.mubr.msk.bf16.mxu1 %vm3018_vm1, %v3017_v8 }
 0x29f   : > { %2634 = vmatprep.subr.bf16.mxu0 %v3017_v8 }
 0x2a1   : > { %1552 = vrot.lane.b32.xlu1 %v895_v46, %s3021_s29 }
 0x2a5   : > { %1814 = vrot.lane.b32.xlu1 %v895_v46, %s3019_s19 }
 0x2ff   : > { %v803_v50 = vpop.permute.xlu0 %802  ;;  %v774_v51 = vpop.permute.xlu1 %773 }
 0x300   : > { %808 = vst.msk [vmem:[#allocation2 + $0xc] sm:$0xf] %vm767_vm3, %v803_v50  ;;  %779 = vst.msk [vmem:[#allocation2 + $0x4] sm:$0xf] %vm767_vm3, %v774_v51 }
 0x303   : > { %v790_v52 = vpop.permute.xlu1 %789 }
 0x304   : > { %795 = vst.msk [vmem:[#allocation2 + $0x8] sm:$0xf] %vm767_vm3, %v790_v52 }
 0x307   : > { %v2495_v53 = vld [vmem:[#allocation2 + $0x4] sm:$0xf]  ;;  %v2519_v58 = vld [vmem:[#allocation2 + $0xc] sm:$0xf] }
 0x308   : > { %v1296_v54 = vsel %vm1032_vm4, %v2495_v53, 0  ;;  %v1820_v60 = vsel %vm1032_vm4, %v2519_v58, 0 }
 0x309   : > { %2629 = vmatpush3.bf16.xpose.msra.mxu1 %v1296_v54 }
 0x30a   : > { %2640 = vmatprep.subr.bf16.mxu1 %v3017_v8 }
 0x30b   : > { %v2507_v55 = vld [vmem:[#allocation2 + $0x8] sm:$0xf] }
 0x30c   : > { %v1558_v57 = vsel %vm1032_vm4, %v2507_v55, 0 }
 0x30f   : > { %v1291_v56 = vpop.permute.xlu1 %1290 }
 0x310   : > { %2631 = vmatmul.mubr.msk.bf16.vlgmr.msra.gmra.mrb[4].mxu1 %vm1032_vm4, %v1291_v56 }
 0x311   : > { %2641 = vmatpush3.bf16.xpose.msra.mxu1 %v1558_v57  ;;  %2642 = vmatprep.mubr.msk.bf16.mxu1 %vm3018_vm1, %v3017_v8 }
 0x312   : > { %2652 = vmatprep.subr.bf16.mxu1 %v3017_v8 }
 0x313   : > { %v1553_v59 = vpop.permute.xlu1 %1552 }
 0x317   : > { %v1815_v61 = vpop.permute.xlu1 %1814 }
 0x318   : > { %2643 = vmatmul.mubr.msk.bf16.vlgmr.msra.gmra.mrb[8].mxu1 %vm1032_vm4, %v1553_v59 }
 0x319   : > { %2653 = vmatpush3.bf16.xpose.msra.mxu1 %v1820_v60  ;;  %2654 = vmatprep.mubr.msk.bf16.mxu1 %vm3018_vm1, %v3017_v8 }
 0x31a   : > { %2664 = vmatprep.subr.bf16.mxu1 %v3017_v8 }
 0x320   : > { %2655 = vmatmul.mubr.msk.bf16.vlgmr.msra.gmra.mrb[12].mxu1 %vm1032_vm4, %v1815_v61 }
 0x321   : > { %2668 = vmatprep.mubr.msk.bf16.mxu1 %vm3018_vm1, %v3017_v8 }
 0x370   : > { %v1073_v2 = vpop.f32.mrb[0].mxu1 }
 0x371   : > { %v1079_v3 = vsel %vm894_vm6, %v1073_v2, -1e+30  ;;  %v2620_v4 = vpop.f32.mrb[1].mxu1 }
 0x372   : > { %v1076_v5 = vpop.f32.mrb[2].mxu1  ;;  %v1080_v6 = vsel %vm1032_vm4, %v1079_v3, -inf }
 0x373   : > { %1081 = vmax.xlane.f32.xlu1 %v1080_v6  ;;  %v2621_v7 = vpop.f32.mrb[3].mxu1 }
 0x384   : > { %796 = vrot.lane.b32.xlu1 %v3325_v37, %s3021_s29 }
 0x3e3   : > { %v1332_v9 = vpop.f32.mrb[4].mxu1 }
 0x3e4   : > { %v1338_v10 = vsel %vm894_vm6, %v1332_v9, -1e+30  ;;  %v2632_v11 = vpop.f32.mrb[5].mxu1 }
 0x3e5   : > { %v1335_v12 = vpop.f32.mrb[6].mxu1  ;;  %v1339_v13 = vsel %vm1032_vm4, %v1338_v10, -inf }
 0x3e6   : > { %1340 = vmax.xlane.f32.xlu0 %v1339_v13  ;;  %v2633_v14 = vpop.f32.mrb[7].mxu1 }
 0x3eb   : > { %v1594_v15 = vpop.f32.mrb[8].mxu1 }
 0x3ec   : > { %v1600_v16 = vsel %vm894_vm6, %v1594_v15, -1e+30  ;;  %v2644_v17 = vpop.f32.mrb[9].mxu1 }
 0x3ed   : > { %v1597_v18 = vpop.f32.mrb[10].mxu1  ;;  %v1601_v19 = vsel %vm1032_vm4, %v1600_v16, -inf }
 0x3ee   : > { %1602 = vmax.xlane.f32.xlu1 %v1601_v19  ;;  %v2645_v20 = vpop.f32.mrb[11].mxu1 }
 0x3f3   : > { %v1856_v21 = vpop.f32.mrb[12].mxu1 }
 0x3f4   : > { %v1862_v22 = vsel %vm894_vm6, %v1856_v21, -1e+30  ;;  %v2656_v23 = vpop.f32.mrb[13].mxu1 }
 0x3f5   : > { %v1859_v24 = vpop.f32.mrb[14].mxu1  ;;  %v1863_v25 = vsel %vm1032_vm4, %v1862_v22, -inf }
 0x3f6   : > { %1864 = vmax.xlane.f32.xlu1 %v1863_v25  ;;  %v2657_v26 = vpop.f32.mrb[15].mxu1 }
 0x3fc   : > { %783 = vrot.lane.b32.xlu0 %v3325_v37, %s3020_s22  ;;  %s3598_s22 = sld [smem:[#allocation28_spill]] }
 0x400   : > { %v3369_v27 = vpop.xlane.xlu1 %1081 }
 0x401   : > { %v1083_v28 = vmax.f32 %v3369_v27, -1e+30 }
 0x402   : > { %s3492_s29 = scalar_lea.hbm %s3598_s22, %s2544_s23 }
 0x403   : > { %v1087_v29 = vsub.f32 %v1079_v3, %v1083_v28  ;;  %v1084_v1 = vsub.f32 -1e+30, %v1083_v28 }
 0x404   : > { %v797_v30 = vpop.permute.xlu1 %796 }
 0x405   : > { %v1088_v31 = vmul.f32 1.442695, %v1087_v29  ;;  %801 = vst.msk [vmem:[#allocation3 + $0x8] sm:$0xf] %vm767_vm3, %v797_v30  ;;  %v1085_v2 = vmul.f32 1.442695, %v1084_v1 }
 0x407   : > { %809 = vrot.lane.b32.xlu1 %v3325_v37, %s3019_s19  ;;  %2814 = vpow2.f32 %v1088_v31 }
 0x40c   : > { %v2508_v48 = vld [vmem:[#allocation3 + $0x8] sm:$0xf] }
 0x40d   : > { %v1622_v54 = vsel %vm1100_vm5, %v2508_v48, 0 }
 0x411   : > { %v2815_v32 = vpop.eup %2814 }
 0x412   : > { %v1096_v33 = vpack.c.bf16 %v2815_v32, %v2815_v32  ;;  %v1091_v63 = vsel %vm1032_vm4, %v2815_v32, 0.0 }
 0x414   : > { %2625 = vmatmul.mubr.msk.bf16.vlgmr.msra.gmra.mrb[12].mxu0 %vm1032_vm4, %v1096_v33 }
 0x415   : > { %2636 = vmatprep.mubr.msk.bf16.mxu0 %vm3018_vm1, %v3017_v8 }
 0x473   : > { %v3378_v34 = vpop.xlane.xlu0 %1340 }
 0x474   : > { %v1342_v35 = vmax.f32 %v3378_v34, -1e+30 }
 0x476   : > { %v1346_v36 = vsub.f32 %v1338_v10, %v1342_v35  ;;  %v1343_v17 = vsub.f32 -1e+30, %v1342_v35 }
 0x477   : > { %v784_v38 = vpop.permute.xlu0 %783 }
 0x478   : > { %v1347_v39 = vmul.f32 1.442695, %v1346_v36  ;;  %788 = vst.msk [vmem:[#allocation3 + $0x4] sm:$0xf] %vm767_vm3, %v784_v38  ;;  %v1344_v19 = vmul.f32 1.442695, %v1343_v17 }
 0x47a   : > { %2816 = vpow2.f32 %v1347_v39 }
 0x47b   : > { %v3384_v37 = vpop.xlane.xlu1 %1602 }
 0x47c   : > { %v1604_v40 = vmax.f32 %v3384_v37, -1e+30 }
 0x47e   : > { %v1608_v41 = vsub.f32 %v1600_v16, %v1604_v40  ;;  %v1605_v20 = vsub.f32 -1e+30, %v1604_v40 }
 0x47f   : > { %v2496_v42 = vld [vmem:[#allocation3 + $0x4] sm:$0xf] }
 0x480   : > { %v1609_v43 = vmul.f32 1.442695, %v1608_v41  ;;  %v1360_v44 = vsel %vm1100_vm5, %v2496_v42, 0  ;;  %v1606_v21 = vmul.f32 1.442695, %v1605_v20 }
 0x481   : > { %2635 = vmatpush3.bf16.msra.mxu0 %v1360_v44 }
 0x482   : > { %2646 = vmatprep.subr.bf16.mxu0 %v3017_v8  ;;  %2818 = vpow2.f32 %v1609_v43 }
 0x483   : > { %v1865_v45 = vpop.xlane.xlu1 %1864 }
 0x484   : > { %v1866_v46 = vmax.f32 %v1865_v45, -1e+30  ;;  %v2817_v47 = vpop.eup %2816 }
 0x485   : > { %v1350_v50 = vsel %vm1032_vm4, %v2817_v47, 0.0  ;;  %v1355_v51 = vpack.c.bf16 %v2817_v47, %v2817_v47  ;;  %v2800_v47 = vld [vmem:[%s3549_s9] sm:$0xff]  }
 0x486   : > { %v1870_v49 = vsub.f32 %v1862_v22, %v1866_v46  ;;  %1351 = vadd.xlane.f32.xlu0 %v1350_v50  ;;  %v1867_v22 = vsub.f32 -1e+30, %v1866_v46  ;;  %2665 = vmatpush3.bf16.msra.mxu1 %v2800_v47  ;;  %v2801_v50 = vld [vmem:[%s3549_s9 + $0x8] sm:$0xff]  }
 0x487   : > { %v810_v52 = vpop.permute.xlu1 %809  ;;  %2637 = vmatmul.mubr.msk.bf16.vlgmr.msra.gmra.mrb[16].mxu0 %vm1032_vm4, %v1355_v51  ;;  %2666 = vmatprep.subr.bf16.mxu1 %v3017_v8 }
 0x488   : > { %v1871_v53 = vmul.f32 1.442695, %v1870_v49  ;;  %814 = vst.msk [vmem:[#allocation3 + $0xc] sm:$0xf] %vm767_vm3, %v810_v52  ;;  %2647 = vmatpush3.bf16.msra.mxu0 %v1622_v54  ;;  %2648 = vmatprep.mubr.msk.bf16.mxu0 %vm3018_vm1, %v3017_v8  ;;  %v1868_v24 = vmul.f32 1.442695, %v1867_v22 }
 0x489   : > { %2658 = vmatprep.subr.bf16.mxu0 %v3017_v8 }
 0x48a   : > { %2820 = vpow2.f32 %v1871_v53  ;;  %2667 = vmatpush3.bf16.msra.mxu1 %v2801_v50 }
 0x48b   : > { %2822 = vpow2.f32 %v1085_v2  ;;  %2680 = vmatprep.subr.bf16.mxu1 %v3017_v8  ;;  %v2527_v2 = vld [vmem:[%s3550_s10] ss:$0 sm:$0xff] }
 0x48c   : > { %v2819_v55 = vpop.eup %2818 }
 0x48d   : > { %v1612_v56 = vsel %vm1032_vm4, %v2819_v55, 0.0  ;;  %v1617_v57 = vpack.c.bf16 %v2819_v55, %v2819_v55 }
 0x48e   : > { %1613 = vadd.xlane.f32.xlu1 %v1612_v56 }
 0x48f   : > { %v2520_v58 = vld [vmem:[#allocation3 + $0xc] sm:$0xf]  ;;  %2649 = vmatmul.mubr.msk.bf16.vlgmr.msra.gmra.mrb[20].mxu0 %vm1032_vm4, %v1617_v57 }
 0x490   : > { %v1884_v59 = vsel %vm1100_vm5, %v2520_v58, 0  ;;  %2660 = vmatprep.mubr.msk.bf16.mxu0 %vm3018_vm1, %v3017_v8 }
 0x491   : > { %2659 = vmatpush3.bf16.msra.mxu0 %v1884_v59 }
 0x492   : > { %2672 = vmatprep.subr.bf16.mxu0 %v3017_v8 }
 0x494   : > { %v2821_v60 = vpop.eup %2820 }
 0x495   : > { %v1874_v61 = vsel %vm1032_vm4, %v2821_v60, 0.0  ;;  %v1879_v62 = vpack.c.bf16 %v2821_v60, %v2821_v60  ;;  %v2823_v3 = vpop.eup %2822 }
 0x496   : > { %1875 = vadd.xlane.f32.xlu0 %v1874_v61  ;;  %v1090_v4 = vmul.f32 0.0, %v2823_v3 }
 0x497   : > { %2661 = vmatmul.mubr.msk.bf16.vlgmr.msra.gmra.mrb[24].mxu0 %vm1032_vm4, %v1879_v62 }
 0x498   : > { %2676 = vmatprep.mubr.msk.bf16.mxu0 %vm3018_vm1, %v3017_v8 }
 0x49a   : > { %1092 = vadd.xlane.f32.xlu0 %v1091_v63 }
 0x4e7   : > { %v1138_v5 = vpop.f32.mrb[12].mxu0 }
 0x4e8   : > { %v1144_v6 = vadd.f32 %v1138_v5, %v1090_v4  ;;  %v2626_v7 = vpop.f32.mrb[13].mxu0 }
 0x4e9   : > { %v1141_v9 = vpop.f32.mrb[14].mxu0 }
 0x4ea   : > { %v2627_v10 = vpop.f32.mrb[15].mxu0 }
 0x513   : > { %v1352_v11 = vpop.xlane.xlu0 %1351 }
 0x51b   : > { %v1614_v28 = vpop.xlane.xlu1 %1613 }
 0x523   : > { %v1876_v12 = vpop.xlane.xlu0 %1875 }
 0x527   : > { %v1093_v13 = vpop.xlane.xlu0 %1092 }
 0x528   : > { %v1094_v14 = vadd.f32 %v1093_v13, %v1090_v4 }
 0x52a   : > { %2824 = vrcp.f32 %v1094_v14 }
 0x52b   : > { %2826 = vpow2.f32 %v1344_v19 }
 0x52c   : > { %2828 = vpow2.f32 %v1606_v21  ;;  %v2528_v21 = vld [vmem:[%s3551_s11] ss:$0 sm:$0xff] }
 0x52d   : > { %2830 = vpow2.f32 %v1868_v24 }
 0x534   : > { %v2825_v15 = vpop.eup %2824 }
 0x535   : > { %v1146_v16 = vmul.f32 %v2825_v15, %v1144_v6  ;;  %v2827_v23 = vpop.eup %2826  ;;  %v2803_v15 = vld [vmem:[%s3553_s13 + $0x8] sm:$0xff]  }
 0x536   : > { %v1349_v25 = vmul.f32 0.0, %v2827_v23  ;;  %v2829_v27 = vpop.eup %2828  ;;  %v2529_v23 = vld [vmem:[%s3552_s12] ss:$0 sm:$0xff] }
 0x537   : > { %v1147_v18 = vpack.c.bf16 %v1146_v16, %v1146_v16  ;;  %v1611_v29 = vmul.f32 0.0, %v2829_v27  ;;  %v2831_v31 = vpop.eup %2830  ;;  %v2804_v16 = vld [vmem:[%s3555_s15] sm:$0xff]   ;;  %v2805_v27 = vld [vmem:[%s3555_s15 + $0x8] sm:$0xff]  }
 0x538   : > { %v1353_v26 = vadd.f32 %v1352_v11, %v1349_v25  ;;  %v1873_v36 = vmul.f32 0.0, %v2831_v31  ;;  %v2809_v31 = vld [vmem:[%s3555_s15 + $0x28] sm:$0xff]  }
 0x539   : > { %1149 = vst.msk [vmem:[#allocation5] sm:$0xf] %vm767_vm3, %v1147_v18  ;;  %v1615_v30 = vadd.f32 %v1614_v28, %v1611_v29  ;;  %v2806_v28 = vld [vmem:[%s3555_s15 + $0x10] sm:$0xff]  }
 0x53a   : > { %2832 = vrcp.f32 %v1353_v26  ;;  %v1877_v40 = vadd.f32 %v1876_v12, %v1873_v36 }
 0x53b   : > { %2834 = vrcp.f32 %v1615_v30  ;;  %v2808_v30 = vld [vmem:[%s3555_s15 + $0x20] sm:$0xff]  }
 0x53c   : > { %2836 = vrcp.f32 %v1877_v40 }
 0x544   : > { %v2833_v35 = vpop.eup %2832 }
 0x545   : > { %v2835_v45 = vpop.eup %2834 }
 0x546   : > { %v2837_v55 = vpop.eup %2836 }
 0x55a   : > { %v1396_v32 = vpop.f32.mrb[16].mxu0 }
 0x55b   : > { %v1402_v33 = vadd.f32 %v1396_v32, %v1349_v25  ;;  %v2638_v34 = vpop.f32.mrb[17].mxu0  ;;  %v2810_v32 = vld [vmem:[%s3555_s15 + $0x30] sm:$0xff]  }
 0x55c   : > { %v1399_v38 = vpop.f32.mrb[18].mxu0  ;;  %v2531_v34 = vld [vmem:[%s3554_s14] ss:$0 sm:$0xff] }
 0x55d   : > { %v1404_v39 = vmul.f32 %v2833_v35, %v1402_v33  ;;  %v2639_v37 = vpop.f32.mrb[19].mxu0  ;;  %v2811_v33 = vld [vmem:[%s3555_s15 + $0x38] sm:$0xff]  }
 0x55f   : > { %v2549_v41 = vpack.c.bf16 %v1404_v39, %v1404_v39 }
 0x561   : > { %1409 = vrot.lane.b32.xlu1 %v2549_v41, %s3022_s20  ;;  %s2926_s20 = scalar_lea.vmem %s3494_s26, 128 }
 0x562   : > { %v1658_v42 = vpop.f32.mrb[20].mxu0  ;;  %p2927_p13 = scmp.ne.s32.totalorder %s3494_s26, %s2926_s20  ;;  %p2934_p3 = scmp.lt.s32.totalorder %s2932_s21, %s2926_s20 }
 0x563   : > { %v1664_v43 = vadd.f32 %v1658_v42, %v1611_v29  ;;  %v2650_v44 = vpop.f32.mrb[21].mxu0  ;;  %v2807_v29 = vld [vmem:[%s3555_s15 + $0x18] sm:$0xff]  }
 0x564   : > { %v1661_v46 = vpop.f32.mrb[22].mxu0  ;;  %p2928_p8 = pnand %p2927_p13, %p3599_p4  ;;  %p2935_p5 = por %p2934_p3, %p2933_p11 }
 0x565   : > { %v1666_v48 = vmul.f32 %v2835_v45, %v1664_v43  ;;  %v2651_v49 = vpop.f32.mrb[23].mxu0 }
 0x566   : > { %v2530_v49 = vld [vmem:[%s3596_s18] ss:$0 sm:$0xff]  ;;  %p2929_p10 = pneg %p2928_p8 }
 0x567   : > { %v2550_v51 = vpack.c.bf16 %v1666_v48, %v1666_v48 }
 0x568   : > { %p2936_p6 = pnand %p2935_p5, %p2929_p10 }
 0x569   : > { %1671 = vrot.lane.b32.xlu0 %v2550_v51, %s3023_s0 }
 0x56a   : > { %v1920_v52 = vpop.f32.mrb[24].mxu0 }
 0x56b   : > { %v1926_v53 = vadd.f32 %v1920_v52, %v1873_v36  ;;  %v2662_v54 = vpop.f32.mrb[25].mxu0 }
 0x56c   : > { %v1923_v56 = vpop.f32.mrb[26].mxu0 }
 0x56d   : > { %v1928_v57 = vmul.f32 %v2837_v55, %v1926_v53  ;;  %v2663_v58 = vpop.f32.mrb[27].mxu0 }
 0x56f   : > { %v2551_v59 = vpack.c.bf16 %v1928_v57, %v1928_v57 }
 0x571   : > { %1933 = vrot.lane.b32.xlu1 %v2551_v59, %s3024_s7 }
 0x5d3   : > { %v1410_v60 = vpop.permute.xlu1 %1409 }
 0x5d4   : > { %1413 = vst.msk [vmem:[#allocation5] sm:$0xf] %vm1412_vm7, %v1410_v60 }
 0x5db   : > { %v1672_v61 = vpop.permute.xlu0 %1671 }
 0x5dc   : > { %1675 = vst.msk [vmem:[#allocation5] sm:$0xf] %vm1674_vm8, %v1672_v61 }
 0x5e3   : > { %v1934_v62 = vpop.permute.xlu1 %1933 }
 0x5e4   : > { %1937 = vst.msk [vmem:[#allocation5] sm:$0xf] %vm1936_vm9, %v1934_v62 }
 0x5eb   : > { %v1938_v63 = vld [vmem:[#allocation5] sm:$0xf] }
 0x5ec   : > { %2669 = vmatmul.mubr.msk.bf16.vlgmr.msra.gmra.mrb[16].mxu1 %vm604_vm0, %v1938_v63 }
 0x5ed   : > { %2696 = vmatprep.mubr.msk.bf16.mxu1 %vm3018_vm1, %v3017_v8  ;;  %2681 = vmatpush3.bf16.msra.mxu1 %v2804_v16 }
 0x5ee   : > { %2682 = vmatprep.subr.bf16.mxu1 %v3017_v8 }
 0x5f1   : > { %2683 = vmatpush3.bf16.msra.mxu1 %v2805_v27 }
 0x5f2   : > { %2684 = vmatprep.subr.bf16.mxu1 %v3017_v8 }
 0x5f5   : > { %2685 = vmatpush3.bf16.msra.mxu1 %v2806_v28 }
 0x5f6   : > { %2686 = vmatprep.subr.bf16.mxu1 %v3017_v8 }
 0x5f9   : > { %2687 = vmatpush3.bf16.msra.mxu1 %v2807_v29 }
 0x5fa   : > { %2688 = vmatprep.subr.bf16.mxu1 %v3017_v8 }
 0x5fd   : > { %2689 = vmatpush3.bf16.msra.mxu1 %v2808_v30 }
 0x5fe   : > { %2690 = vmatprep.subr.bf16.mxu1 %v3017_v8 }
 0x601   : > { %2691 = vmatpush3.bf16.msra.mxu1 %v2809_v31 }
 0x602   : > { %2692 = vmatprep.subr.bf16.mxu1 %v3017_v8 }
 0x605   : > { %2693 = vmatpush3.bf16.msra.mxu1 %v2810_v32 }
 0x606   : > { %2694 = vmatprep.subr.bf16.mxu1 %v3017_v8 }
 0x609   : > { %2695 = vmatpush3.bf16.msra.mxu1 %v2811_v33 }
 0x6bf   : > { %v1992_v1 = vpop.f32.mrb[16].mxu1 }
 0x6c0   : > { %v1998_v3 = vadd.f32 %v1992_v1, %v3270_v0  ;;  %v2670_v4 = vpop.f32.mrb[17].mxu1  ;;  %v2802_v0 = vld [vmem:[%s3553_s13] sm:$0xff]  }
 0x6c1   : > { %v1995_v5 = vpop.f32.mrb[18].mxu1  ;;  %2673 = vmatpush3.bf16.msra.mxu0 %v2802_v0 }
 0x6c2   : > { %v3429_v6 = vadd.f32 %v2527_v2, %v1998_v3  ;;  %v2671_v7 = vpop.f32.mrb[19].mxu1  ;;  %2674 = vmatprep.subr.bf16.mxu0 %v3017_v8 }
 0x6c4   : > { %v2009_v9 = vsel %vm604_vm0, %v3429_v6, 0.0  ;;  %v2045_v50 = vadd.f32 %v2530_v49, %v3429_v6 }
 0x6c5   : > { %2010 = vadd.xlane.f32.xlu1 %v2009_v9  ;;  %2675 = vmatpush3.bf16.msra.mxu0 %v2803_v15 }
 0x752   : > { %v2011_v10 = vpop.xlane.xlu1 %2010 }
 0x753   : > { %v2013_v11 = vmul.f32 0.03125, %v2011_v10 }
 0x755   : > { %v2014_v12 = vsub.f32 %v3429_v6, %v2013_v11 }
 0x757   : > { %v2015_v13 = vmul.f32 %v2014_v12, %v2014_v12 }
 0x759   : > { %v2016_v14 = vsel %vm604_vm0, %v2015_v13, 0.0 }
 0x75a   : > { %2017 = vadd.xlane.f32.xlu0 %v2016_v14 }
 0x7e7   : > { %v2018_v17 = vpop.xlane.xlu0 %2017 }
 0x7e8   : > { %v2019_v18 = vmul.f32 0.03125, %v2018_v17 }
 0x7ea   : > { %v2020_v19 = vadd.f32 1e-05, %v2019_v18 }
 0x7ec   : > { %2838 = vrsqrt.f32 %v2020_v19 }
 0x7f6   : > { %v2839_v20 = vpop.eup %2838 }
 0x7f7   : > { %v2022_v22 = vmul.f32 %v2839_v20, %v2014_v12 }
 0x7f9   : > { %v2029_v24 = vmul.f32 %v2528_v21, %v2022_v22 }
 0x7fb   : > { %v2036_v25 = vadd.f32 %v2529_v23, %v2029_v24 }
 0x7fd   : > { %v2037_v26 = vpack.c.bf16 %v2036_v25, %v2036_v25 }
 0x7ff   : > { %2677 = vmatmul.mubr.msk.bf16.vlgmr.msra.gmra.mrb[28].mxu0 %vm604_vm0, %v2037_v26 }
 0x8d2   : > { %v2106_v35 = vpop.f32.mrb[28].mxu0 }
 0x8d3   : > { %v2107_v36 = vadd.f32 %v2531_v34, %v2106_v35  ;;  %v2678_v38 = vpop.f32.mrb[29].mxu0 }
 0x8d4   : > { %v2109_v39 = vpop.f32.mrb[30].mxu0 }
 0x8d5   : > { %v2113_v37 = vmul.f32 0.044715, %v2107_v36  ;;  %v2679_v40 = vpop.f32.mrb[31].mxu0  ;;  %v2112_v8 = vmul.f32 0.5, %v2107_v36 }
 0x8d7   : > { %v2114_v41 = vmul.f32 %v2113_v37, %v2107_v36 }
 0x8d9   : > { %v2115_v42 = vmul.f32 %v2114_v41, %v2107_v36 }
 0x8db   : > { %v2116_v43 = vadd.f32 %v2115_v42, %v2107_v36 }
 0x8dd   : > { %v2117_v44 = vmul.f32 0.7978846, %v2116_v43 }
 0x8df   : > { %2840 = vtanh.f32 %v2117_v44 }
 0x8e9   : > { %v2841_v45 = vpop.eup %2840 }
 0x8ea   : > { %v2119_v46 = vadd.f32 1.0, %v2841_v45 }
 0x8ec   : > { %v2120_v47 = vmul.f32 %v2119_v46, %v2112_v8 }
 0x8ee   : > { %v2121_v48 = vpack.c.bf16 %v2120_v47, %v2120_v47 }
 0x8f0   : > { %2697 = vmatmul.mubr.bf16.vlgmr.msra.gmra.mrb[20].mxu1 %v2121_v48 }
 0x9c3   : > { %v2220_v51 = vpop.f32.mrb[20].mxu1 }
 0x9c4   : > { %v2226_v52 = vadd.f32 %v2220_v51, %v2045_v50  ;;  %v2698_v53 = vpop.f32.mrb[21].mxu1 }
 0x9c5   : > { %v2223_v54 = vpop.f32.mrb[22].mxu1 }
 0x9c6   : > { %v2699_v55 = vpop.f32.mrb[23].mxu1  ;;  %2227 = vst.msk [vmem:[%s591_s17] sm:$0xff] %vm604_vm0, %v2226_v52 }
 0x9c7   : > { %2939 = shalt.err (!%p2936_p6)
}
 0x9c8   : > { %s2940_s1 = scalar_lea.hbm %s3492_s29, 128  ;;  %s2944_s18 = scalar_lea.hbm %s3598_s22, 256 }
 0x9c9   : > { %p2941_p7 = scmp.ne.s32.totalorder %s3492_s29, %s2940_s1  ;;  %p2945_p0 = scmp.lt.u32.totalorder %s3492_s29, %s3598_s22 }
 0x9ca   : > { %p2946_p2 = scmp.lt.u32.totalorder %s2944_s18, %s2940_s1  ;;  %p2948_p13 = scmp.lt.u32.totalorder %s2940_s1, %s3492_s29 }
 0x9cb   : > { %p2942_p9 = pnand %p2941_p7, %p3599_p4 }
 0x9cc   : > { %p2947_p1 = por %p2946_p2, %p2945_p0 }
 0x9cd   : > { %p2943_p12 = pneg %p2942_p9 }
 0x9ce   : > { %p2949_p8 = por %p2948_p13, %p2947_p1 }
 0x9d0   : > { %p2950_p10 = pnand %p2949_p8, %p2943_p12 }
 0x9d2   : > { %2953 = shalt.err (!%p2950_p10)
}
 0x9d3   : > { %2712 = dma.vmem_to_hbm [thread:$0]  (%p3599_p4), %s3494_s26, 128, %s3492_s29, %s2229_s27  }
 0x9d4 PF: > { %s3600_s24 = sld [smem:[#allocation19_spill]]  ;;  %s3601_s19 = sld [smem:[#allocation16_spill]] }
 0x9d5   : > { %s3602_s20 = sld [smem:[#allocation22_spill]] }
 0x9da   : > { %p2734_p11 = scmp.ge.s32.totalorder %s3600_s24, 2  ;;  %s2255_s16 = sand.u32 1, %s3601_s19  }
 0x9db   : > { %p3603_p3 = scmp.ne.s32.totalorder %s3602_s20, 0  ;;  %s2256_s28 = scalar_lea.sflag [#allocation8], %s2255_s16 }
 0x9dd   : > { %p2725_p5 = pnand %p2734_p11, %p3603_p3 }
 0x9df   : > { %2987 = dma.done.wait (!%p2725_p5), %s2256_s28, 128  }
 0x9e0   : > { %2989 = vsyncadd (!%p2725_p5), %s2256_s28, 4294967168  ;;  %s32_s29 = sadd.s32 1, %s3600_s24   ;;  %s3604_s21 = sld [smem:[#allocation17_spill]] }
 0x9e1   : > { %p29_p6 = scmp.ge.s32.totalorder %s32_s29, 4   ;;  %s3605_s26 = sld [smem:[#allocation23_spill]] }
 0x9e2   : > { %s3606_s27 = sld [smem:[#allocation18_spill]]  ;;  %s3607_s28 = sld [smem:[#allocation20_spill]] }
 0x9e3   : > { %s3608_s24 = smov %s2996_s25  ;;  %31 = sbr.rel (!%p29_p6) target bundleno = 12 (0xc), region = 236 }
 0x9e6   : > { %s3609_s25 = smov %s3604_s21 }
 0x9ea   :  { %2261 = vsyncpa [#allocation7], 1 }
 0x9eb   :  { %2263 = vsyncpa [#allocation7 + $0x1], 1 }
 0x9ec   :  { %2264 = vsyncpa [#allocation10], 1 }
 0x9ed   :  { %2265 = vsyncpa [#allocation8], 1 }
 0x9ee   :  { %2267 = vsyncpa [#allocation8 + $0x1], 1 }

// kernel: tpu_custom_call.1
= control target key start
LH: loop header
LB: loop body
LE: loop exit
PB: predicated region body
PF: predicated region fallthrough
CT: control target
= control target key end

     0   :  { %s3540_s0 = inlined_call_operand.vmem [shape: f32[2,8,32], index: 0, kind: input, shape index: {}]   ;;  %s3541_s1 = inlined_call_operand.vmem [shape: f32[1,32], index: 1, kind: input, shape index: {}]   ;;  %s3542_s2 = inlined_call_operand.vmem [shape: f32[1,32], index: 2, kind: input, shape index: {}]   ;;  %s3543_s3 = inlined_call_operand.vmem [shape: bf16[32,32], index: 3, kind: input, shape index: {}]   ;;  %s3544_s4 = inlined_call_operand.vmem [shape: bf16[32,32], index: 4, kind: input, shape index: {}]   ;;  %s3545_s5 = inlined_call_operand.vmem [shape: bf16[32,32], index: 5, kind: input, shape index: {}]   ;;  %s3546_s6 = inlined_call_operand.hbm [shape: f32[1,32], index: 6, kind: input, shape index: {}]   ;;  %s3547_s7 = inlined_call_operand.hbm [shape: f32[1,32], index: 7, kind: input, shape index: {}]   ;;  %s3548_s8 = inlined_call_operand.hbm [shape: f32[1,32], index: 8, kind: input, shape index: {}]   ;;  %s3549_s9 = inlined_call_operand.vmem [shape: bf16[32,32], index: 9, kind: input, shape index: {}]   ;;  %s3550_s10 = inlined_call_operand.vmem [shape: f32[1,32], index: 10, kind: input, shape index: {}]   ;;  %s3551_s11 = inlined_call_operand.vmem [shape: f32[1,32], index: 11, kind: input, shape index: {}]   ;;  %s3552_s12 = inlined_call_operand.vmem [shape: f32[1,32], index: 12, kind: input, shape index: {}]   ;;  %s3553_s13 = inlined_call_operand.vmem [shape: bf16[32,128], index: 13, kind: input, shape index: {}]   ;;  %s3554_s14 = inlined_call_operand.vmem [shape: f32[1,128], index: 14, kind: input, shape index: {}]   ;;  %s3555_s15 = inlined_call_operand.vmem [shape: bf16[128,32], index: 15, kind: input, shape index: {}]   ;;  %s3556_s16 = inlined_call_operand.vmem [shape: f32[1,32], index: 16, kind: input, shape index: {}]   ;;  %s3557_s17 = inlined_call_operand.hbm [shape: f32[2,8,32], index: 17, kind: output, shape index: {}]  }
   0x1   :  { %3572 = sst [smem:[#allocation24_spill]] %s3540_s0 }
   0x2   :  { %3573 = sst [smem:[#allocation25_spill]] %s3541_s1 }
   0x3   :  { %3574 = sst [smem:[#allocation26_spill]] %s3547_s7 }
   0x4   :  { %3575 = sst [smem:[#allocation27_spill]] %s3556_s16 }
   0x5   :  { %3576 = sst [smem:[#allocation28_spill]] %s3557_s17 }
   0x6   :  { %22 = vsyncpa [#allocation7], 0 }
   0x7   :  { %23 = vsyncpa [#allocation10], 0 }
   0x8   :  { %24 = vsyncpa [#allocation8], 0 }
   0x9   :  { %26 = vsyncpa [#allocation8 + $0x1], 0  ;;  %s3116_s24 = smov 0   ;;  %s3118_s25 = smov 0  }
   0xa   :  { %s3120_s26 = smov 0   ;;  %s3122_s27 = smov 0  }
   0xb   :  { %s3124_s28 = smov 0   ;;  %s3126_s29 = smov 0  }
   0xc LB: > { %3577 = sst [smem:[#allocation16_spill]] %s2992_s24  ;;  %s2452_s0 = sadd.s32 4294967295, %s3012_s29   ;;  %s3012_s29 = sphi %s3126_s29, %s32_s29   ;;  %s3008_s28 = sphi %s3124_s28, %s3607_s28   ;;  %s3004_s27 = sphi %s3122_s27, %s3606_s27   ;;  %s3000_s26 = sphi %s3120_s26, %s3605_s26   ;;  %s2996_s25 = sphi %s3118_s25, %s3609_s25   ;;  %s2992_s24 = sphi %s3116_s24, %s3608_s24  }
   0xd   : > { %3578 = sst [smem:[#allocation17_spill]] %s3000_s26  ;;  %s2453_s30 = sadd.s32 4294967294, %s3012_s29  }
   0xe   : > { %3579 = sst [smem:[#allocation18_spill]] %s3008_s28  ;;  %s44_s18 = sadd.s32 1, %s3008_s28 }
   0xf   : > { %3580 = sst [smem:[#allocation19_spill]] %s3012_s29  ;;  %s415_s19 = sadd.s32 1, %s3000_s26 }
  0x10   : > { %p46_p0 = scmp.ge.s32.totalorder %s44_s18, 2  ;;  %p425_p1 = scmp.ne.s32.totalorder %s3000_s26, %s2996_s25 }
  0x11   : > { %p426_p2 = scmp.eq.s32.totalorder %s2452_s0, 1  ;;  %p431_p3 = scmp.ne.s32.totalorder %s2996_s25, %s2992_s24 }
  0x12   : > { %s3611_s18 = smov (%p46_p0, %s44_s18), 0  ;;  %p432_p5 = scmp.eq.s32.totalorder %s2453_s30, 1 }
  0x13   : > { %3581 = sst [smem:[#allocation20_spill]] %s3611_s18  ;;  %p3156_p4 = por %p426_p2, %p425_p1 }
  0x14   : > { %s410_s20 = ssub.s32 %s3008_s28, %s3611_s18  ;;  %p2454_p6 = scmp.ge.s32.totalorder %s3012_s29, 1 }
  0x15   : > { %s3582_s1 = scalar_select %p3156_p4, 1, 0 }
  0x16   : > { %p413_p7 = scmp.eq.s32.totalorder %s410_s20, 0  ;;  %p3163_p8 = por %p432_p5, %p431_p3 }
  0x17   : > { %3583 = sst [smem:[#allocation21_spill]] %s3582_s1  ;;  %p439_p9 = scmp.lt.s32.totalorder %s3012_s29, 3 }
  0x18   : > { %s3584_s21 = scalar_select %p3163_p8, 1, 0 }
  0x19   : > { %s3169_s22 = scalar_select %p413_p7, %s3000_s26, %s415_s19  }
  0x1a   : > { %3585 = sst [smem:[#allocation22_spill]] %s3584_s21  ;;  %p3171_p10 = pnand %p2454_p6, %p439_p9 }
  0x1b   : > { %3586 = sst [smem:[#allocation23_spill]] %s3169_s22  ;;  %p3175_p11 = scmp.eq.s32.totalorder %s2452_s0, 0 }
  0x1c   : > { %s3587_s23 = scalar_select %p3171_p10, 1, 0 }
  0x1d   : > { %s3588_s24 = scalar_select %p3175_p11, 1, 0 }
  0x1e   : > { %p2714_p12 = pneg %p3171_p10  ;;  %s3014_s30 = smov [#allocation9]  }
  0x1f   : > { %s478_s20 = sshll.u32 %s3014_s30, 4  ;;  %s3015_s19 = smov [#allocation6]   ;;  %s479_s20 = int_to_ptr.vmem [resolvable:$true] %s478_s20 }
  0x20   : > { %p3183_p13 = pnand %p3175_p11, %p2714_p12  ;;  %s467_s28 = sshll.u32 %s3015_s19, 4  ;;  %s3187_s28 = int_to_ptr.vmem [resolvable:$true] %s467_s28 }
  0x21   : > { %s3590_s7 = sld [smem:[#allocation26_spill]] }
  0x22   : > { %p3197_p1 = pneg %p3183_p13 }
  0x27   : > { %s2842_s26 = scalar_lea.hbm %s3590_s7, 16 }
  0x28   : > { %p2843_p0 = scmp.ne.s32.totalorder %s3590_s7, %s2842_s26  ;;  %p2849_p5 = scmp.lt.u32.totalorder %s2842_s26, %s3590_s7 }
  0x2a   : > { %p2845_p2 = pnand %p3197_p1, %p2843_p0 }
  0x2c   : > { %p2846_p3 = pneg %p2845_p2 }
  0x2e   : > { %p2851_p6 = pnand %p2849_p5, %p2846_p3 }
  0x30   : > { %2854 = shalt.err (!%p2851_p6)
}
  0x31   : > { %s2855_s22 = scalar_lea.vmem %s479_s20, 16  ;;  %s2862_s29 = scalar_lea.vmem %s479_s20, 32 }
  0x32   : > { %p2856_p7 = scmp.ne.s32.totalorder %s479_s20, %s2855_s22  ;;  %p2863_p8 = scmp.lt.s32.totalorder %s479_s20, %s479_s20 }
  0x33   : > { %p2864_p4 = scmp.lt.s32.totalorder %s2862_s29, %s2855_s22 }
  0x34   : > { %p2858_p9 = pnand %p2856_p7, %p3197_p1 }
  0x35   : > { %p2865_p11 = por %p2864_p4, %p2863_p8 }
  0x36   : > { %p2859_p12 = pneg %p2858_p9 }
  0x38   : > { %p2866_p10 = pnand %p2865_p11, %p2859_p12 }
  0x3a   : > { %2869 = shalt.err (!%p2866_p10)
}
  0x3b   : > { %2720 = dma.hbm_to_vmem [thread:$0]  (!%p3183_p13), %s3590_s7, 16, %s479_s20, [#allocation10]  }
  0x3c   : > { %s2870_s19 = scalar_lea.hbm %s3546_s6, 16 }
  0x3d   : > { %p2871_p0 = scmp.ne.s32.totalorder %s3546_s6, %s2870_s19  ;;  %p2877_p8 = scmp.lt.u32.totalorder %s2870_s19, %s3546_s6 }
  0x3f   : > { %p2873_p2 = pnand %p2871_p0, %p3197_p1 }
  0x41   : > { %p2874_p4 = pneg %p2873_p2 }
  0x43   : > { %p2879_p10 = pnand %p2877_p8, %p2874_p4 }
  0x45   : > { %2882 = shalt.err (!%p2879_p10)
}
  0x46   : > { %s2883_s20 = scalar_lea.vmem %s3187_s28, 16  ;;  %s2890_s16 = scalar_lea.vmem %s3187_s28, 32 }
  0x47   : > { %p2884_p11 = scmp.ne.s32.totalorder %s3187_s28, %s2883_s20  ;;  %p2891_p6 = scmp.lt.s32.totalorder %s3187_s28, %s3187_s28 }
  0x48   : > { %p2892_p7 = scmp.lt.s32.totalorder %s2890_s16, %s2883_s20 }
  0x49   : > { %p2886_p3 = pnand %p2884_p11, %p3197_p1 }
  0x4a   : > { %p2893_p9 = por %p2892_p7, %p2891_p6 }
  0x4b   : > { %p2887_p5 = pneg %p2886_p3 }
  0x4d   : > { %p2894_p12 = pnand %p2893_p9, %p2887_p5 }
  0x4f   : > { %2897 = shalt.err (!%p2894_p12)
}
  0x50   : > { %2717 = dma.hbm_to_vmem [thread:$0]  (!%p3183_p13), %s3546_s6, 16, %s3187_s28, [#allocation7]  }
  0x51   : > { %s3016_s0 = smov [#allocation11]   ;;  %s2898_s22 = scalar_lea.hbm %s3548_s8, 16 }
  0x52   : > { %s489_s17 = sshll.u32 %s3016_s0, 4  ;;  %p2899_p0 = scmp.ne.s32.totalorder %s3548_s8, %s2898_s22  ;;  %s490_s17 = int_to_ptr.vmem [resolvable:$true] %s489_s17 }
  0x53   : > { %p2905_p8 = scmp.lt.u32.totalorder %s2898_s22, %s3548_s8 }
  0x54   : > { %p2901_p2 = pnand %p2899_p0, %p3197_p1 }
  0x56   : > { %p2902_p4 = pneg %p2901_p2 }
  0x58   : > { %p2907_p10 = pnand %p2905_p8, %p2902_p4 }
  0x5a   : > { %2910 = shalt.err (!%p2907_p10)
}
  0x5b   : > { %s2911_s28 = scalar_lea.vmem %s490_s17, 16  ;;  %s2918_s1 = scalar_lea.vmem %s490_s17, 32 }
  0x5c   : > { %p2912_p11 = scmp.ne.s32.totalorder %s490_s17, %s2911_s28  ;;  %p2919_p6 = scmp.lt.s32.totalorder %s490_s17, %s490_s17 }
  0x5d   : > { %p2920_p7 = scmp.lt.s32.totalorder %s2918_s1, %s2911_s28 }
  0x5e   : > { %p2914_p3 = pnand %p2912_p11, %p3197_p1 }
  0x5f   : > { %p2921_p9 = por %p2920_p7, %p2919_p6 }
  0x60   : > { %p2915_p5 = pneg %p2914_p3 }
  0x62   : > { %p2922_p12 = pnand %p2921_p9, %p2915_p5 }
  0x64   : > { %2925 = shalt.err (!%p2922_p12)
}
  0x65   : > { %2723 = dma.hbm_to_vmem [thread:$0]  (!%p3183_p13), %s3548_s8, 16, %s490_s17, [#allocation10]  }
  0x66   : > { %p3592_p0 = scmp.ne.s32.totalorder %s3587_s23, 0 }
  0x67   : > { %p3593_p2 = scmp.ne.s32.totalorder (!%p3592_p0), %s3588_s24, 0 }
  0x68   : > { %533 = sbr.rel (%p3592_p0) target bundleno = 2516 (0x9d4), region = 88 }
  0x6f   : > { %2979 = dma.done.wait (%p3593_p2), [#allocation7], 16  }
  0x70   : > { %2981 = vsyncadd (%p3593_p2), [#allocation7], 4294967280 }
  0x71   : > { %2983 = dma.done.wait (%p3593_p2), [#allocation10], 32  }
  0x72   : > { %2985 = vsyncadd (%p3593_p2), [#allocation10], 4294967264  ;;  %p592_p1 = scmp.lt.s32.totalorder %s3004_s27, 1  ;;  %s3594_s17 = sld [smem:[#allocation24_spill]]  ;;  %vm604_vm0 = vcmask 261120   ;;  %v2794_v7 = vld [vmem:[%s3544_s4] sm:$0xff]   ;;  %v890_v62 = vlaneseq }
  0x73   : > { %v3017_v8 = vmov 0.0   ;;  %vm3018_vm1 = vmmov 0   ;;  %v2795_v9 = vld [vmem:[%s3544_s4 + $0x8] sm:$0xff]   ;;  %s3595_s28 = sld [smem:[#allocation25_spill]]  ;;  %v2466_v16 = vld [vmem:[%s3542_s2] ss:$0 sm:$0xff] }
  0x74   : > { %s593_s7 = scalar_select %p592_p1, %s3004_s27, 1  ;;  %2592 = vmatprep.subr.bf16.mxu0 %v3017_v8  ;;  %2596 = vmatprep.mubr.msk.bf16.mxu0 %vm3018_vm1, %v3017_v8  ;;  %vm634_vm2 = vcmask 257024   ;;  %v2796_v19 = vld [vmem:[%s3545_s5] sm:$0xff]   ;;  %v2797_v21 = vld [vmem:[%s3545_s5 + $0x8] sm:$0xff]   ;;  %vm767_vm3 = vcmask 60416   ;;  %vm1032_vm4 = vcmask 64512  }
  0x75   : > { %2593 = vmatpush3.bf16.msra.mxu0 %v2794_v7  ;;  %2616 = vmatprep.subr.bf16.mxu1 %v3017_v8  ;;  %v2798_v22 = vld [vmem:[%s3543_s3] sm:$0xff]   ;;  %v2799_v23 = vld [vmem:[%s3543_s3 + $0x8] sm:$0xff]   ;;  %s3019_s19 = smov 104   ;;  %s3020_s22 = smov 120   ;;  %vm1100_vm5 = vcmask 1043456   ;;  %v891_v63 = vand.u32 127, %v890_v62 }
  0x76   : > { %s2464_s18 = sshll.u32 %s593_s7, 3  ;;  %2594 = vmatprep.subr.bf16.mxu0 %v3017_v8  ;;  %2618 = vmatprep.mubr.msk.bf16.mxu1 %vm3018_vm1, %v3017_v8  ;;  %v2467_v25 = vld [vmem:[#allocation9] ss:$0 sm:$0xff]  ;;  %v2471_v32 = vld [vmem:[#allocation11] ss:$0 sm:$0xff]  ;;  %s3021_s29 = smov 112  }
  0x77   : > { %v2477_v41 = vld [vmem:[#allocation6] ss:$0 sm:$0xff]  ;;  %s3022_s20 = smov 8   ;;  %s3023_s0 = smov 16   ;;  %vm1412_vm7 = vcmask 126016   ;;  %vm1674_vm8 = vcmask 191616  }
  0x78   : > { %s595_s26 = scalar_lea.vmem %s3594_s17, %s2464_s18  ;;  %s3024_s7 = smov 24   ;;  %vm1936_vm9 = vcmask 257216  }
  0x79   : > { %v3270_v0 = vld [vmem:[%s595_s26] sm:$0xff]  ;;  %2595 = vmatpush3.bf16.msra.mxu0 %v2795_v9  ;;  %s589_s1 = sand.u32 1, %s2996_s25   ;;  %s3596_s18 = sld [smem:[#allocation27_spill]] }
  0x7a   : > { %v605_v1 = vsel %vm604_vm0, %v3270_v0, 0.0  ;;  %2600 = vmatprep.subr.bf16.mxu0 %v3017_v8  ;;  %v2465_v14 = vld [vmem:[%s3595_s28] ss:$0 sm:$0xff]  ;;  %s2463_s21 = sshll.u32 %s589_s1, 3  ;;  %s3597_s30 = sld [smem:[#allocation21_spill]] }
  0x7b   : > { %606 = vadd.xlane.f32.xlu0 %v605_v1  ;;  %v893_v1 = vshrl.u32 %v890_v62, 7  ;;  %s2544_s23 = sshll.u32 %s3004_s27, 7  ;;  %s591_s17 = scalar_lea.vmem [#allocation12], %s2463_s21 }
  0x7c   : > { %s2243_s26 = sshll.u32 %s591_s17, 4  ;;  %s2229_s27 = scalar_lea.sflag [#allocation8], %s589_s1  ;;  %s3494_s26 = int_to_ptr.vmem [resolvable:$true] %s2243_s26 }
  0x7d   : > { %vm894_vm6 = vcmp.le.s32.totalorder %v891_v63, %v893_v1  ;;  %s3025_s16 = smov [#allocation12]  }
  0x7e   : > { %s2930_s28 = sshll.u32 %s3025_s16, 4  ;;  %s2931_s28 = int_to_ptr.vmem [resolvable:$false] %s2930_s28 }
  0x7f   : > { %s2932_s21 = scalar_lea.vmem %s2931_s28, 256  ;;  %p2933_p11 = scmp.lt.s32.totalorder %s3494_s26, %s2931_s28 }
  0x80   : > { %p3599_p4 = scmp.ne.s32.totalorder %s3597_s30, 0 }
 0x108   : > { %v607_v2 = vpop.xlane.xlu0 %606 }
 0x109   : > { %v609_v3 = vmul.f32 0.03125, %v607_v2 }
 0x10b   : > { %v610_v4 = vsub.f32 %v3270_v0, %v609_v3 }
 0x10d   : > { %v611_v5 = vmul.f32 %v610_v4, %v610_v4 }
 0x10f   : > { %v612_v6 = vsel %vm604_vm0, %v611_v5, 0.0 }
 0x110   : > { %613 = vadd.xlane.f32.xlu0 %v612_v6 }
 0x19d   : > { %v614_v10 = vpop.xlane.xlu0 %613 }
 0x19e   : > { %v615_v11 = vmul.f32 0.03125, %v614_v10 }
 0x1a0   : > { %v616_v12 = vadd.f32 1e-05, %v615_v11 }
 0x1a2   : > { %2812 = vrsqrt.f32 %v616_v12 }
 0x1ac   : > { %v2813_v13 = vpop.eup %2812 }
 0x1ad   : > { %v618_v15 = vmul.f32 %v2813_v13, %v610_v4 }
 0x1af   : > { %v625_v17 = vmul.f32 %v2465_v14, %v618_v15 }
 0x1b1   : > { %v632_v18 = vadd.f32 %v2466_v16, %v625_v17 }
 0x1b3   : > { %v633_v20 = vpack.c.bf16 %v632_v18, %v632_v18 }
 0x1b5   : > { %635 = vst.msk [vmem:[#allocation4] sm:$0xf] %vm634_vm2, %v633_v20  ;;  %2597 = vmatmul.mubr.msk.bf16.vlgmr.msra.gmra.mrb[0].mxu0 %vm604_vm0, %v633_v20 }
 0x1b6   : > { %2601 = vmatpush3.bf16.msra.mxu0 %v2796_v19  ;;  %2604 = vmatprep.mubr.msk.bf16.mxu0 %vm3018_vm1, %v3017_v8 }
 0x1b7   : > { %2602 = vmatprep.subr.bf16.mxu0 %v3017_v8 }
 0x1ba   : > { %2603 = vmatpush3.bf16.msra.mxu0 %v2797_v21 }
 0x1bb   : > { %2608 = vmatprep.subr.bf16.mxu0 %v3017_v8 }
 0x1bc   : > { %v822_v24 = vld [vmem:[#allocation4] sm:$0xf] }
 0x1bd   : > { %2605 = vmatmul.mubr.msk.bf16.vlgmr.msra.gmra.mrb[4].mxu0 %vm604_vm0, %v633_v20 }
 0x1be   : > { %2609 = vmatpush3.bf16.msra.mxu0 %v2798_v22  ;;  %2612 = vmatprep.mubr.msk.bf16.mxu0 %vm3018_vm1, %v3017_v8 }
 0x1bf   : > { %2610 = vmatprep.subr.bf16.mxu0 %v3017_v8 }
 0x1c2   : > { %2611 = vmatpush3.bf16.msra.mxu0 %v2799_v23 }
 0x1c3   : > { %2622 = vmatprep.subr.bf16.mxu0 %v3017_v8 }
 0x1c5   : > { %2613 = vmatmul.mubr.msk.bf16.vlgmr.msra.gmra.mrb[8].mxu0 %vm604_vm0, %v822_v24 }
 0x1c6   : > { %2624 = vmatprep.mubr.msk.bf16.mxu0 %vm3018_vm1, %v3017_v8 }
 0x288   : > { %v696_v26 = vpop.f32.mrb[0].mxu0 }
 0x289   : > { %v697_v27 = vadd.f32 %v2467_v25, %v696_v26  ;;  %v2598_v28 = vpop.f32.mrb[1].mxu0 }
 0x28a   : > { %v699_v29 = vpop.f32.mrb[2].mxu0 }
 0x28b   : > { %v702_v30 = vpack.c.bf16 %v697_v27, %v697_v27  ;;  %v2599_v31 = vpop.f32.mrb[3].mxu0 }
 0x28d   : > { %768 = vst.msk [vmem:[#allocation2] sm:$0xf] %vm767_vm3, %v702_v30  ;;  %802 = vrot.lane.b32.xlu0 %v702_v30, %s3019_s19  ;;  %773 = vrot.lane.b32.xlu1 %v702_v30, %s3020_s22 }
 0x290   : > { %v760_v33 = vpop.f32.mrb[4].mxu0 }
 0x291   : > { %v761_v34 = vadd.f32 %v2471_v32, %v760_v33  ;;  %789 = vrot.lane.b32.xlu1 %v702_v30, %s3021_s29  ;;  %v2606_v35 = vpop.f32.mrb[5].mxu0 }
 0x292   : > { %v763_v36 = vpop.f32.mrb[6].mxu0 }
 0x293   : > { %v3325_v37 = vpack.c.bf16 %v761_v34, %v761_v34  ;;  %v2607_v38 = vpop.f32.mrb[7].mxu0 }
 0x294   : > { %v1028_v39 = vld [vmem:[#allocation2] sm:$0xf] }
 0x295   : > { %769 = vst.msk [vmem:[#allocation3] sm:$0xf] %vm767_vm3, %v3325_v37  ;;  %v1037_v40 = vsel %vm1032_vm4, %v1028_v39, 0 }
 0x296   : > { %2617 = vmatpush3.bf16.xpose.msra.mxu1 %v1037_v40 }
 0x297   : > { %2628 = vmatprep.subr.bf16.mxu1 %v3017_v8 }
 0x298   : > { %v884_v42 = vpop.f32.mrb[8].mxu0 }
 0x299   : > { %v885_v43 = vadd.f32 %v2477_v41, %v884_v42  ;;  %v2614_v44 = vpop.f32.mrb[9].mxu0 }
 0x29a   : > { %v887_v45 = vpop.f32.mrb[10].mxu0 }
 0x29b   : > { %v895_v46 = vpack.c.bf16 %v885_v43, %v885_v43  ;;  %v2615_v47 = vpop.f32.mrb[11].mxu0 }
 0x29c   : > { %v1031_v48 = vld [vmem:[#allocation3] sm:$0xf] }
 0x29d   : > { %1290 = vrot.lane.b32.xlu1 %v895_v46, %s3020_s22  ;;  %2619 = vmatmul.mubr.msk.bf16.vlgmr.msra.gmra.mrb[0].mxu1 %vm1032_vm4, %v895_v46  ;;  %v1102_v49 = vsel %vm1100_vm5, %v1031_v48, 0 }
 0x29e   : > { %2623 = vmatpush3.bf16.msra.mxu0 %v1102_v49  ;;  %2630 = vmatprep.mubr.msk.bf16.mxu1 %vm3018_vm1, %v3017_v8 }
 0x29f   : > { %2634 = vmatprep.subr.bf16.mxu0 %v3017_v8 }
 0x2a1   : > { %1552 = vrot.lane.b32.xlu1 %v895_v46, %s3021_s29 }
 0x2a5   : > { %1814 = vrot.lane.b32.xlu1 %v895_v46, %s3019_s19 }
 0x2ff   : > { %v803_v50 = vpop.permute.xlu0 %802  ;;  %v774_v51 = vpop.permute.xlu1 %773 }
 0x300   : > { %808 = vst.msk [vmem:[#allocation2 + $0xc] sm:$0xf] %vm767_vm3, %v803_v50  ;;  %779 = vst.msk [vmem:[#allocation2 + $0x4] sm:$0xf] %vm767_vm3, %v774_v51 }
 0x303   : > { %v790_v52 = vpop.permute.xlu1 %789 }
 0x304   : > { %795 = vst.msk [vmem:[#allocation2 + $0x8] sm:$0xf] %vm767_vm3, %v790_v52 }
 0x307   : > { %v2495_v53 = vld [vmem:[#allocation2 + $0x4] sm:$0xf]  ;;  %v2519_v58 = vld [vmem:[#allocation2 + $0xc] sm:$0xf] }
 0x308   : > { %v1296_v54 = vsel %vm1032_vm4, %v2495_v53, 0  ;;  %v1820_v60 = vsel %vm1032_vm4, %v2519_v58, 0 }
 0x309   : > { %2629 = vmatpush3.bf16.xpose.msra.mxu1 %v1296_v54 }
 0x30a   : > { %2640 = vmatprep.subr.bf16.mxu1 %v3017_v8 }
 0x30b   : > { %v2507_v55 = vld [vmem:[#allocation2 + $0x8] sm:$0xf] }
 0x30c   : > { %v1558_v57 = vsel %vm1032_vm4, %v2507_v55, 0 }
 0x30f   : > { %v1291_v56 = vpop.permute.xlu1 %1290 }
 0x310   : > { %2631 = vmatmul.mubr.msk.bf16.vlgmr.msra.gmra.mrb[4].mxu1 %vm1032_vm4, %v1291_v56 }
 0x311   : > { %2641 = vmatpush3.bf16.xpose.msra.mxu1 %v1558_v57  ;;  %2642 = vmatprep.mubr.msk.bf16.mxu1 %vm3018_vm1, %v3017_v8 }
 0x312   : > { %2652 = vmatprep.subr.bf16.mxu1 %v3017_v8 }
 0x313   : > { %v1553_v59 = vpop.permute.xlu1 %1552 }
 0x317   : > { %v1815_v61 = vpop.permute.xlu1 %1814 }
 0x318   : > { %2643 = vmatmul.mubr.msk.bf16.vlgmr.msra.gmra.mrb[8].mxu1 %vm1032_vm4, %v1553_v59 }
 0x319   : > { %2653 = vmatpush3.bf16.xpose.msra.mxu1 %v1820_v60  ;;  %2654 = vmatprep.mubr.msk.bf16.mxu1 %vm3018_vm1, %v3017_v8 }
 0x31a   : > { %2664 = vmatprep.subr.bf16.mxu1 %v3017_v8 }
 0x320   : > { %2655 = vmatmul.mubr.msk.bf16.vlgmr.msra.gmra.mrb[12].mxu1 %vm1032_vm4, %v1815_v61 }
 0x321   : > { %2668 = vmatprep.mubr.msk.bf16.mxu1 %vm3018_vm1, %v3017_v8 }
 0x370   : > { %v1073_v2 = vpop.f32.mrb[0].mxu1 }
 0x371   : > { %v1079_v3 = vsel %vm894_vm6, %v1073_v2, -1e+30  ;;  %v2620_v4 = vpop.f32.mrb[1].mxu1 }
 0x372   : > { %v1076_v5 = vpop.f32.mrb[2].mxu1  ;;  %v1080_v6 = vsel %vm1032_vm4, %v1079_v3, -inf }
 0x373   : > { %1081 = vmax.xlane.f32.xlu1 %v1080_v6  ;;  %v2621_v7 = vpop.f32.mrb[3].mxu1 }
 0x384   : > { %796 = vrot.lane.b32.xlu1 %v3325_v37, %s3021_s29 }
 0x3e3   : > { %v1332_v9 = vpop.f32.mrb[4].mxu1 }
 0x3e4   : > { %v1338_v10 = vsel %vm894_vm6, %v1332_v9, -1e+30  ;;  %v2632_v11 = vpop.f32.mrb[5].mxu1 }
 0x3e5   : > { %v1335_v12 = vpop.f32.mrb[6].mxu1  ;;  %v1339_v13 = vsel %vm1032_vm4, %v1338_v10, -inf }
 0x3e6   : > { %1340 = vmax.xlane.f32.xlu0 %v1339_v13  ;;  %v2633_v14 = vpop.f32.mrb[7].mxu1 }
 0x3eb   : > { %v1594_v15 = vpop.f32.mrb[8].mxu1 }
 0x3ec   : > { %v1600_v16 = vsel %vm894_vm6, %v1594_v15, -1e+30  ;;  %v2644_v17 = vpop.f32.mrb[9].mxu1 }
 0x3ed   : > { %v1597_v18 = vpop.f32.mrb[10].mxu1  ;;  %v1601_v19 = vsel %vm1032_vm4, %v1600_v16, -inf }
 0x3ee   : > { %1602 = vmax.xlane.f32.xlu1 %v1601_v19  ;;  %v2645_v20 = vpop.f32.mrb[11].mxu1 }
 0x3f3   : > { %v1856_v21 = vpop.f32.mrb[12].mxu1 }
 0x3f4   : > { %v1862_v22 = vsel %vm894_vm6, %v1856_v21, -1e+30  ;;  %v2656_v23 = vpop.f32.mrb[13].mxu1 }
 0x3f5   : > { %v1859_v24 = vpop.f32.mrb[14].mxu1  ;;  %v1863_v25 = vsel %vm1032_vm4, %v1862_v22, -inf }
 0x3f6   : > { %1864 = vmax.xlane.f32.xlu1 %v1863_v25  ;;  %v2657_v26 = vpop.f32.mrb[15].mxu1 }
 0x3fc   : > { %783 = vrot.lane.b32.xlu0 %v3325_v37, %s3020_s22  ;;  %s3598_s22 = sld [smem:[#allocation28_spill]] }
 0x400   : > { %v3369_v27 = vpop.xlane.xlu1 %1081 }
 0x401   : > { %v1083_v28 = vmax.f32 %v3369_v27, -1e+30 }
 0x402   : > { %s3492_s29 = scalar_lea.hbm %s3598_s22, %s2544_s23 }
 0x403   : > { %v1087_v29 = vsub.f32 %v1079_v3, %v1083_v28  ;;  %v1084_v1 = vsub.f32 -1e+30, %v1083_v28 }
 0x404   : > { %v797_v30 = vpop.permute.xlu1 %796 }
 0x405   : > { %v1088_v31 = vmul.f32 1.442695, %v1087_v29  ;;  %801 = vst.msk [vmem:[#allocation3 + $0x8] sm:$0xf] %vm767_vm3, %v797_v30  ;;  %v1085_v2 = vmul.f32 1.442695, %v1084_v1 }
 0x407   : > { %809 = vrot.lane.b32.xlu1 %v3325_v37, %s3019_s19  ;;  %2814 = vpow2.f32 %v1088_v31 }
 0x40c   : > { %v2508_v48 = vld [vmem:[#allocation3 + $0x8] sm:$0xf] }
 0x40d   : > { %v1622_v54 = vsel %vm1100_vm5, %v2508_v48, 0 }
 0x411   : > { %v2815_v32 = vpop.eup %2814 }
 0x412   : > { %v1096_v33 = vpack.c.bf16 %v2815_v32, %v2815_v32  ;;  %v1091_v63 = vsel %vm1032_vm4, %v2815_v32, 0.0 }
 0x414   : > { %2625 = vmatmul.mubr.msk.bf16.vlgmr.msra.gmra.mrb[12].mxu0 %vm1032_vm4, %v1096_v33 }
 0x415   : > { %2636 = vmatprep.mubr.msk.bf16.mxu0 %vm3018_vm1, %v3017_v8 }
 0x473   : > { %v3378_v34 = vpop.xlane.xlu0 %1340 }
 0x474   : > { %v1342_v35 = vmax.f32 %v3378_v34, -1e+30 }
 0x476   : > { %v1346_v36 = vsub.f32 %v1338_v10, %v1342_v35  ;;  %v1343_v17 = vsub.f32 -1e+30, %v1342_v35 }
 0x477   : > { %v784_v38 = vpop.permute.xlu0 %783 }
 0x478   : > { %v1347_v39 = vmul.f32 1.442695, %v1346_v36  ;;  %788 = vst.msk [vmem:[#allocation3 + $0x4] sm:$0xf] %vm767_vm3, %v784_v38  ;;  %v1344_v19 = vmul.f32 1.442695, %v1343_v17 }
 0x47a   : > { %2816 = vpow2.f32 %v1347_v39 }
 0x47b   : > { %v3384_v37 = vpop.xlane.xlu1 %1602 }
 0x47c   : > { %v1604_v40 = vmax.f32 %v3384_v37, -1e+30 }
 0x47e   : > { %v1608_v41 = vsub.f32 %v1600_v16, %v1604_v40  ;;  %v1605_v20 = vsub.f32 -1e+30, %v1604_v40 }
 0x47f   : > { %v2496_v42 = vld [vmem:[#allocation3 + $0x4] sm:$0xf] }
 0x480   : > { %v1609_v43 = vmul.f32 1.442695, %v1608_v41  ;;  %v1360_v44 = vsel %vm1100_vm5, %v2496_v42, 0  ;;  %v1606_v21 = vmul.f32 1.442695, %v1605_v20 }
 0x481   : > { %2635 = vmatpush3.bf16.msra.mxu0 %v1360_v44 }
 0x482   : > { %2646 = vmatprep.subr.bf16.mxu0 %v3017_v8  ;;  %2818 = vpow2.f32 %v1609_v43 }
 0x483   : > { %v1865_v45 = vpop.xlane.xlu1 %1864 }
 0x484   : > { %v1866_v46 = vmax.f32 %v1865_v45, -1e+30  ;;  %v2817_v47 = vpop.eup %2816 }
 0x485   : > { %v1350_v50 = vsel %vm1032_vm4, %v2817_v47, 0.0  ;;  %v1355_v51 = vpack.c.bf16 %v2817_v47, %v2817_v47  ;;  %v2800_v47 = vld [vmem:[%s3549_s9] sm:$0xff]  }
 0x486   : > { %v1870_v49 = vsub.f32 %v1862_v22, %v1866_v46  ;;  %1351 = vadd.xlane.f32.xlu0 %v1350_v50  ;;  %v1867_v22 = vsub.f32 -1e+30, %v1866_v46  ;;  %2665 = vmatpush3.bf16.msra.mxu1 %v2800_v47  ;;  %v2801_v50 = vld [vmem:[%s3549_s9 + $0x8] sm:$0xff]  }
 0x487   : > { %v810_v52 = vpop.permute.xlu1 %809  ;;  %2637 = vmatmul.mubr.msk.bf16.vlgmr.msra.gmra.mrb[16].mxu0 %vm1032_vm4, %v1355_v51  ;;  %2666 = vmatprep.subr.bf16.mxu1 %v3017_v8 }
 0x488   : > { %v1871_v53 = vmul.f32 1.442695, %v1870_v49  ;;  %814 = vst.msk [vmem:[#allocation3 + $0xc] sm:$0xf] %vm767_vm3, %v810_v52  ;;  %2647 = vmatpush3.bf16.msra.mxu0 %v1622_v54  ;;  %2648 = vmatprep.mubr.msk.bf16.mxu0 %vm3018_vm1, %v3017_v8  ;;  %v1868_v24 = vmul.f32 1.442695, %v1867_v22 }
 0x489   : > { %2658 = vmatprep.subr.bf16.mxu0 %v3017_v8 }
 0x48a   : > { %2820 = vpow2.f32 %v1871_v53  ;;  %2667 = vmatpush3.bf16.msra.mxu1 %v2801_v50 }
 0x48b   : > { %2822 = vpow2.f32 %v1085_v2  ;;  %2680 = vmatprep.subr.bf16.mxu1 %v3017_v8  ;;  %v2527_v2 = vld [vmem:[%s3550_s10] ss:$0 sm:$0xff] }
 0x48c   : > { %v2819_v55 = vpop.eup %2818 }
 0x48d   : > { %v1612_v56 = vsel %vm1032_vm4, %v2819_v55, 0.0  ;;  %v1617_v57 = vpack.c.bf16 %v2819_v55, %v2819_v55 }
 0x48e   : > { %1613 = vadd.xlane.f32.xlu1 %v1612_v56 }
 0x48f   : > { %v2520_v58 = vld [vmem:[#allocation3 + $0xc] sm:$0xf]  ;;  %2649 = vmatmul.mubr.msk.bf16.vlgmr.msra.gmra.mrb[20].mxu0 %vm1032_vm4, %v1617_v57 }
 0x490   : > { %v1884_v59 = vsel %vm1100_vm5, %v2520_v58, 0  ;;  %2660 = vmatprep.mubr.msk.bf16.mxu0 %vm3018_vm1, %v3017_v8 }
 0x491   : > { %2659 = vmatpush3.bf16.msra.mxu0 %v1884_v59 }
 0x492   : > { %2672 = vmatprep.subr.bf16.mxu0 %v3017_v8 }
 0x494   : > { %v2821_v60 = vpop.eup %2820 }
 0x495   : > { %v1874_v61 = vsel %vm1032_vm4, %v2821_v60, 0.0  ;;  %v1879_v62 = vpack.c.bf16 %v2821_v60, %v2821_v60  ;;  %v2823_v3 = vpop.eup %2822 }
 0x496   : > { %1875 = vadd.xlane.f32.xlu0 %v1874_v61  ;;  %v1090_v4 = vmul.f32 0.0, %v2823_v3 }
 0x497   : > { %2661 = vmatmul.mubr.msk.bf16.vlgmr.msra.gmra.mrb[24].mxu0 %vm1032_vm4, %v1879_v62 }
 0x498   : > { %2676 = vmatprep.mubr.msk.bf16.mxu0 %vm3018_vm1, %v3017_v8 }
 0x49a   : > { %1092 = vadd.xlane.f32.xlu0 %v1091_v63 }
 0x4e7   : > { %v1138_v5 = vpop.f32.mrb[12].mxu0 }
 0x4e8   : > { %v1144_v6 = vadd.f32 %v1138_v5, %v1090_v4  ;;  %v2626_v7 = vpop.f32.mrb[13].mxu0 }
 0x4e9   : > { %v1141_v9 = vpop.f32.mrb[14].mxu0 }
 0x4ea   : > { %v2627_v10 = vpop.f32.mrb[15].mxu0 }
 0x513   : > { %v1352_v11 = vpop.xlane.xlu0 %1351 }
 0x51b   : > { %v1614_v28 = vpop.xlane.xlu1 %1613 }
 0x523   : > { %v1876_v12 = vpop.xlane.xlu0 %1875 }
 0x527   : > { %v1093_v13 = vpop.xlane.xlu0 %1092 }
 0x528   : > { %v1094_v14 = vadd.f32 %v1093_v13, %v1090_v4 }
 0x52a   : > { %2824 = vrcp.f32 %v1094_v14 }
 0x52b   : > { %2826 = vpow2.f32 %v1344_v19 }
 0x52c   : > { %2828 = vpow2.f32 %v1606_v21  ;;  %v2528_v21 = vld [vmem:[%s3551_s11] ss:$0 sm:$0xff] }
 0x52d   : > { %2830 = vpow2.f32 %v1868_v24 }
 0x534   : > { %v2825_v15 = vpop.eup %2824 }
 0x535   : > { %v1146_v16 = vmul.f32 %v2825_v15, %v1144_v6  ;;  %v2827_v23 = vpop.eup %2826  ;;  %v2803_v15 = vld [vmem:[%s3553_s13 + $0x8] sm:$0xff]  }
 0x536   : > { %v1349_v25 = vmul.f32 0.0, %v2827_v23  ;;  %v2829_v27 = vpop.eup %2828  ;;  %v2529_v23 = vld [vmem:[%s3552_s12] ss:$0 sm:$0xff] }
 0x537   : > { %v1147_v18 = vpack.c.bf16 %v1146_v16, %v1146_v16  ;;  %v1611_v29 = vmul.f32 0.0, %v2829_v27  ;;  %v2831_v31 = vpop.eup %2830  ;;  %v2804_v16 = vld [vmem:[%s3555_s15] sm:$0xff]   ;;  %v2805_v27 = vld [vmem:[%s3555_s15 + $0x8] sm:$0xff]  }
 0x538   : > { %v1353_v26 = vadd.f32 %v1352_v11, %v1349_v25  ;;  %v1873_v36 = vmul.f32 0.0, %v2831_v31  ;;  %v2809_v31 = vld [vmem:[%s3555_s15 + $0x28] sm:$0xff]  }
 0x539   : > { %1149 = vst.msk [vmem:[#allocation5] sm:$0xf] %vm767_vm3, %v1147_v18  ;;  %v1615_v30 = vadd.f32 %v1614_v28, %v1611_v29  ;;  %v2806_v28 = vld [vmem:[%s3555_s15 + $0x10] sm:$0xff]  }
 0x53a   : > { %2832 = vrcp.f32 %v1353_v26  ;;  %v1877_v40 = vadd.f32 %v1876_v12, %v1873_v36 }
 0x53b   : > { %2834 = vrcp.f32 %v1615_v30  ;;  %v2808_v30 = vld [vmem:[%s3555_s15 + $0x20] sm:$0xff]  }
 0x53c   : > { %2836 = vrcp.f32 %v1877_v40 }
 0x544   : > { %v2833_v35 = vpop.eup %2832 }
 0x545   : > { %v2835_v45 = vpop.eup %2834 }
 0x546   : > { %v2837_v55 = vpop.eup %2836 }
 0x55a   : > { %v1396_v32 = vpop.f32.mrb[16].mxu0 }
 0x55b   : > { %v1402_v33 = vadd.f32 %v1396_v32, %v1349_v25  ;;  %v2638_v34 = vpop.f32.mrb[17].mxu0  ;;  %v2810_v32 = vld [vmem:[%s3555_s15 + $0x30] sm:$0xff]  }
 0x55c   : > { %v1399_v38 = vpop.f32.mrb[18].mxu0  ;;  %v2531_v34 = vld [vmem:[%s3554_s14] ss:$0 sm:$0xff] }
 0x55d   : > { %v1404_v39 = vmul.f32 %v2833_v35, %v1402_v33  ;;  %v2639_v37 = vpop.f32.mrb[19].mxu0  ;;  %v2811_v33 = vld [vmem:[%s3555_s15 + $0x38] sm:$0xff]  }
 0x55f   : > { %v2549_v41 = vpack.c.bf16 %v1404_v39, %v1404_v39 }
 0x561   : > { %1409 = vrot.lane.b32.xlu1 %v2549_v41, %s3022_s20  ;;  %s2926_s20 = scalar_lea.vmem %s3494_s26, 128 }
 0x562   : > { %v1658_v42 = vpop.f32.mrb[20].mxu0  ;;  %p2927_p13 = scmp.ne.s32.totalorder %s3494_s26, %s2926_s20  ;;  %p2934_p3 = scmp.lt.s32.totalorder %s2932_s21, %s2926_s20 }
 0x563   : > { %v1664_v43 = vadd.f32 %v1658_v42, %v1611_v29  ;;  %v2650_v44 = vpop.f32.mrb[21].mxu0  ;;  %v2807_v29 = vld [vmem:[%s3555_s15 + $0x18] sm:$0xff]  }
 0x564   : > { %v1661_v46 = vpop.f32.mrb[22].mxu0  ;;  %p2928_p8 = pnand %p2927_p13, %p3599_p4  ;;  %p2935_p5 = por %p2934_p3, %p2933_p11 }
 0x565   : > { %v1666_v48 = vmul.f32 %v2835_v45, %v1664_v43  ;;  %v2651_v49 = vpop.f32.mrb[23].mxu0 }
 0x566   : > { %v2530_v49 = vld [vmem:[%s3596_s18] ss:$0 sm:$0xff]  ;;  %p2929_p10 = pneg %p2928_p8 }
 0x567   : > { %v2550_v51 = vpack.c.bf16 %v1666_v48, %v1666_v48 }
 0x568   : > { %p2936_p6 = pnand %p2935_p5, %p2929_p10 }
 0x569   : > { %1671 = vrot.lane.b32.xlu0 %v2550_v51, %s3023_s0 }
 0x56a   : > { %v1920_v52 = vpop.f32.mrb[24].mxu0 }
 0x56b   : > { %v1926_v53 = vadd.f32 %v1920_v52, %v1873_v36  ;;  %v2662_v54 = vpop.f32.mrb[25].mxu0 }
 0x56c   : > { %v1923_v56 = vpop.f32.mrb[26].mxu0 }
 0x56d   : > { %v1928_v57 = vmul.f32 %v2837_v55, %v1926_v53  ;;  %v2663_v58 = vpop.f32.mrb[27].mxu0 }
 0x56f   : > { %v2551_v59 = vpack.c.bf16 %v1928_v57, %v1928_v57 }
 0x571   : > { %1933 = vrot.lane.b32.xlu1 %v2551_v59, %s3024_s7 }
 0x5d3   : > { %v1410_v60 = vpop.permute.xlu1 %1409 }
 0x5d4   : > { %1413 = vst.msk [vmem:[#allocation5] sm:$0xf] %vm1412_vm7, %v1410_v60 }
 0x5db   : > { %v1672_v61 = vpop.permute.xlu0 %1671 }
 0x5dc   : > { %1675 = vst.msk [vmem:[#allocation5] sm:$0xf] %vm1674_vm8, %v1672_v61 }
 0x5e3   : > { %v1934_v62 = vpop.permute.xlu1 %1933 }
 0x5e4   : > { %1937 = vst.msk [vmem:[#allocation5] sm:$0xf] %vm1936_vm9, %v1934_v62 }
 0x5eb   : > { %v1938_v63 = vld [vmem:[#allocation5] sm:$0xf] }
 0x5ec   : > { %2669 = vmatmul.mubr.msk.bf16.vlgmr.msra.gmra.mrb[16].mxu1 %vm604_vm0, %v1938_v63 }
 0x5ed   : > { %2696 = vmatprep.mubr.msk.bf16.mxu1 %vm3018_vm1, %v3017_v8  ;;  %2681 = vmatpush3.bf16.msra.mxu1 %v2804_v16 }
 0x5ee   : > { %2682 = vmatprep.subr.bf16.mxu1 %v3017_v8 }
 0x5f1   : > { %2683 = vmatpush3.bf16.msra.mxu1 %v2805_v27 }
 0x5f2   : > { %2684 = vmatprep.subr.bf16.mxu1 %v3017_v8 }
 0x5f5   : > { %2685 = vmatpush3.bf16.msra.mxu1 %v2806_v28 }
 0x5f6   : > { %2686 = vmatprep.subr.bf16.mxu1 %v3017_v8 }
 0x5f9   : > { %2687 = vmatpush3.bf16.msra.mxu1 %v2807_v29 }
 0x5fa   : > { %2688 = vmatprep.subr.bf16.mxu1 %v3017_v8 }
 0x5fd   : > { %2689 = vmatpush3.bf16.msra.mxu1 %v2808_v30 }
 0x5fe   : > { %2690 = vmatprep.subr.bf16.mxu1 %v3017_v8 }
 0x601   : > { %2691 = vmatpush3.bf16.msra.mxu1 %v2809_v31 }
 0x602   : > { %2692 = vmatprep.subr.bf16.mxu1 %v3017_v8 }
 0x605   : > { %2693 = vmatpush3.bf16.msra.mxu1 %v2810_v32 }
 0x606   : > { %2694 = vmatprep.subr.bf16.mxu1 %v3017_v8 }
 0x609   : > { %2695 = vmatpush3.bf16.msra.mxu1 %v2811_v33 }
 0x6bf   : > { %v1992_v1 = vpop.f32.mrb[16].mxu1 }
 0x6c0   : > { %v1998_v3 = vadd.f32 %v1992_v1, %v3270_v0  ;;  %v2670_v4 = vpop.f32.mrb[17].mxu1  ;;  %v2802_v0 = vld [vmem:[%s3553_s13] sm:$0xff]  }
 0x6c1   : > { %v1995_v5 = vpop.f32.mrb[18].mxu1  ;;  %2673 = vmatpush3.bf16.msra.mxu0 %v2802_v0 }
 0x6c2   : > { %v3429_v6 = vadd.f32 %v2527_v2, %v1998_v3  ;;  %v2671_v7 = vpop.f32.mrb[19].mxu1  ;;  %2674 = vmatprep.subr.bf16.mxu0 %v3017_v8 }
 0x6c4   : > { %v2009_v9 = vsel %vm604_vm0, %v3429_v6, 0.0  ;;  %v2045_v50 = vadd.f32 %v2530_v49, %v3429_v6 }
 0x6c5   : > { %2010 = vadd.xlane.f32.xlu1 %v2009_v9  ;;  %2675 = vmatpush3.bf16.msra.mxu0 %v2803_v15 }
 0x752   : > { %v2011_v10 = vpop.xlane.xlu1 %2010 }
 0x753   : > { %v2013_v11 = vmul.f32 0.03125, %v2011_v10 }
 0x755   : > { %v2014_v12 = vsub.f32 %v3429_v6, %v2013_v11 }
 0x757   : > { %v2015_v13 = vmul.f32 %v2014_v12, %v2014_v12 }
 0x759   : > { %v2016_v14 = vsel %vm604_vm0, %v2015_v13, 0.0 }
 0x75a   : > { %2017 = vadd.xlane.f32.xlu0 %v2016_v14 }
 0x7e7   : > { %v2018_v17 = vpop.xlane.xlu0 %2017 }
 0x7e8   : > { %v2019_v18 = vmul.f32 0.03125, %v2018_v17 }
 0x7ea   : > { %v2020_v19 = vadd.f32 1e-05, %v2019_v18 }
 0x7ec   : > { %2838 = vrsqrt.f32 %v2020_v19 }
 0x7f6   : > { %v2839_v20 = vpop.eup %2838 }
 0x7f7   : > { %v2022_v22 = vmul.f32 %v2839_v20, %v2014_v12 }
 0x7f9   : > { %v2029_v24 = vmul.f32 %v2528_v21, %v2022_v22 }
 0x7fb   : > { %v2036_v25 = vadd.f32 %v2529_v23, %v2029_v24 }
 0x7fd   : > { %v2037_v26 = vpack.c.bf16 %v2036_v25, %v2036_v25 }
 0x7ff   : > { %2677 = vmatmul.mubr.msk.bf16.vlgmr.msra.gmra.mrb[28].mxu0 %vm604_vm0, %v2037_v26 }
 0x8d2   : > { %v2106_v35 = vpop.f32.mrb[28].mxu0 }
 0x8d3   : > { %v2107_v36 = vadd.f32 %v2531_v34, %v2106_v35  ;;  %v2678_v38 = vpop.f32.mrb[29].mxu0 }
 0x8d4   : > { %v2109_v39 = vpop.f32.mrb[30].mxu0 }
 0x8d5   : > { %v2113_v37 = vmul.f32 0.044715, %v2107_v36  ;;  %v2679_v40 = vpop.f32.mrb[31].mxu0  ;;  %v2112_v8 = vmul.f32 0.5, %v2107_v36 }
 0x8d7   : > { %v2114_v41 = vmul.f32 %v2113_v37, %v2107_v36 }
 0x8d9   : > { %v2115_v42 = vmul.f32 %v2114_v41, %v2107_v36 }
 0x8db   : > { %v2116_v43 = vadd.f32 %v2115_v42, %v2107_v36 }
 0x8dd   : > { %v2117_v44 = vmul.f32 0.7978846, %v2116_v43 }
 0x8df   : > { %2840 = vtanh.f32 %v2117_v44 }
 0x8e9   : > { %v2841_v45 = vpop.eup %2840 }
 0x8ea   : > { %v2119_v46 = vadd.f32 1.0, %v2841_v45 }
 0x8ec   : > { %v2120_v47 = vmul.f32 %v2119_v46, %v2112_v8 }
 0x8ee   : > { %v2121_v48 = vpack.c.bf16 %v2120_v47, %v2120_v47 }
 0x8f0   : > { %2697 = vmatmul.mubr.bf16.vlgmr.msra.gmra.mrb[20].mxu1 %v2121_v48 }
 0x9c3   : > { %v2220_v51 = vpop.f32.mrb[20].mxu1 }
 0x9c4   : > { %v2226_v52 = vadd.f32 %v2220_v51, %v2045_v50  ;;  %v2698_v53 = vpop.f32.mrb[21].mxu1 }
 0x9c5   : > { %v2223_v54 = vpop.f32.mrb[22].mxu1 }
 0x9c6   : > { %v2699_v55 = vpop.f32.mrb[23].mxu1  ;;  %2227 = vst.msk [vmem:[%s591_s17] sm:$0xff] %vm604_vm0, %v2226_v52 }
 0x9c7   : > { %2939 = shalt.err (!%p2936_p6)
}
 0x9c8   : > { %s2940_s1 = scalar_lea.hbm %s3492_s29, 128  ;;  %s2944_s18 = scalar_lea.hbm %s3598_s22, 256 }
 0x9c9   : > { %p2941_p7 = scmp.ne.s32.totalorder %s3492_s29, %s2940_s1  ;;  %p2945_p0 = scmp.lt.u32.totalorder %s3492_s29, %s3598_s22 }
 0x9ca   : > { %p2946_p2 = scmp.lt.u32.totalorder %s2944_s18, %s2940_s1  ;;  %p2948_p13 = scmp.lt.u32.totalorder %s2940_s1, %s3492_s29 }
 0x9cb   : > { %p2942_p9 = pnand %p2941_p7, %p3599_p4 }
 0x9cc   : > { %p2947_p1 = por %p2946_p2, %p2945_p0 }
 0x9cd   : > { %p2943_p12 = pneg %p2942_p9 }
 0x9ce   : > { %p2949_p8 = por %p2948_p13, %p2947_p1 }
 0x9d0   : > { %p2950_p10 = pnand %p2949_p8, %p2943_p12 }
 0x9d2   : > { %2953 = shalt.err (!%p2950_p10)
}
 0x9d3   : > { %2712 = dma.vmem_to_hbm [thread:$0]  (%p3599_p4), %s3494_s26, 128, %s3492_s29, %s2229_s27  }
 0x9d4 PF: > { %s3600_s24 = sld [smem:[#allocation19_spill]]  ;;  %s3601_s19 = sld [smem:[#allocation16_spill]] }
 0x9d5   : > { %s3602_s20 = sld [smem:[#allocation22_spill]] }
 0x9da   : > { %p2734_p11 = scmp.ge.s32.totalorder %s3600_s24, 2  ;;  %s2255_s16 = sand.u32 1, %s3601_s19  }
 0x9db   : > { %p3603_p3 = scmp.ne.s32.totalorder %s3602_s20, 0  ;;  %s2256_s28 = scalar_lea.sflag [#allocation8], %s2255_s16 }
 0x9dd   : > { %p2725_p5 = pnand %p2734_p11, %p3603_p3 }
 0x9df   : > { %2987 = dma.done.wait (!%p2725_p5), %s2256_s28, 128  }
 0x9e0   : > { %2989 = vsyncadd (!%p2725_p5), %s2256_s28, 4294967168  ;;  %s32_s29 = sadd.s32 1, %s3600_s24   ;;  %s3604_s21 = sld [smem:[#allocation17_spill]] }
 0x9e1   : > { %p29_p6 = scmp.ge.s32.totalorder %s32_s29, 4   ;;  %s3605_s26 = sld [smem:[#allocation23_spill]] }
 0x9e2   : > { %s3606_s27 = sld [smem:[#allocation18_spill]]  ;;  %s3607_s28 = sld [smem:[#allocation20_spill]] }
 0x9e3   : > { %s3608_s24 = smov %s2996_s25  ;;  %31 = sbr.rel (!%p29_p6) target bundleno = 12 (0xc), region = 236 }
 0x9e6   : > { %s3609_s25 = smov %s3604_s21 }
 0x9ea   :  { %2261 = vsyncpa [#allocation7], 1 }
 0x9eb   :  { %2263 = vsyncpa [#allocation7 + $0x1], 1 }
 0x9ec   :  { %2264 = vsyncpa [#allocation10], 1 }
 0x9ed   :  { %2265 = vsyncpa [#allocation8], 1 }
 0x9ee   :  { %2267 = vsyncpa [#allocation8 + $0x1], 1 }

</bundles_post_ra>
